<compile_context>
chip_gen: v7x
topology: tpu7x:2x2x1
jax: 0.10.0
libtpu: 0.0.40
codegen_flags: <defaults>
</compile_context>

<pallas_src>
import functools

import jax
import jax.numpy as jnp
from jax.experimental import pallas as pl
from jax.experimental.pallas import tpu as pltpu


# ---------------------------------------------------------------------------
# Fused kernel: embedding + all bi-LSTM layers + classifier MLP, all in VMEM.
# PyTorch gate order: i, f, g, o ; c' = f*c + i*g ; h' = o*tanh(c')
# ---------------------------------------------------------------------------
def _fused_lstm_net_kernel(*refs, num_layers, seq_len, hidden, batch, vocab):
    T, H, Bp, V = seq_len, hidden, batch, vocab
    G = 4 * H
    f32, bf16 = jnp.float32, jnp.bfloat16

    ids_ref, emb_ref = refs[0], refs[1]
    layer_refs = [refs[2 + 3 * l: 5 + 3 * l] for l in range(num_layers)]
    mlp_off = 2 + 3 * num_layers
    w1, b1, w2, b2, w3, b3, w4, b4 = refs[mlp_off: mlp_off + 8]
    out_ref = refs[mlp_off + 8]
    gx_ref = refs[mlp_off + 9]                      # (T*Bp, 8H) f32 scratch

    def gate_step(gates, c):
        # gates: (R, 4H) f32 in PyTorch order [i | f | g | o]
        # Two full-width EUP passes, then cheap aligned/VPU work.
        s = jax.nn.sigmoid(gates)
        th = jnp.tanh(gates)
        i_g = s[:, 0:H]
        f_g = s[:, H:2 * H]
        g_g = th[:, 2 * H:3 * H]
        o_g = s[:, 3 * H:4 * H]
        c_new = f_g * c + i_g * g_g
        h_new = o_g * jnp.tanh(c_new)
        return h_new, c_new

    # ---- embedding gather fused in-kernel: one-hot (iota compare) matmul ----
    ids = ids_ref[...]                                        # (T*Bp, 1) int32
    onehot = (jax.lax.broadcasted_iota(jnp.int32, (T * Bp, V), 1)
              == ids).astype(bf16)                            # (T*Bp, V)
    x = jnp.dot(onehot, emb_ref[...], preferred_element_type=f32)   # (T*Bp, E)

    xf = x.astype(bf16)          # layer input, forward-feature rows
    xb = None                    # layer input, backward-feature rows (l > 0)
    h_f_last = None
    h_b_last = None

    for l in range(num_layers):
        wih_ref, whh_ref, b_ref = layer_refs[l]
        is_last = (l == num_layers - 1)

        # ---- hoisted input projection: one pass over all timesteps, both
        #      directions (columns [0:4H] = fwd gates, [4H:8H] = bwd) --------
        wih = wih_ref[...]                                    # bf16
        if l == 0:
            gx = jnp.dot(xf, wih, preferred_element_type=f32)
        else:
            gx = (jnp.dot(xf, wih[:H, :], preferred_element_type=f32)
                  + jnp.dot(xb, wih[H:, :], preferred_element_type=f32))
        # Stage in VMEM so the unrolled loop reads aligned 8-row slices
        # instead of pinning the whole (T*Bp, 8H) value in vregs.
        gx_ref[...] = gx + b_ref[...]

        whh = whh_ref[...]                                    # (H, 8H) bf16

        if not is_last:
            # ---- fused fwd+bwd recurrence: ONE matmul per unrolled step ----
            h = jnp.zeros((2 * Bp, H), f32)                   # [h_f ; h_b]
            c = jnp.zeros((2 * Bp, H), f32)
            hs_f = [None] * T
            hs_b = [None] * T
            for s in range(T):
                tf_ = s                  # forward processes time s
                tb_ = T - 1 - s          # backward processes time T-1-s
                hW = jnp.dot(h.astype(bf16), whh,
                             preferred_element_type=f32)      # (2Bp, 8H)
                gates_f = gx_ref[tf_ * Bp:(tf_ + 1) * Bp, 0:G] + hW[0:Bp, 0:G]
                gates_b = (gx_ref[tb_ * Bp:(tb_ + 1) * Bp, G:2 * G]
                           + hW[Bp:2 * Bp, G:2 * G])
                gates = jnp.concatenate([gates_f, gates_b], axis=0)
                h, c = gate_step(gates, c)
                hs_f[tf_] = h[0:Bp, :]
                hs_b[tb_] = h[Bp:2 * Bp, :]
            # Layer output kept as values (no masked VMEM stores).
            xf = jnp.concatenate(hs_f, axis=0).astype(bf16)   # (T*Bp, H)
            xb = jnp.concatenate(hs_b, axis=0).astype(bf16)   # (T*Bp, H)
        else:
            # ---- last layer: forward chain + ONE backward step on x[T-1] ---
            whh_f = whh[:, 0:G]
            h = jnp.zeros((Bp, H), f32)
            c = jnp.zeros((Bp, H), f32)
            for t in range(T):
                gates = gx_ref[t * Bp:(t + 1) * Bp, 0:G] + jnp.dot(
                    h.astype(bf16), whh_f, preferred_element_type=f32)
                h, c = gate_step(gates, c)
            h_f_last = h
            # output[:, T-1, :] of the backward direction = first bwd step
            # with zero initial state (default nn.LSTM initial state).
            h_b_last, _ = gate_step(gx_ref[(T - 1) * Bp:T * Bp, G:2 * G],
                                    jnp.zeros((Bp, H), f32))

    # ---- classifier MLP (dropout = identity in eval mode) ----
    w1v = w1[...]                                             # (2H, 512) bf16
    z = (jnp.dot(h_f_last.astype(bf16), w1v[:H, :], preferred_element_type=f32)
         + jnp.dot(h_b_last.astype(bf16), w1v[H:, :], preferred_element_type=f32)
         + b1[...])
    z = jnp.maximum(z, 0.0)
    z = jnp.maximum(
        jnp.dot(z.astype(bf16), w2[...], preferred_element_type=f32) + b2[...],
        0.0)
    z = jnp.maximum(
        jnp.dot(z.astype(bf16), w3[...], preferred_element_type=f32) + b3[...],
        0.0)
    out_ref[...] = (jnp.dot(z, w4[...], preferred_element_type=f32)
                    + b4[...]).astype(out_ref.dtype)


# ---------------------------------------------------------------------------
# Full LSTM_Net forward (single fused pallas_call)
# ---------------------------------------------------------------------------
def lstm_net_forward(ids, params):
    B, T = ids.shape
    H = params["lstm"][0]["whh"].shape[0]
    num_layers = len(params["lstm"])
    emb = params["embedding"]
    V, _ = emb.shape

    # Pad batch to a multiple of 8 so (B,4H)/(B,H) tiles fill f32 sublanes;
    # pad vocab rows to a multiple of 8 for the one-hot matmul.
    Bp = max(8, ((B + 7) // 8) * 8)
    Vp = ((V + 7) // 8) * 8

    ids_p = jnp.pad(ids.astype(jnp.int32), ((0, Bp - B), (0, 0)))
    # time-major flattened layout: row t*Bp + b = token (batch b, time t)
    ids_tm = ids_p.T.reshape(T * Bp, 1)
    emb_p = jnp.pad(emb, ((0, Vp - V), (0, 0)))

    args = [ids_tm, emb_p]
    for layer in params["lstm"]:
        args += [layer["wih"], layer["whh"], layer["b"]]
    args += list(params["mlp"])

    kernel = functools.partial(_fused_lstm_net_kernel, num_layers=num_layers,
                               seq_len=T, hidden=H, batch=Bp, vocab=Vp)
    out = pl.pallas_call(
        kernel,
        out_shape=jax.ShapeDtypeStruct((Bp, 1), jnp.float32),
        in_specs=[pl.BlockSpec(memory_space=pltpu.MemorySpace.VMEM)] * len(args),
        out_specs=pl.BlockSpec(memory_space=pltpu.MemorySpace.VMEM),
        scratch_shapes=[pltpu.VMEM((T * Bp, 8 * H), jnp.float32)],  # gx stage
    )(*args)
    return out[:B]


# ---------------------------------------------------------------------------
# Deterministic parameter construction.
#   wih : (in_dim, 8H)  bf16  = [W_ih_fwd^T | W_ih_bwd^T]
#   whh : (H, 8H)       bf16  = [W_hh_fwd^T | W_hh_bwd^T]
#   b   : (1, 8H)       f32   = [b_ih+b_hh fwd | b_ih+b_hh bwd]
# MLP weights bf16 (pre-transposed), biases f32; final (128,1) weight f32.
# ---------------------------------------------------------------------------
def make_params(key, vocab, emb_dim, hidden, num_layers):
    keys = iter(jax.random.split(key, 64))
    k = 1.0 / jnp.sqrt(hidden)

    def u(shape, scale=k):
        return jax.random.uniform(next(keys), shape, jnp.float32, -scale, scale)

    params = {"embedding": (jax.random.normal(next(keys), (vocab, emb_dim),
                                              jnp.float32) * 0.1
                            ).astype(jnp.bfloat16)}

    layers = []
    for l in range(num_layers):
        in_dim = emb_dim if l == 0 else 2 * hidden
        wih_f = u((in_dim, 4 * hidden))
        wih_b = u((in_dim, 4 * hidden))
        b_f = u((1, 4 * hidden)) + u((1, 4 * hidden))   # b_ih + b_hh (fwd)
        b_b = u((1, 4 * hidden)) + u((1, 4 * hidden))   # b_ih + b_hh (bwd)
        layers.append({
            "wih": jnp.concatenate([wih_f, wih_b], axis=1).astype(jnp.bfloat16),
            "whh": jnp.concatenate([u((hidden, 4 * hidden)),
                                    u((hidden, 4 * hidden))],
                                   axis=1).astype(jnp.bfloat16),
            "b": jnp.concatenate([b_f, b_b], axis=1),
        })
    params["lstm"] = layers

    dims = [2 * hidden, 512, 256, 128, 1]
    mlp = []
    for i in range(4):
        kl = 1.0 / jnp.sqrt(dims[i])
        w = u((dims[i], dims[i + 1]), kl)
        mlp.append(w.astype(jnp.bfloat16) if i < 3 else w)   # last layer f32
        mlp.append(u((1, dims[i + 1]), kl))
    params["mlp"] = mlp
    return params


if __name__ == "__main__":
    B, T = 2, 8            # batch, sequence length (sen_len)
    VOCAB, EMB, HID, NLAYERS = 50, 32, 32, 2

    key = jax.random.PRNGKey(0)
    pkey, dkey = jax.random.split(key)
    params = make_params(pkey, VOCAB, EMB, HID, NLAYERS)
    ids = jax.random.randint(dkey, (B, T), 0, VOCAB, dtype=jnp.int32)

    out = jax.jit(lstm_net_forward)(ids, params)
    out = jax.block_until_ready(out)
    assert out.shape == (B, 1) and out.dtype == jnp.float32
    assert bool(jnp.all(jnp.isfinite(out)))
    print("KERNEL_OK")
</pallas_src>

<mosaic_0001>
module attributes {stable_mosaic.version = 11 : i64} {
  func.func @_fused_lstm_net_kernel(%arg0: memref<64x1xi32, #tpu.memory_space<vmem>>, %arg1: memref<56x32xbf16, #tpu.memory_space<vmem>>, %arg2: memref<32x256xbf16, #tpu.memory_space<vmem>>, %arg3: memref<32x256xbf16, #tpu.memory_space<vmem>>, %arg4: memref<1x256xf32, #tpu.memory_space<vmem>>, %arg5: memref<64x256xbf16, #tpu.memory_space<vmem>>, %arg6: memref<32x256xbf16, #tpu.memory_space<vmem>>, %arg7: memref<1x256xf32, #tpu.memory_space<vmem>>, %arg8: memref<64x512xbf16, #tpu.memory_space<vmem>>, %arg9: memref<1x512xf32, #tpu.memory_space<vmem>>, %arg10: memref<512x256xbf16, #tpu.memory_space<vmem>>, %arg11: memref<1x256xf32, #tpu.memory_space<vmem>>, %arg12: memref<256x128xbf16, #tpu.memory_space<vmem>>, %arg13: memref<1x128xf32, #tpu.memory_space<vmem>>, %arg14: memref<128x1xf32, #tpu.memory_space<vmem>>, %arg15: memref<1x1xf32, #tpu.memory_space<vmem>>, %arg16: memref<8x1xf32, #tpu.memory_space<vmem>>, %arg17: memref<64x256xf32, #tpu.memory_space<vmem>>) attributes {dimension_semantics = [], scalar_prefetch = 0 : i64, scratch_operands = 1 : i64, tpu.core_type = #tpu.core_type<tc>} {
    %c0 = arith.constant 0 : index
    %c0_0 = arith.constant 0 : index
    %0 = vector.load %arg0[%c0, %c0_0] : memref<64x1xi32, #tpu.memory_space<vmem>>, vector<64x1xi32>
    %1 = tpu.iota {dimensions = array<i32: 1>} : vector<64x56xi32>
    %2 = vector.broadcast %0 : vector<64x1xi32> to vector<64x56xi32>
    %3 = arith.cmpi eq, %1, %2 : vector<64x56xi32>
    %4 = arith.extui %3 : vector<64x56xi1> to vector<64x56xi32>
    %5 = arith.sitofp %4 : vector<64x56xi32> to vector<64x56xf32>
    %6 = arith.truncf %5 : vector<64x56xf32> to vector<64x56xbf16>
    %c0_1 = arith.constant 0 : index
    %c0_2 = arith.constant 0 : index
    %7 = vector.load %arg1[%c0_1, %c0_2] : memref<56x32xbf16, #tpu.memory_space<vmem>>, vector<56x32xbf16>
    %cst = arith.constant dense<0.000000e+00> : vector<64x32xf32>
    %8 = tpu.matmul %6, %7, %cst {dimension_numbers = #tpu.dot_dimension_numbers<[1], [0], [0], [1], [0, 0, 1, 1], [], []>} : vector<64x56xbf16>, vector<56x32xbf16>, vector<64x32xf32> -> vector<64x32xf32>
    %9 = arith.truncf %8 : vector<64x32xf32> to vector<64x32xbf16>
    %c0_3 = arith.constant 0 : index
    %c0_4 = arith.constant 0 : index
    %10 = vector.load %arg2[%c0_3, %c0_4] : memref<32x256xbf16, #tpu.memory_space<vmem>>, vector<32x256xbf16>
    %cst_5 = arith.constant dense<0.000000e+00> : vector<64x256xf32>
    %11 = tpu.matmul %9, %10, %cst_5 {dimension_numbers = #tpu.dot_dimension_numbers<[1], [0], [0], [1], [0, 0, 1, 1], [], []>} : vector<64x32xbf16>, vector<32x256xbf16>, vector<64x256xf32> -> vector<64x256xf32>
    %c0_6 = arith.constant 0 : index
    %c0_7 = arith.constant 0 : index
    %12 = vector.load %arg4[%c0_6, %c0_7] : memref<1x256xf32, #tpu.memory_space<vmem>>, vector<1x256xf32>
    %13 = vector.broadcast %12 : vector<1x256xf32> to vector<64x256xf32>
    %14 = arith.addf %11, %13 : vector<64x256xf32>
    %c0_8 = arith.constant 0 : index
    %c0_9 = arith.constant 0 : index
    %15 = vector.load %arg17[%c0_8, %c0_9] : memref<64x256xf32, #tpu.memory_space<vmem>>, vector<64x256xf32>
    tpu.vector_store %arg17[%c0_8, %c0_9], %14 {strides = array<i32>} : memref<64x256xf32, #tpu.memory_space<vmem>>, vector<64x256xf32>,
    %c0_10 = arith.constant 0 : index
    %c0_11 = arith.constant 0 : index
    %16 = vector.load %arg3[%c0_10, %c0_11] : memref<32x256xbf16, #tpu.memory_space<vmem>>, vector<32x256xbf16>
    %cst_12 = arith.constant 0.000000e+00 : f32
    %17 = vector.broadcast %cst_12 : f32 to vector<16x32xf32>
    %cst_13 = arith.constant 0.000000e+00 : f32
    %18 = vector.broadcast %cst_13 : f32 to vector<16x32xf32>
    %19 = arith.truncf %17 : vector<16x32xf32> to vector<16x32xbf16>
    %cst_14 = arith.constant dense<0.000000e+00> : vector<16x256xf32>
    %20 = tpu.matmul %19, %16, %cst_14 {dimension_numbers = #tpu.dot_dimension_numbers<[1], [0], [0], [1], [0, 0, 1, 1], [], []>} : vector<16x32xbf16>, vector<32x256xbf16>, vector<16x256xf32> -> vector<16x256xf32>
    %c0_15 = arith.constant 0 : index
    %c0_16 = arith.constant 0 : index
    %21 = vector.load %arg17[%c0_15, %c0_16] : memref<64x256xf32, #tpu.memory_space<vmem>>, vector<8x128xf32>
    %22 = vector.extract_strided_slice %20 {offsets = [0, 0], sizes = [8, 128], strides = [1, 1]} : vector<16x256xf32> to vector<8x128xf32>
    %23 = arith.addf %21, %22 : vector<8x128xf32>
    %c56 = arith.constant 56 : index
    %c128 = arith.constant 128 : index
    %24 = vector.load %arg17[%c56, %c128] : memref<64x256xf32, #tpu.memory_space<vmem>>, vector<8x128xf32>
    %25 = vector.extract_strided_slice %20 {offsets = [8, 128], sizes = [8, 128], strides = [1, 1]} : vector<16x256xf32> to vector<8x128xf32>
    %26 = arith.addf %24, %25 : vector<8x128xf32>
    %27 = tpu.concatenate %23, %26 in 0 : vector<8x128xf32>, vector<8x128xf32> -> vector<16x128xf32>
    %28 = arith.negf %27 : vector<16x128xf32>
    %29 = math.exp %28 : vector<16x128xf32>
    %cst_17 = arith.constant 1.000000e+00 : f32
    %30 = vector.broadcast %cst_17 : f32 to vector<16x128xf32>
    %31 = arith.addf %30, %29 : vector<16x128xf32>
    %32 = arith.divf %30, %31 : vector<16x128xf32>
    %33 = math.tanh %27 : vector<16x128xf32>
    %34 = vector.extract_strided_slice %32 {offsets = [0, 0], sizes = [16, 32], strides = [1, 1]} : vector<16x128xf32> to vector<16x32xf32>
    %35 = vector.extract_strided_slice %32 {offsets = [0, 32], sizes = [16, 32], strides = [1, 1]} : vector<16x128xf32> to vector<16x32xf32>
    %36 = vector.extract_strided_slice %33 {offsets = [0, 64], sizes = [16, 32], strides = [1, 1]} : vector<16x128xf32> to vector<16x32xf32>
    %37 = vector.extract_strided_slice %32 {offsets = [0, 96], sizes = [16, 32], strides = [1, 1]} : vector<16x128xf32> to vector<16x32xf32>
    %38 = arith.mulf %35, %18 : vector<16x32xf32>
    %39 = arith.mulf %34, %36 : vector<16x32xf32>
    %40 = arith.addf %38, %39 : vector<16x32xf32>
    %41 = math.tanh %40 : vector<16x32xf32>
    %42 = arith.mulf %37, %41 : vector<16x32xf32>
    %43 = vector.extract_strided_slice %42 {offsets = [0, 0], sizes = [8, 32], strides = [1, 1]} : vector<16x32xf32> to vector<8x32xf32>
    %44 = vector.extract_strided_slice %42 {offsets = [8, 0], sizes = [8, 32], strides = [1, 1]} : vector<16x32xf32> to vector<8x32xf32>
    %45 = arith.truncf %42 : vector<16x32xf32> to vector<16x32xbf16>
    %cst_18 = arith.constant dense<0.000000e+00> : vector<16x256xf32>
    %46 = tpu.matmul %45, %16, %cst_18 {dimension_numbers = #tpu.dot_dimension_numbers<[1], [0], [0], [1], [0, 0, 1, 1], [], []>} : vector<16x32xbf16>, vector<32x256xbf16>, vector<16x256xf32> -> vector<16x256xf32>
    %c8 = arith.constant 8 : index
    %c0_19 = arith.constant 0 : index
    %47 = vector.load %arg17[%c8, %c0_19] : memref<64x256xf32, #tpu.memory_space<vmem>>, vector<8x128xf32>
    %48 = vector.extract_strided_slice %46 {offsets = [0, 0], sizes = [8, 128], strides = [1, 1]} : vector<16x256xf32> to vector<8x128xf32>
    %49 = arith.addf %47, %48 : vector<8x128xf32>
    %c48 = arith.constant 48 : index
    %c128_20 = arith.constant 128 : index
    %50 = vector.load %arg17[%c48, %c128_20] : memref<64x256xf32, #tpu.memory_space<vmem>>, vector<8x128xf32>
    %51 = vector.extract_strided_slice %46 {offsets = [8, 128], sizes = [8, 128], strides = [1, 1]} : vector<16x256xf32> to vector<8x128xf32>
    %52 = arith.addf %50, %51 : vector<8x128xf32>
    %53 = tpu.concatenate %49, %52 in 0 : vector<8x128xf32>, vector<8x128xf32> -> vector<16x128xf32>
    %54 = arith.negf %53 : vector<16x128xf32>
    %55 = math.exp %54 : vector<16x128xf32>
    %cst_21 = arith.constant 1.000000e+00 : f32
    %56 = vector.broadcast %cst_21 : f32 to vector<16x128xf32>
    %57 = arith.addf %56, %55 : vector<16x128xf32>
    %58 = arith.divf %56, %57 : vector<16x128xf32>
    %59 = math.tanh %53 : vector<16x128xf32>
    %60 = vector.extract_strided_slice %58 {offsets = [0, 0], sizes = [16, 32], strides = [1, 1]} : vector<16x128xf32> to vector<16x32xf32>
    %61 = vector.extract_strided_slice %58 {offsets = [0, 32], sizes = [16, 32], strides = [1, 1]} : vector<16x128xf32> to vector<16x32xf32>
    %62 = vector.extract_strided_slice %59 {offsets = [0, 64], sizes = [16, 32], strides = [1, 1]} : vector<16x128xf32> to vector<16x32xf32>
    %63 = vector.extract_strided_slice %58 {offsets = [0, 96], sizes = [16, 32], strides = [1, 1]} : vector<16x128xf32> to vector<16x32xf32>
    %64 = arith.mulf %61, %40 : vector<16x32xf32>
    %65 = arith.mulf %60, %62 : vector<16x32xf32>
    %66 = arith.addf %64, %65 : vector<16x32xf32>
    %67 = math.tanh %66 : vector<16x32xf32>
    %68 = arith.mulf %63, %67 : vector<16x32xf32>
    %69 = vector.extract_strided_slice %68 {offsets = [0, 0], sizes = [8, 32], strides = [1, 1]} : vector<16x32xf32> to vector<8x32xf32>
    %70 = vector.extract_strided_slice %68 {offsets = [8, 0], sizes = [8, 32], strides = [1, 1]} : vector<16x32xf32> to vector<8x32xf32>
    %71 = arith.truncf %68 : vector<16x32xf32> to vector<16x32xbf16>
    %cst_22 = arith.constant dense<0.000000e+00> : vector<16x256xf32>
    %72 = tpu.matmul %71, %16, %cst_22 {dimension_numbers = #tpu.dot_dimension_numbers<[1], [0], [0], [1], [0, 0, 1, 1], [], []>} : vector<16x32xbf16>, vector<32x256xbf16>, vector<16x256xf32> -> vector<16x256xf32>
    %c16 = arith.constant 16 : index
    %c0_23 = arith.constant 0 : index
    %73 = vector.load %arg17[%c16, %c0_23] : memref<64x256xf32, #tpu.memory_space<vmem>>, vector<8x128xf32>
    %74 = vector.extract_strided_slice %72 {offsets = [0, 0], sizes = [8, 128], strides = [1, 1]} : vector<16x256xf32> to vector<8x128xf32>
    %75 = arith.addf %73, %74 : vector<8x128xf32>
    %c40 = arith.constant 40 : index
    %c128_24 = arith.constant 128 : index
    %76 = vector.load %arg17[%c40, %c128_24] : memref<64x256xf32, #tpu.memory_space<vmem>>, vector<8x128xf32>
    %77 = vector.extract_strided_slice %72 {offsets = [8, 128], sizes = [8, 128], strides = [1, 1]} : vector<16x256xf32> to vector<8x128xf32>
    %78 = arith.addf %76, %77 : vector<8x128xf32>
    %79 = tpu.concatenate %75, %78 in 0 : vector<8x128xf32>, vector<8x128xf32> -> vector<16x128xf32>
    %80 = arith.negf %79 : vector<16x128xf32>
    %81 = math.exp %80 : vector<16x128xf32>
    %cst_25 = arith.constant 1.000000e+00 : f32
    %82 = vector.broadcast %cst_25 : f32 to vector<16x128xf32>
    %83 = arith.addf %82, %81 : vector<16x128xf32>
    %84 = arith.divf %82, %83 : vector<16x128xf32>
    %85 = math.tanh %79 : vector<16x128xf32>
    %86 = vector.extract_strided_slice %84 {offsets = [0, 0], sizes = [16, 32], strides = [1, 1]} : vector<16x128xf32> to vector<16x32xf32>
    %87 = vector.extract_strided_slice %84 {offsets = [0, 32], sizes = [16, 32], strides = [1, 1]} : vector<16x128xf32> to vector<16x32xf32>
    %88 = vector.extract_strided_slice %85 {offsets = [0, 64], sizes = [16, 32], strides = [1, 1]} : vector<16x128xf32> to vector<16x32xf32>
    %89 = vector.extract_strided_slice %84 {offsets = [0, 96], sizes = [16, 32], strides = [1, 1]} : vector<16x128xf32> to vector<16x32xf32>
    %90 = arith.mulf %87, %66 : vector<16x32xf32>
    %91 = arith.mulf %86, %88 : vector<16x32xf32>
    %92 = arith.addf %90, %91 : vector<16x32xf32>
    %93 = math.tanh %92 : vector<16x32xf32>
    %94 = arith.mulf %89, %93 : vector<16x32xf32>
    %95 = vector.extract_strided_slice %94 {offsets = [0, 0], sizes = [8, 32], strides = [1, 1]} : vector<16x32xf32> to vector<8x32xf32>
    %96 = vector.extract_strided_slice %94 {offsets = [8, 0], sizes = [8, 32], strides = [1, 1]} : vector<16x32xf32> to vector<8x32xf32>
    %97 = arith.truncf %94 : vector<16x32xf32> to vector<16x32xbf16>
    %cst_26 = arith.constant dense<0.000000e+00> : vector<16x256xf32>
    %98 = tpu.matmul %97, %16, %cst_26 {dimension_numbers = #tpu.dot_dimension_numbers<[1], [0], [0], [1], [0, 0, 1, 1], [], []>} : vector<16x32xbf16>, vector<32x256xbf16>, vector<16x256xf32> -> vector<16x256xf32>
    %c24 = arith.constant 24 : index
    %c0_27 = arith.constant 0 : index
    %99 = vector.load %arg17[%c24, %c0_27] : memref<64x256xf32, #tpu.memory_space<vmem>>, vector<8x128xf32>
    %100 = vector.extract_strided_slice %98 {offsets = [0, 0], sizes = [8, 128], strides = [1, 1]} : vector<16x256xf32> to vector<8x128xf32>
    %101 = arith.addf %99, %100 : vector<8x128xf32>
    %c32 = arith.constant 32 : index
    %c128_28 = arith.constant 128 : index
    %102 = vector.load %arg17[%c32, %c128_28] : memref<64x256xf32, #tpu.memory_space<vmem>>, vector<8x128xf32>
    %103 = vector.extract_strided_slice %98 {offsets = [8, 128], sizes = [8, 128], strides = [1, 1]} : vector<16x256xf32> to vector<8x128xf32>
    %104 = arith.addf %102, %103 : vector<8x128xf32>
    %105 = tpu.concatenate %101, %104 in 0 : vector<8x128xf32>, vector<8x128xf32> -> vector<16x128xf32>
    %106 = arith.negf %105 : vector<16x128xf32>
    %107 = math.exp %106 : vector<16x128xf32>
    %cst_29 = arith.constant 1.000000e+00 : f32
    %108 = vector.broadcast %cst_29 : f32 to vector<16x128xf32>
    %109 = arith.addf %108, %107 : vector<16x128xf32>
    %110 = arith.divf %108, %109 : vector<16x128xf32>
    %111 = math.tanh %105 : vector<16x128xf32>
    %112 = vector.extract_strided_slice %110 {offsets = [0, 0], sizes = [16, 32], strides = [1, 1]} : vector<16x128xf32> to vector<16x32xf32>
    %113 = vector.extract_strided_slice %110 {offsets = [0, 32], sizes = [16, 32], strides = [1, 1]} : vector<16x128xf32> to vector<16x32xf32>
    %114 = vector.extract_strided_slice %111 {offsets = [0, 64], sizes = [16, 32], strides = [1, 1]} : vector<16x128xf32> to vector<16x32xf32>
    %115 = vector.extract_strided_slice %110 {offsets = [0, 96], sizes = [16, 32], strides = [1, 1]} : vector<16x128xf32> to vector<16x32xf32>
    %116 = arith.mulf %113, %92 : vector<16x32xf32>
    %117 = arith.mulf %112, %114 : vector<16x32xf32>
    %118 = arith.addf %116, %117 : vector<16x32xf32>
    %119 = math.tanh %118 : vector<16x32xf32>
    %120 = arith.mulf %115, %119 : vector<16x32xf32>
    %121 = vector.extract_strided_slice %120 {offsets = [0, 0], sizes = [8, 32], strides = [1, 1]} : vector<16x32xf32> to vector<8x32xf32>
    %122 = vector.extract_strided_slice %120 {offsets = [8, 0], sizes = [8, 32], strides = [1, 1]} : vector<16x32xf32> to vector<8x32xf32>
    %123 = arith.truncf %120 : vector<16x32xf32> to vector<16x32xbf16>
    %cst_30 = arith.constant dense<0.000000e+00> : vector<16x256xf32>
    %124 = tpu.matmul %123, %16, %cst_30 {dimension_numbers = #tpu.dot_dimension_numbers<[1], [0], [0], [1], [0, 0, 1, 1], [], []>} : vector<16x32xbf16>, vector<32x256xbf16>, vector<16x256xf32> -> vector<16x256xf32>
    %c32_31 = arith.constant 32 : index
    %c0_32 = arith.constant 0 : index
    %125 = vector.load %arg17[%c32_31, %c0_32] : memref<64x256xf32, #tpu.memory_space<vmem>>, vector<8x128xf32>
    %126 = vector.extract_strided_slice %124 {offsets = [0, 0], sizes = [8, 128], strides = [1, 1]} : vector<16x256xf32> to vector<8x128xf32>
    %127 = arith.addf %125, %126 : vector<8x128xf32>
    %c24_33 = arith.constant 24 : index
    %c128_34 = arith.constant 128 : index
    %128 = vector.load %arg17[%c24_33, %c128_34] : memref<64x256xf32, #tpu.memory_space<vmem>>, vector<8x128xf32>
    %129 = vector.extract_strided_slice %124 {offsets = [8, 128], sizes = [8, 128], strides = [1, 1]} : vector<16x256xf32> to vector<8x128xf32>
    %130 = arith.addf %128, %129 : vector<8x128xf32>
    %131 = tpu.concatenate %127, %130 in 0 : vector<8x128xf32>, vector<8x128xf32> -> vector<16x128xf32>
    %132 = arith.negf %131 : vector<16x128xf32>
    %133 = math.exp %132 : vector<16x128xf32>
    %cst_35 = arith.constant 1.000000e+00 : f32
    %134 = vector.broadcast %cst_35 : f32 to vector<16x128xf32>
    %135 = arith.addf %134, %133 : vector<16x128xf32>
    %136 = arith.divf %134, %135 : vector<16x128xf32>
    %137 = math.tanh %131 : vector<16x128xf32>
    %138 = vector.extract_strided_slice %136 {offsets = [0, 0], sizes = [16, 32], strides = [1, 1]} : vector<16x128xf32> to vector<16x32xf32>
    %139 = vector.extract_strided_slice %136 {offsets = [0, 32], sizes = [16, 32], strides = [1, 1]} : vector<16x128xf32> to vector<16x32xf32>
    %140 = vector.extract_strided_slice %137 {offsets = [0, 64], sizes = [16, 32], strides = [1, 1]} : vector<16x128xf32> to vector<16x32xf32>
    %141 = vector.extract_strided_slice %136 {offsets = [0, 96], sizes = [16, 32], strides = [1, 1]} : vector<16x128xf32> to vector<16x32xf32>
    %142 = arith.mulf %139, %118 : vector<16x32xf32>
    %143 = arith.mulf %138, %140 : vector<16x32xf32>
    %144 = arith.addf %142, %143 : vector<16x32xf32>
    %145 = math.tanh %144 : vector<16x32xf32>
    %146 = arith.mulf %141, %145 : vector<16x32xf32>
    %147 = vector.extract_strided_slice %146 {offsets = [0, 0], sizes = [8, 32], strides = [1, 1]} : vector<16x32xf32> to vector<8x32xf32>
    %148 = vector.extract_strided_slice %146 {offsets = [8, 0], sizes = [8, 32], strides = [1, 1]} : vector<16x32xf32> to vector<8x32xf32>
    %149 = arith.truncf %146 : vector<16x32xf32> to vector<16x32xbf16>
    %cst_36 = arith.constant dense<0.000000e+00> : vector<16x256xf32>
    %150 = tpu.matmul %149, %16, %cst_36 {dimension_numbers = #tpu.dot_dimension_numbers<[1], [0], [0], [1], [0, 0, 1, 1], [], []>} : vector<16x32xbf16>, vector<32x256xbf16>, vector<16x256xf32> -> vector<16x256xf32>
    %c40_37 = arith.constant 40 : index
    %c0_38 = arith.constant 0 : index
    %151 = vector.load %arg17[%c40_37, %c0_38] : memref<64x256xf32, #tpu.memory_space<vmem>>, vector<8x128xf32>
    %152 = vector.extract_strided_slice %150 {offsets = [0, 0], sizes = [8, 128], strides = [1, 1]} : vector<16x256xf32> to vector<8x128xf32>
    %153 = arith.addf %151, %152 : vector<8x128xf32>
    %c16_39 = arith.constant 16 : index
    %c128_40 = arith.constant 128 : index
    %154 = vector.load %arg17[%c16_39, %c128_40] : memref<64x256xf32, #tpu.memory_space<vmem>>, vector<8x128xf32>
    %155 = vector.extract_strided_slice %150 {offsets = [8, 128], sizes = [8, 128], strides = [1, 1]} : vector<16x256xf32> to vector<8x128xf32>
    %156 = arith.addf %154, %155 : vector<8x128xf32>
    %157 = tpu.concatenate %153, %156 in 0 : vector<8x128xf32>, vector<8x128xf32> -> vector<16x128xf32>
    %158 = arith.negf %157 : vector<16x128xf32>
    %159 = math.exp %158 : vector<16x128xf32>
    %cst_41 = arith.constant 1.000000e+00 : f32
    %160 = vector.broadcast %cst_41 : f32 to vector<16x128xf32>
    %161 = arith.addf %160, %159 : vector<16x128xf32>
    %162 = arith.divf %160, %161 : vector<16x128xf32>
    %163 = math.tanh %157 : vector<16x128xf32>
    %164 = vector.extract_strided_slice %162 {offsets = [0, 0], sizes = [16, 32], strides = [1, 1]} : vector<16x128xf32> to vector<16x32xf32>
    %165 = vector.extract_strided_slice %162 {offsets = [0, 32], sizes = [16, 32], strides = [1, 1]} : vector<16x128xf32> to vector<16x32xf32>
    %166 = vector.extract_strided_slice %163 {offsets = [0, 64], sizes = [16, 32], strides = [1, 1]} : vector<16x128xf32> to vector<16x32xf32>
    %167 = vector.extract_strided_slice %162 {offsets = [0, 96], sizes = [16, 32], strides = [1, 1]} : vector<16x128xf32> to vector<16x32xf32>
    %168 = arith.mulf %165, %144 : vector<16x32xf32>
    %169 = arith.mulf %164, %166 : vector<16x32xf32>
    %170 = arith.addf %168, %169 : vector<16x32xf32>
    %171 = math.tanh %170 : vector<16x32xf32>
    %172 = arith.mulf %167, %171 : vector<16x32xf32>
    %173 = vector.extract_strided_slice %172 {offsets = [0, 0], sizes = [8, 32], strides = [1, 1]} : vector<16x32xf32> to vector<8x32xf32>
    %174 = vector.extract_strided_slice %172 {offsets = [8, 0], sizes = [8, 32], strides = [1, 1]} : vector<16x32xf32> to vector<8x32xf32>
    %175 = arith.truncf %172 : vector<16x32xf32> to vector<16x32xbf16>
    %cst_42 = arith.constant dense<0.000000e+00> : vector<16x256xf32>
    %176 = tpu.matmul %175, %16, %cst_42 {dimension_numbers = #tpu.dot_dimension_numbers<[1], [0], [0], [1], [0, 0, 1, 1], [], []>} : vector<16x32xbf16>, vector<32x256xbf16>, vector<16x256xf32> -> vector<16x256xf32>
    %c48_43 = arith.constant 48 : index
    %c0_44 = arith.constant 0 : index
    %177 = vector.load %arg17[%c48_43, %c0_44] : memref<64x256xf32, #tpu.memory_space<vmem>>, vector<8x128xf32>
    %178 = vector.extract_strided_slice %176 {offsets = [0, 0], sizes = [8, 128], strides = [1, 1]} : vector<16x256xf32> to vector<8x128xf32>
    %179 = arith.addf %177, %178 : vector<8x128xf32>
    %c8_45 = arith.constant 8 : index
    %c128_46 = arith.constant 128 : index
    %180 = vector.load %arg17[%c8_45, %c128_46] : memref<64x256xf32, #tpu.memory_space<vmem>>, vector<8x128xf32>
    %181 = vector.extract_strided_slice %176 {offsets = [8, 128], sizes = [8, 128], strides = [1, 1]} : vector<16x256xf32> to vector<8x128xf32>
    %182 = arith.addf %180, %181 : vector<8x128xf32>
    %183 = tpu.concatenate %179, %182 in 0 : vector<8x128xf32>, vector<8x128xf32> -> vector<16x128xf32>
    %184 = arith.negf %183 : vector<16x128xf32>
    %185 = math.exp %184 : vector<16x128xf32>
    %cst_47 = arith.constant 1.000000e+00 : f32
    %186 = vector.broadcast %cst_47 : f32 to vector<16x128xf32>
    %187 = arith.addf %186, %185 : vector<16x128xf32>
    %188 = arith.divf %186, %187 : vector<16x128xf32>
    %189 = math.tanh %183 : vector<16x128xf32>
    %190 = vector.extract_strided_slice %188 {offsets = [0, 0], sizes = [16, 32], strides = [1, 1]} : vector<16x128xf32> to vector<16x32xf32>
    %191 = vector.extract_strided_slice %188 {offsets = [0, 32], sizes = [16, 32], strides = [1, 1]} : vector<16x128xf32> to vector<16x32xf32>
    %192 = vector.extract_strided_slice %189 {offsets = [0, 64], sizes = [16, 32], strides = [1, 1]} : vector<16x128xf32> to vector<16x32xf32>
    %193 = vector.extract_strided_slice %188 {offsets = [0, 96], sizes = [16, 32], strides = [1, 1]} : vector<16x128xf32> to vector<16x32xf32>
    %194 = arith.mulf %191, %170 : vector<16x32xf32>
    %195 = arith.mulf %190, %192 : vector<16x32xf32>
    %196 = arith.addf %194, %195 : vector<16x32xf32>
    %197 = math.tanh %196 : vector<16x32xf32>
    %198 = arith.mulf %193, %197 : vector<16x32xf32>
    %199 = vector.extract_strided_slice %198 {offsets = [0, 0], sizes = [8, 32], strides = [1, 1]} : vector<16x32xf32> to vector<8x32xf32>
    %200 = vector.extract_strided_slice %198 {offsets = [8, 0], sizes = [8, 32], strides = [1, 1]} : vector<16x32xf32> to vector<8x32xf32>
    %201 = arith.truncf %198 : vector<16x32xf32> to vector<16x32xbf16>
    %cst_48 = arith.constant dense<0.000000e+00> : vector<16x256xf32>
    %202 = tpu.matmul %201, %16, %cst_48 {dimension_numbers = #tpu.dot_dimension_numbers<[1], [0], [0], [1], [0, 0, 1, 1], [], []>} : vector<16x32xbf16>, vector<32x256xbf16>, vector<16x256xf32> -> vector<16x256xf32>
    %c56_49 = arith.constant 56 : index
    %c0_50 = arith.constant 0 : index
    %203 = vector.load %arg17[%c56_49, %c0_50] : memref<64x256xf32, #tpu.memory_space<vmem>>, vector<8x128xf32>
    %204 = vector.extract_strided_slice %202 {offsets = [0, 0], sizes = [8, 128], strides = [1, 1]} : vector<16x256xf32> to vector<8x128xf32>
    %205 = arith.addf %203, %204 : vector<8x128xf32>
    %c0_51 = arith.constant 0 : index
    %c128_52 = arith.constant 128 : index
    %206 = vector.load %arg17[%c0_51, %c128_52] : memref<64x256xf32, #tpu.memory_space<vmem>>, vector<8x128xf32>
    %207 = vector.extract_strided_slice %202 {offsets = [8, 128], sizes = [8, 128], strides = [1, 1]} : vector<16x256xf32> to vector<8x128xf32>
    %208 = arith.addf %206, %207 : vector<8x128xf32>
    %209 = tpu.concatenate %205, %208 in 0 : vector<8x128xf32>, vector<8x128xf32> -> vector<16x128xf32>
    %210 = arith.negf %209 : vector<16x128xf32>
    %211 = math.exp %210 : vector<16x128xf32>
    %cst_53 = arith.constant 1.000000e+00 : f32
    %212 = vector.broadcast %cst_53 : f32 to vector<16x128xf32>
    %213 = arith.addf %212, %211 : vector<16x128xf32>
    %214 = arith.divf %212, %213 : vector<16x128xf32>
    %215 = math.tanh %209 : vector<16x128xf32>
    %216 = vector.extract_strided_slice %214 {offsets = [0, 0], sizes = [16, 32], strides = [1, 1]} : vector<16x128xf32> to vector<16x32xf32>
    %217 = vector.extract_strided_slice %214 {offsets = [0, 32], sizes = [16, 32], strides = [1, 1]} : vector<16x128xf32> to vector<16x32xf32>
    %218 = vector.extract_strided_slice %215 {offsets = [0, 64], sizes = [16, 32], strides = [1, 1]} : vector<16x128xf32> to vector<16x32xf32>
    %219 = vector.extract_strided_slice %214 {offsets = [0, 96], sizes = [16, 32], strides = [1, 1]} : vector<16x128xf32> to vector<16x32xf32>
    %220 = arith.mulf %217, %196 : vector<16x32xf32>
    %221 = arith.mulf %216, %218 : vector<16x32xf32>
    %222 = arith.addf %220, %221 : vector<16x32xf32>
    %223 = math.tanh %222 : vector<16x32xf32>
    %224 = arith.mulf %219, %223 : vector<16x32xf32>
    %225 = vector.extract_strided_slice %224 {offsets = [0, 0], sizes = [8, 32], strides = [1, 1]} : vector<16x32xf32> to vector<8x32xf32>
    %226 = vector.extract_strided_slice %224 {offsets = [8, 0], sizes = [8, 32], strides = [1, 1]} : vector<16x32xf32> to vector<8x32xf32>
    %227 = tpu.concatenate %43, %69, %95, %121, %147, %173, %199, %225 in 0 : vector<8x32xf32>, vector<8x32xf32>, vector<8x32xf32>, vector<8x32xf32>, vector<8x32xf32>, vector<8x32xf32>, vector<8x32xf32>, vector<8x32xf32> -> vector<64x32xf32>
    %228 = arith.truncf %227 : vector<64x32xf32> to vector<64x32xbf16>
    %229 = tpu.concatenate %226, %200, %174, %148, %122, %96, %70, %44 in 0 : vector<8x32xf32>, vector<8x32xf32>, vector<8x32xf32>, vector<8x32xf32>, vector<8x32xf32>, vector<8x32xf32>, vector<8x32xf32>, vector<8x32xf32> -> vector<64x32xf32>
    %230 = arith.truncf %229 : vector<64x32xf32> to vector<64x32xbf16>
    %c0_54 = arith.constant 0 : index
    %c0_55 = arith.constant 0 : index
    %231 = vector.load %arg5[%c0_54, %c0_55] : memref<64x256xbf16, #tpu.memory_space<vmem>>, vector<64x256xbf16>
    %232 = vector.extract_strided_slice %231 {offsets = [0, 0], sizes = [32, 256], strides = [1, 1]} : vector<64x256xbf16> to vector<32x256xbf16>
    %cst_56 = arith.constant dense<0.000000e+00> : vector<64x256xf32>
    %233 = tpu.matmul %228, %232, %cst_56 {dimension_numbers = #tpu.dot_dimension_numbers<[1], [0], [0], [1], [0, 0, 1, 1], [], []>} : vector<64x32xbf16>, vector<32x256xbf16>, vector<64x256xf32> -> vector<64x256xf32>
    %234 = vector.extract_strided_slice %231 {offsets = [32, 0], sizes = [32, 256], strides = [1, 1]} : vector<64x256xbf16> to vector<32x256xbf16>
    %cst_57 = arith.constant dense<0.000000e+00> : vector<64x256xf32>
    %235 = tpu.matmul %230, %234, %cst_57 {dimension_numbers = #tpu.dot_dimension_numbers<[1], [0], [0], [1], [0, 0, 1, 1], [], []>} : vector<64x32xbf16>, vector<32x256xbf16>, vector<64x256xf32> -> vector<64x256xf32>
    %236 = arith.addf %233, %235 : vector<64x256xf32>
    %c0_58 = arith.constant 0 : index
    %c0_59 = arith.constant 0 : index
    %237 = vector.load %arg7[%c0_58, %c0_59] : memref<1x256xf32, #tpu.memory_space<vmem>>, vector<1x256xf32>
    %238 = vector.broadcast %237 : vector<1x256xf32> to vector<64x256xf32>
    %239 = arith.addf %236, %238 : vector<64x256xf32>
    %c0_60 = arith.constant 0 : index
    %c0_61 = arith.constant 0 : index
    %240 = vector.load %arg17[%c0_60, %c0_61] : memref<64x256xf32, #tpu.memory_space<vmem>>, vector<64x256xf32>
    tpu.vector_store %arg17[%c0_60, %c0_61], %239 {strides = array<i32>} : memref<64x256xf32, #tpu.memory_space<vmem>>, vector<64x256xf32>,
    %c0_62 = arith.constant 0 : index
    %c0_63 = arith.constant 0 : index
    %241 = vector.load %arg6[%c0_62, %c0_63] : memref<32x256xbf16, #tpu.memory_space<vmem>>, vector<32x256xbf16>
    %242 = vector.extract_strided_slice %241 {offsets = [0, 0], sizes = [32, 128], strides = [1, 1]} : vector<32x256xbf16> to vector<32x128xbf16>
    %cst_64 = arith.constant 0.000000e+00 : f32
    %243 = vector.broadcast %cst_64 : f32 to vector<8x32xf32>
    %cst_65 = arith.constant 0.000000e+00 : f32
    %244 = vector.broadcast %cst_65 : f32 to vector<8x32xf32>
    %c0_66 = arith.constant 0 : index
    %c0_67 = arith.constant 0 : index
    %245 = vector.load %arg17[%c0_66, %c0_67] : memref<64x256xf32, #tpu.memory_space<vmem>>, vector<8x128xf32>
    %246 = arith.truncf %243 : vector<8x32xf32> to vector<8x32xbf16>
    %cst_68 = arith.constant dense<0.000000e+00> : vector<8x128xf32>
    %247 = tpu.matmul %246, %242, %cst_68 {dimension_numbers = #tpu.dot_dimension_numbers<[1], [0], [0], [1], [0, 0, 1, 1], [], []>} : vector<8x32xbf16>, vector<32x128xbf16>, vector<8x128xf32> -> vector<8x128xf32>
    %248 = arith.addf %245, %247 : vector<8x128xf32>
    %249 = arith.negf %248 : vector<8x128xf32>
    %250 = math.exp %249 : vector<8x128xf32>
    %cst_69 = arith.constant 1.000000e+00 : f32
    %251 = vector.broadcast %cst_69 : f32 to vector<8x128xf32>
    %252 = arith.addf %251, %250 : vector<8x128xf32>
    %253 = arith.divf %251, %252 : vector<8x128xf32>
    %254 = math.tanh %248 : vector<8x128xf32>
    %255 = vector.extract_strided_slice %253 {offsets = [0, 0], sizes = [8, 32], strides = [1, 1]} : vector<8x128xf32> to vector<8x32xf32>
    %256 = vector.extract_strided_slice %253 {offsets = [0, 32], sizes = [8, 32], strides = [1, 1]} : vector<8x128xf32> to vector<8x32xf32>
    %257 = vector.extract_strided_slice %254 {offsets = [0, 64], sizes = [8, 32], strides = [1, 1]} : vector<8x128xf32> to vector<8x32xf32>
    %258 = vector.extract_strided_slice %253 {offsets = [0, 96], sizes = [8, 32], strides = [1, 1]} : vector<8x128xf32> to vector<8x32xf32>
    %259 = arith.mulf %256, %244 : vector<8x32xf32>
    %260 = arith.mulf %255, %257 : vector<8x32xf32>
    %261 = arith.addf %259, %260 : vector<8x32xf32>
    %262 = math.tanh %261 : vector<8x32xf32>
    %263 = arith.mulf %258, %262 : vector<8x32xf32>
    %c8_70 = arith.constant 8 : index
    %c0_71 = arith.constant 0 : index
    %264 = vector.load %arg17[%c8_70, %c0_71] : memref<64x256xf32, #tpu.memory_space<vmem>>, vector<8x128xf32>
    %265 = arith.truncf %263 : vector<8x32xf32> to vector<8x32xbf16>
    %cst_72 = arith.constant dense<0.000000e+00> : vector<8x128xf32>
    %266 = tpu.matmul %265, %242, %cst_72 {dimension_numbers = #tpu.dot_dimension_numbers<[1], [0], [0], [1], [0, 0, 1, 1], [], []>} : vector<8x32xbf16>, vector<32x128xbf16>, vector<8x128xf32> -> vector<8x128xf32>
    %267 = arith.addf %264, %266 : vector<8x128xf32>
    %268 = arith.negf %267 : vector<8x128xf32>
    %269 = math.exp %268 : vector<8x128xf32>
    %cst_73 = arith.constant 1.000000e+00 : f32
    %270 = vector.broadcast %cst_73 : f32 to vector<8x128xf32>
    %271 = arith.addf %270, %269 : vector<8x128xf32>
    %272 = arith.divf %270, %271 : vector<8x128xf32>
    %273 = math.tanh %267 : vector<8x128xf32>
    %274 = vector.extract_strided_slice %272 {offsets = [0, 0], sizes = [8, 32], strides = [1, 1]} : vector<8x128xf32> to vector<8x32xf32>
    %275 = vector.extract_strided_slice %272 {offsets = [0, 32], sizes = [8, 32], strides = [1, 1]} : vector<8x128xf32> to vector<8x32xf32>
    %276 = vector.extract_strided_slice %273 {offsets = [0, 64], sizes = [8, 32], strides = [1, 1]} : vector<8x128xf32> to vector<8x32xf32>
    %277 = vector.extract_strided_slice %272 {offsets = [0, 96], sizes = [8, 32], strides = [1, 1]} : vector<8x128xf32> to vector<8x32xf32>
    %278 = arith.mulf %275, %261 : vector<8x32xf32>
    %279 = arith.mulf %274, %276 : vector<8x32xf32>
    %280 = arith.addf %278, %279 : vector<8x32xf32>
    %281 = math.tanh %280 : vector<8x32xf32>
    %282 = arith.mulf %277, %281 : vector<8x32xf32>
    %c16_74 = arith.constant 16 : index
    %c0_75 = arith.constant 0 : index
    %283 = vector.load %arg17[%c16_74, %c0_75] : memref<64x256xf32, #tpu.memory_space<vmem>>, vector<8x128xf32>
    %284 = arith.truncf %282 : vector<8x32xf32> to vector<8x32xbf16>
    %cst_76 = arith.constant dense<0.000000e+00> : vector<8x128xf32>
    %285 = tpu.matmul %284, %242, %cst_76 {dimension_numbers = #tpu.dot_dimension_numbers<[1], [0], [0], [1], [0, 0, 1, 1], [], []>} : vector<8x32xbf16>, vector<32x128xbf16>, vector<8x128xf32> -> vector<8x128xf32>
    %286 = arith.addf %283, %285 : vector<8x128xf32>
    %287 = arith.negf %286 : vector<8x128xf32>
    %288 = math.exp %287 : vector<8x128xf32>
    %cst_77 = arith.constant 1.000000e+00 : f32
    %289 = vector.broadcast %cst_77 : f32 to vector<8x128xf32>
    %290 = arith.addf %289, %288 : vector<8x128xf32>
    %291 = arith.divf %289, %290 : vector<8x128xf32>
    %292 = math.tanh %286 : vector<8x128xf32>
    %293 = vector.extract_strided_slice %291 {offsets = [0, 0], sizes = [8, 32], strides = [1, 1]} : vector<8x128xf32> to vector<8x32xf32>
    %294 = vector.extract_strided_slice %291 {offsets = [0, 32], sizes = [8, 32], strides = [1, 1]} : vector<8x128xf32> to vector<8x32xf32>
    %295 = vector.extract_strided_slice %292 {offsets = [0, 64], sizes = [8, 32], strides = [1, 1]} : vector<8x128xf32> to vector<8x32xf32>
    %296 = vector.extract_strided_slice %291 {offsets = [0, 96], sizes = [8, 32], strides = [1, 1]} : vector<8x128xf32> to vector<8x32xf32>
    %297 = arith.mulf %294, %280 : vector<8x32xf32>
    %298 = arith.mulf %293, %295 : vector<8x32xf32>
    %299 = arith.addf %297, %298 : vector<8x32xf32>
    %300 = math.tanh %299 : vector<8x32xf32>
    %301 = arith.mulf %296, %300 : vector<8x32xf32>
    %c24_78 = arith.constant 24 : index
    %c0_79 = arith.constant 0 : index
    %302 = vector.load %arg17[%c24_78, %c0_79] : memref<64x256xf32, #tpu.memory_space<vmem>>, vector<8x128xf32>
    %303 = arith.truncf %301 : vector<8x32xf32> to vector<8x32xbf16>
    %cst_80 = arith.constant dense<0.000000e+00> : vector<8x128xf32>
    %304 = tpu.matmul %303, %242, %cst_80 {dimension_numbers = #tpu.dot_dimension_numbers<[1], [0], [0], [1], [0, 0, 1, 1], [], []>} : vector<8x32xbf16>, vector<32x128xbf16>, vector<8x128xf32> -> vector<8x128xf32>
    %305 = arith.addf %302, %304 : vector<8x128xf32>
    %306 = arith.negf %305 : vector<8x128xf32>
    %307 = math.exp %306 : vector<8x128xf32>
    %cst_81 = arith.constant 1.000000e+00 : f32
    %308 = vector.broadcast %cst_81 : f32 to vector<8x128xf32>
    %309 = arith.addf %308, %307 : vector<8x128xf32>
    %310 = arith.divf %308, %309 : vector<8x128xf32>
    %311 = math.tanh %305 : vector<8x128xf32>
    %312 = vector.extract_strided_slice %310 {offsets = [0, 0], sizes = [8, 32], strides = [1, 1]} : vector<8x128xf32> to vector<8x32xf32>
    %313 = vector.extract_strided_slice %310 {offsets = [0, 32], sizes = [8, 32], strides = [1, 1]} : vector<8x128xf32> to vector<8x32xf32>
    %314 = vector.extract_strided_slice %311 {offsets = [0, 64], sizes = [8, 32], strides = [1, 1]} : vector<8x128xf32> to vector<8x32xf32>
    %315 = vector.extract_strided_slice %310 {offsets = [0, 96], sizes = [8, 32], strides = [1, 1]} : vector<8x128xf32> to vector<8x32xf32>
    %316 = arith.mulf %313, %299 : vector<8x32xf32>
    %317 = arith.mulf %312, %314 : vector<8x32xf32>
    %318 = arith.addf %316, %317 : vector<8x32xf32>
    %319 = math.tanh %318 : vector<8x32xf32>
    %320 = arith.mulf %315, %319 : vector<8x32xf32>
    %c32_82 = arith.constant 32 : index
    %c0_83 = arith.constant 0 : index
    %321 = vector.load %arg17[%c32_82, %c0_83] : memref<64x256xf32, #tpu.memory_space<vmem>>, vector<8x128xf32>
    %322 = arith.truncf %320 : vector<8x32xf32> to vector<8x32xbf16>
    %cst_84 = arith.constant dense<0.000000e+00> : vector<8x128xf32>
    %323 = tpu.matmul %322, %242, %cst_84 {dimension_numbers = #tpu.dot_dimension_numbers<[1], [0], [0], [1], [0, 0, 1, 1], [], []>} : vector<8x32xbf16>, vector<32x128xbf16>, vector<8x128xf32> -> vector<8x128xf32>
    %324 = arith.addf %321, %323 : vector<8x128xf32>
    %325 = arith.negf %324 : vector<8x128xf32>
    %326 = math.exp %325 : vector<8x128xf32>
    %cst_85 = arith.constant 1.000000e+00 : f32
    %327 = vector.broadcast %cst_85 : f32 to vector<8x128xf32>
    %328 = arith.addf %327, %326 : vector<8x128xf32>
    %329 = arith.divf %327, %328 : vector<8x128xf32>
    %330 = math.tanh %324 : vector<8x128xf32>
    %331 = vector.extract_strided_slice %329 {offsets = [0, 0], sizes = [8, 32], strides = [1, 1]} : vector<8x128xf32> to vector<8x32xf32>
    %332 = vector.extract_strided_slice %329 {offsets = [0, 32], sizes = [8, 32], strides = [1, 1]} : vector<8x128xf32> to vector<8x32xf32>
    %333 = vector.extract_strided_slice %330 {offsets = [0, 64], sizes = [8, 32], strides = [1, 1]} : vector<8x128xf32> to vector<8x32xf32>
    %334 = vector.extract_strided_slice %329 {offsets = [0, 96], sizes = [8, 32], strides = [1, 1]} : vector<8x128xf32> to vector<8x32xf32>
    %335 = arith.mulf %332, %318 : vector<8x32xf32>
    %336 = arith.mulf %331, %333 : vector<8x32xf32>
    %337 = arith.addf %335, %336 : vector<8x32xf32>
    %338 = math.tanh %337 : vector<8x32xf32>
    %339 = arith.mulf %334, %338 : vector<8x32xf32>
    %c40_86 = arith.constant 40 : index
    %c0_87 = arith.constant 0 : index
    %340 = vector.load %arg17[%c40_86, %c0_87] : memref<64x256xf32, #tpu.memory_space<vmem>>, vector<8x128xf32>
    %341 = arith.truncf %339 : vector<8x32xf32> to vector<8x32xbf16>
    %cst_88 = arith.constant dense<0.000000e+00> : vector<8x128xf32>
    %342 = tpu.matmul %341, %242, %cst_88 {dimension_numbers = #tpu.dot_dimension_numbers<[1], [0], [0], [1], [0, 0, 1, 1], [], []>} : vector<8x32xbf16>, vector<32x128xbf16>, vector<8x128xf32> -> vector<8x128xf32>
    %343 = arith.addf %340, %342 : vector<8x128xf32>
    %344 = arith.negf %343 : vector<8x128xf32>
    %345 = math.exp %344 : vector<8x128xf32>
    %cst_89 = arith.constant 1.000000e+00 : f32
    %346 = vector.broadcast %cst_89 : f32 to vector<8x128xf32>
    %347 = arith.addf %346, %345 : vector<8x128xf32>
    %348 = arith.divf %346, %347 : vector<8x128xf32>
    %349 = math.tanh %343 : vector<8x128xf32>
    %350 = vector.extract_strided_slice %348 {offsets = [0, 0], sizes = [8, 32], strides = [1, 1]} : vector<8x128xf32> to vector<8x32xf32>
    %351 = vector.extract_strided_slice %348 {offsets = [0, 32], sizes = [8, 32], strides = [1, 1]} : vector<8x128xf32> to vector<8x32xf32>
    %352 = vector.extract_strided_slice %349 {offsets = [0, 64], sizes = [8, 32], strides = [1, 1]} : vector<8x128xf32> to vector<8x32xf32>
    %353 = vector.extract_strided_slice %348 {offsets = [0, 96], sizes = [8, 32], strides = [1, 1]} : vector<8x128xf32> to vector<8x32xf32>
    %354 = arith.mulf %351, %337 : vector<8x32xf32>
    %355 = arith.mulf %350, %352 : vector<8x32xf32>
    %356 = arith.addf %354, %355 : vector<8x32xf32>
    %357 = math.tanh %356 : vector<8x32xf32>
    %358 = arith.mulf %353, %357 : vector<8x32xf32>
    %c48_90 = arith.constant 48 : index
    %c0_91 = arith.constant 0 : index
    %359 = vector.load %arg17[%c48_90, %c0_91] : memref<64x256xf32, #tpu.memory_space<vmem>>, vector<8x128xf32>
    %360 = arith.truncf %358 : vector<8x32xf32> to vector<8x32xbf16>
    %cst_92 = arith.constant dense<0.000000e+00> : vector<8x128xf32>
    %361 = tpu.matmul %360, %242, %cst_92 {dimension_numbers = #tpu.dot_dimension_numbers<[1], [0], [0], [1], [0, 0, 1, 1], [], []>} : vector<8x32xbf16>, vector<32x128xbf16>, vector<8x128xf32> -> vector<8x128xf32>
    %362 = arith.addf %359, %361 : vector<8x128xf32>
    %363 = arith.negf %362 : vector<8x128xf32>
    %364 = math.exp %363 : vector<8x128xf32>
    %cst_93 = arith.constant 1.000000e+00 : f32
    %365 = vector.broadcast %cst_93 : f32 to vector<8x128xf32>
    %366 = arith.addf %365, %364 : vector<8x128xf32>
    %367 = arith.divf %365, %366 : vector<8x128xf32>
    %368 = math.tanh %362 : vector<8x128xf32>
    %369 = vector.extract_strided_slice %367 {offsets = [0, 0], sizes = [8, 32], strides = [1, 1]} : vector<8x128xf32> to vector<8x32xf32>
    %370 = vector.extract_strided_slice %367 {offsets = [0, 32], sizes = [8, 32], strides = [1, 1]} : vector<8x128xf32> to vector<8x32xf32>
    %371 = vector.extract_strided_slice %368 {offsets = [0, 64], sizes = [8, 32], strides = [1, 1]} : vector<8x128xf32> to vector<8x32xf32>
    %372 = vector.extract_strided_slice %367 {offsets = [0, 96], sizes = [8, 32], strides = [1, 1]} : vector<8x128xf32> to vector<8x32xf32>
    %373 = arith.mulf %370, %356 : vector<8x32xf32>
    %374 = arith.mulf %369, %371 : vector<8x32xf32>
    %375 = arith.addf %373, %374 : vector<8x32xf32>
    %376 = math.tanh %375 : vector<8x32xf32>
    %377 = arith.mulf %372, %376 : vector<8x32xf32>
    %c56_94 = arith.constant 56 : index
    %c0_95 = arith.constant 0 : index
    %378 = vector.load %arg17[%c56_94, %c0_95] : memref<64x256xf32, #tpu.memory_space<vmem>>, vector<8x128xf32>
    %379 = arith.truncf %377 : vector<8x32xf32> to vector<8x32xbf16>
    %cst_96 = arith.constant dense<0.000000e+00> : vector<8x128xf32>
    %380 = tpu.matmul %379, %242, %cst_96 {dimension_numbers = #tpu.dot_dimension_numbers<[1], [0], [0], [1], [0, 0, 1, 1], [], []>} : vector<8x32xbf16>, vector<32x128xbf16>, vector<8x128xf32> -> vector<8x128xf32>
    %381 = arith.addf %378, %380 : vector<8x128xf32>
    %382 = arith.negf %381 : vector<8x128xf32>
    %383 = math.exp %382 : vector<8x128xf32>
    %cst_97 = arith.constant 1.000000e+00 : f32
    %384 = vector.broadcast %cst_97 : f32 to vector<8x128xf32>
    %385 = arith.addf %384, %383 : vector<8x128xf32>
    %386 = arith.divf %384, %385 : vector<8x128xf32>
    %387 = math.tanh %381 : vector<8x128xf32>
    %388 = vector.extract_strided_slice %386 {offsets = [0, 0], sizes = [8, 32], strides = [1, 1]} : vector<8x128xf32> to vector<8x32xf32>
    %389 = vector.extract_strided_slice %386 {offsets = [0, 32], sizes = [8, 32], strides = [1, 1]} : vector<8x128xf32> to vector<8x32xf32>
    %390 = vector.extract_strided_slice %387 {offsets = [0, 64], sizes = [8, 32], strides = [1, 1]} : vector<8x128xf32> to vector<8x32xf32>
    %391 = vector.extract_strided_slice %386 {offsets = [0, 96], sizes = [8, 32], strides = [1, 1]} : vector<8x128xf32> to vector<8x32xf32>
    %392 = arith.mulf %389, %375 : vector<8x32xf32>
    %393 = arith.mulf %388, %390 : vector<8x32xf32>
    %394 = arith.addf %392, %393 : vector<8x32xf32>
    %395 = math.tanh %394 : vector<8x32xf32>
    %396 = arith.mulf %391, %395 : vector<8x32xf32>
    %c56_98 = arith.constant 56 : index
    %c128_99 = arith.constant 128 : index
    %397 = vector.load %arg17[%c56_98, %c128_99] : memref<64x256xf32, #tpu.memory_space<vmem>>, vector<8x128xf32>
    %cst_100 = arith.constant 0.000000e+00 : f32
    %398 = vector.broadcast %cst_100 : f32 to vector<8x32xf32>
    %399 = arith.negf %397 : vector<8x128xf32>
    %400 = math.exp %399 : vector<8x128xf32>
    %cst_101 = arith.constant 1.000000e+00 : f32
    %401 = vector.broadcast %cst_101 : f32 to vector<8x128xf32>
    %402 = arith.addf %401, %400 : vector<8x128xf32>
    %403 = arith.divf %401, %402 : vector<8x128xf32>
    %404 = math.tanh %397 : vector<8x128xf32>
    %405 = vector.extract_strided_slice %403 {offsets = [0, 0], sizes = [8, 32], strides = [1, 1]} : vector<8x128xf32> to vector<8x32xf32>
    %406 = vector.extract_strided_slice %403 {offsets = [0, 32], sizes = [8, 32], strides = [1, 1]} : vector<8x128xf32> to vector<8x32xf32>
    %407 = vector.extract_strided_slice %404 {offsets = [0, 64], sizes = [8, 32], strides = [1, 1]} : vector<8x128xf32> to vector<8x32xf32>
    %408 = vector.extract_strided_slice %403 {offsets = [0, 96], sizes = [8, 32], strides = [1, 1]} : vector<8x128xf32> to vector<8x32xf32>
    %409 = arith.mulf %406, %398 : vector<8x32xf32>
    %410 = arith.mulf %405, %407 : vector<8x32xf32>
    %411 = arith.addf %409, %410 : vector<8x32xf32>
    %412 = math.tanh %411 : vector<8x32xf32>
    %413 = arith.mulf %408, %412 : vector<8x32xf32>
    %c0_102 = arith.constant 0 : index
    %c0_103 = arith.constant 0 : index
    %414 = vector.load %arg8[%c0_102, %c0_103] : memref<64x512xbf16, #tpu.memory_space<vmem>>, vector<64x512xbf16>
    %415 = arith.truncf %396 : vector<8x32xf32> to vector<8x32xbf16>
    %416 = vector.extract_strided_slice %414 {offsets = [0, 0], sizes = [32, 512], strides = [1, 1]} : vector<64x512xbf16> to vector<32x512xbf16>
    %cst_104 = arith.constant dense<0.000000e+00> : vector<8x512xf32>
    %417 = tpu.matmul %415, %416, %cst_104 {dimension_numbers = #tpu.dot_dimension_numbers<[1], [0], [0], [1], [0, 0, 1, 1], [], []>} : vector<8x32xbf16>, vector<32x512xbf16>, vector<8x512xf32> -> vector<8x512xf32>
    %418 = arith.truncf %413 : vector<8x32xf32> to vector<8x32xbf16>
    %419 = vector.extract_strided_slice %414 {offsets = [32, 0], sizes = [32, 512], strides = [1, 1]} : vector<64x512xbf16> to vector<32x512xbf16>
    %cst_105 = arith.constant dense<0.000000e+00> : vector<8x512xf32>
    %420 = tpu.matmul %418, %419, %cst_105 {dimension_numbers = #tpu.dot_dimension_numbers<[1], [0], [0], [1], [0, 0, 1, 1], [], []>} : vector<8x32xbf16>, vector<32x512xbf16>, vector<8x512xf32> -> vector<8x512xf32>
    %421 = arith.addf %417, %420 : vector<8x512xf32>
    %c0_106 = arith.constant 0 : index
    %c0_107 = arith.constant 0 : index
    %422 = vector.load %arg9[%c0_106, %c0_107] : memref<1x512xf32, #tpu.memory_space<vmem>>, vector<1x512xf32>
    %423 = vector.broadcast %422 : vector<1x512xf32> to vector<8x512xf32>
    %424 = arith.addf %421, %423 : vector<8x512xf32>
    %cst_108 = arith.constant 0.000000e+00 : f32
    %425 = vector.broadcast %cst_108 : f32 to vector<8x512xf32>
    %426 = arith.maximumf %424, %425 : vector<8x512xf32>
    %427 = arith.truncf %426 : vector<8x512xf32> to vector<8x512xbf16>
    %c0_109 = arith.constant 0 : index
    %c0_110 = arith.constant 0 : index
    %428 = vector.load %arg10[%c0_109, %c0_110] : memref<512x256xbf16, #tpu.memory_space<vmem>>, vector<512x256xbf16>
    %cst_111 = arith.constant dense<0.000000e+00> : vector<8x256xf32>
    %429 = tpu.matmul %427, %428, %cst_111 {dimension_numbers = #tpu.dot_dimension_numbers<[1], [0], [0], [1], [0, 0, 1, 1], [], []>} : vector<8x512xbf16>, vector<512x256xbf16>, vector<8x256xf32> -> vector<8x256xf32>
    %c0_112 = arith.constant 0 : index
    %c0_113 = arith.constant 0 : index
    %430 = vector.load %arg11[%c0_112, %c0_113] : memref<1x256xf32, #tpu.memory_space<vmem>>, vector<1x256xf32>
    %431 = vector.broadcast %430 : vector<1x256xf32> to vector<8x256xf32>
    %432 = arith.addf %429, %431 : vector<8x256xf32>
    %cst_114 = arith.constant 0.000000e+00 : f32
    %433 = vector.broadcast %cst_114 : f32 to vector<8x256xf32>
    %434 = arith.maximumf %432, %433 : vector<8x256xf32>
    %435 = arith.truncf %434 : vector<8x256xf32> to vector<8x256xbf16>
    %c0_115 = arith.constant 0 : index
    %c0_116 = arith.constant 0 : index
    %436 = vector.load %arg12[%c0_115, %c0_116] : memref<256x128xbf16, #tpu.memory_space<vmem>>, vector<256x128xbf16>
    %cst_117 = arith.constant dense<0.000000e+00> : vector<8x128xf32>
    %437 = tpu.matmul %435, %436, %cst_117 {dimension_numbers = #tpu.dot_dimension_numbers<[1], [0], [0], [1], [0, 0, 1, 1], [], []>} : vector<8x256xbf16>, vector<256x128xbf16>, vector<8x128xf32> -> vector<8x128xf32>
    %c0_118 = arith.constant 0 : index
    %c0_119 = arith.constant 0 : index
    %438 = vector.load %arg13[%c0_118, %c0_119] : memref<1x128xf32, #tpu.memory_space<vmem>>, vector<1x128xf32>
    %439 = vector.broadcast %438 : vector<1x128xf32> to vector<8x128xf32>
    %440 = arith.addf %437, %439 : vector<8x128xf32>
    %cst_120 = arith.constant 0.000000e+00 : f32
    %441 = vector.broadcast %cst_120 : f32 to vector<8x128xf32>
    %442 = arith.maximumf %440, %441 : vector<8x128xf32>
    %c0_121 = arith.constant 0 : index
    %c0_122 = arith.constant 0 : index
    %443 = vector.load %arg14[%c0_121, %c0_122] : memref<128x1xf32, #tpu.memory_space<vmem>>, vector<128x1xf32>
    %cst_123 = arith.constant dense<0.000000e+00> : vector<8x1xf32>
    %444 = tpu.matmul %442, %443, %cst_123 {dimension_numbers = #tpu.dot_dimension_numbers<[1], [0], [0], [1], [0, 0, 1, 1], [], []>} : vector<8x128xf32>, vector<128x1xf32>, vector<8x1xf32> -> vector<8x1xf32>
    %c0_124 = arith.constant 0 : index
    %c0_125 = arith.constant 0 : index
    %445 = vector.load %arg15[%c0_124, %c0_125] : memref<1x1xf32, #tpu.memory_space<vmem>>, vector<1x1xf32>
    %446 = vector.broadcast %445 : vector<1x1xf32> to vector<8x1xf32>
    %447 = arith.addf %444, %446 : vector<8x1xf32>
    %c0_126 = arith.constant 0 : index
    %c0_127 = arith.constant 0 : index
    %448 = vector.load %arg16[%c0_126, %c0_127] : memref<8x1xf32, #tpu.memory_space<vmem>>, vector<8x1xf32>
    tpu.vector_store %arg16[%c0_126, %c0_127], %447 {strides = array<i32>} : memref<8x1xf32, #tpu.memory_space<vmem>>, vector<8x1xf32>,
    return
  }
}

</mosaic_0001>

<bundles_post_ra>
// kernel: lstm_net_forward.1
= control target key start
LH: loop header
LB: loop body
LE: loop exit
PB: predicated region body
PF: predicated region fallthrough
CT: control target
= control target key end

     0   :  { %s4942_s0 = inlined_call_operand.vmem [shape: s32[64,1], index: 0, kind: input, shape index: {}]   ;;  %s4943_s1 = inlined_call_operand.vmem [shape: bf16[56,32], index: 1, kind: input, shape index: {}]   ;;  %s4944_s2 = inlined_call_operand.hbm [shape: bf16[32,256], index: 2, kind: input, shape index: {}]   ;;  %s4945_s3 = inlined_call_operand.hbm [shape: bf16[32,256], index: 3, kind: input, shape index: {}]   ;;  %s4946_s4 = inlined_call_operand.vmem [shape: f32[1,256], index: 4, kind: input, shape index: {}]   ;;  %s4947_s5 = inlined_call_operand.vmem [shape: bf16[64,256], index: 5, kind: input, shape index: {}]   ;;  %s4948_s6 = inlined_call_operand.vmem [shape: bf16[32,256], index: 6, kind: input, shape index: {}]   ;;  %s4949_s7 = inlined_call_operand.hbm [shape: f32[1,256], index: 7, kind: input, shape index: {}]   ;;  %s4950_s8 = inlined_call_operand.vmem [shape: bf16[64,512], index: 8, kind: input, shape index: {}]   ;;  %s4951_s9 = inlined_call_operand.vmem [shape: f32[1,512], index: 9, kind: input, shape index: {}]   ;;  %s4952_s10 = inlined_call_operand.hbm [shape: bf16[512,256], index: 10, kind: input, shape index: {}]   ;;  %s4953_s11 = inlined_call_operand.vmem [shape: f32[1,256], index: 11, kind: input, shape index: {}]   ;;  %s4954_s12 = inlined_call_operand.vmem [shape: bf16[256,128], index: 12, kind: input, shape index: {}]   ;;  %s4955_s13 = inlined_call_operand.vmem [shape: f32[1,128], index: 13, kind: input, shape index: {}]   ;;  %s4956_s14 = inlined_call_operand.vmem [shape: f32[128,1], index: 14, kind: input, shape index: {}]   ;;  %s4957_s15 = inlined_call_operand.<no memory space> [shape: f32[1,1], index: 15, kind: input, shape index: {}]   ;;  %s4958_s16 = inlined_call_operand.vmem [shape: f32[8,1], index: 16, kind: output, shape index: {}]  }
   0x1   :  { %4960 = sst [smem:[#allocation14_spill]] %s4942_s0  ;;  %v21_v0 = vstv %s4957_s15 }
   0x2   :  { %22 = vst [vmem:[#allocation3] sm:$0x1] %v21_v0 }
   0x3   :  { %23 = vsyncpa [#allocation5], 0 }
   0x4   :  { %24 = vsyncpa [#allocation7], 0 }
   0x5   :  { %25 = vsyncpa [#allocation10], 0  ;;  %s4101_s23 = smov [#allocation6]   ;;  %s4102_s25 = smov [#allocation4]  }
   0x6   :  { %s47_s24 = sshll.u32 %s4101_s23, 4  ;;  %s35_s26 = sshll.u32 %s4102_s25, 4  ;;  %s48_s24 = int_to_ptr.vmem [resolvable:$true] %s47_s24  ;;  %s4201_s26 = int_to_ptr.vmem [resolvable:$true] %s35_s26 }
   0x7   :  { %s4007_s29 = scalar_lea.hbm %s4945_s3, 512 }
   0x8   :  { %p4008_p0 = scmp.ne.s32.totalorder %s4945_s3, %s4007_s29  ;;  %p4011_p1 = scmp.lt.u32.totalorder %s4007_s29, %s4945_s3 }
   0xa   :  { %p4013_p2 = pnand %p4011_p1, %p4008_p0 }
   0xc   :  { %4016 = shalt.err (!%p4013_p2)
}
   0xd   :  { %s4017_s18 = scalar_lea.vmem %s48_s24, 512  ;;  %p4022_p4 = scmp.lt.s32.totalorder %s48_s24, %s48_s24 }
   0xe   :  { %p4018_p3 = scmp.ne.s32.totalorder %s48_s24, %s4017_s18  ;;  %p4023_p5 = scmp.lt.s32.totalorder %s4017_s18, %s4017_s18 }
  0x10   :  { %p4024_p6 = por %p4023_p5, %p4022_p4 }
  0x12   :  { %p4025_p7 = pnand %p4024_p6, %p4018_p3 }
  0x14   :  { %4028 = shalt.err (!%p4025_p7)
}
  0x15   :  { %s4103_s19 = smov 128   ;;  %s4104_s20 = smov 8  }
  0x16   :  { %53 = dma.hbm_to_vmem [thread:$0]  %s4945_s3, 512, %s48_s24, [#allocation7], %s4103_s19, %s4103_s19, %s4104_s20  }
  0x17   :  { %s4029_s27 = scalar_lea.hbm %s4944_s2, 512 }
  0x18   :  { %p4030_p8 = scmp.ne.s32.totalorder %s4944_s2, %s4029_s27  ;;  %p4033_p9 = scmp.lt.u32.totalorder %s4029_s27, %s4944_s2 }
  0x1a   :  { %p4035_p10 = pnand %p4033_p9, %p4030_p8 }
  0x1c   :  { %4038 = shalt.err (!%p4035_p10)
}
  0x1d   :  { %s4039_s15 = scalar_lea.vmem %s4201_s26, 512  ;;  %p4044_p12 = scmp.lt.s32.totalorder %s4201_s26, %s4201_s26 }
  0x1e   :  { %p4040_p11 = scmp.ne.s32.totalorder %s4201_s26, %s4039_s15  ;;  %p4045_p13 = scmp.lt.s32.totalorder %s4039_s15, %s4039_s15 }
  0x20   :  { %p4046_p0 = por %p4045_p13, %p4044_p12 }
  0x22   :  { %p4047_p1 = pnand %p4046_p0, %p4040_p11 }
  0x24   :  { %4050 = shalt.err (!%p4047_p1)
}
  0x25   :  { %41 = dma.hbm_to_vmem [thread:$0]  %s4944_s2, 512, %s4201_s26, [#allocation5], %s4103_s19, %s4103_s19, %s4104_s20  }
  0x26   :  { %s4105_s17 = smov [#allocation8]   ;;  %s4106_s21 = smov [#allocation9]  }
  0x27   :  { %s66_s18 = sshll.u32 %s4105_s17, 4  ;;  %s79_s22 = sshll.u32 %s4106_s21, 4  ;;  %s67_s18 = int_to_ptr.vmem [resolvable:$true] %s66_s18  ;;  %s4238_s22 = int_to_ptr.vmem [resolvable:$true] %s79_s22 }
  0x28   :  { %s4051_s27 = scalar_lea.hbm %s4949_s7, 32 }
  0x29   :  { %p4052_p2 = scmp.ne.s32.totalorder %s4949_s7, %s4051_s27  ;;  %p4055_p3 = scmp.lt.u32.totalorder %s4051_s27, %s4949_s7 }
  0x2b   :  { %p4057_p4 = pnand %p4055_p3, %p4052_p2 }
  0x2d   :  { %4060 = shalt.err (!%p4057_p4)
}
  0x2e   :  { %s4061_s2 = scalar_lea.vmem %s67_s18, 32  ;;  %p4066_p6 = scmp.lt.s32.totalorder %s67_s18, %s67_s18 }
  0x2f   :  { %p4062_p5 = scmp.ne.s32.totalorder %s67_s18, %s4061_s2  ;;  %p4067_p7 = scmp.lt.s32.totalorder %s4061_s2, %s4061_s2 }
  0x31   :  { %p4068_p8 = por %p4067_p7, %p4066_p6 }
  0x33   :  { %p4069_p9 = pnand %p4068_p8, %p4062_p5 }
  0x35   :  { %4072 = shalt.err (!%p4069_p9)
}
  0x36   :  { %69 = dma.hbm_to_vmem [thread:$0]  %s4949_s7, 32, %s67_s18, [#allocation7]  }
  0x37   :  { %s4073_s17 = scalar_lea.hbm %s4952_s10, 8192 }
  0x38   :  { %p4074_p10 = scmp.ne.s32.totalorder %s4952_s10, %s4073_s17  ;;  %p4077_p11 = scmp.lt.u32.totalorder %s4073_s17, %s4952_s10 }
  0x3a   :  { %p4079_p12 = pnand %p4077_p11, %p4074_p10 }
  0x3c   :  { %4082 = shalt.err (!%p4079_p12)
}
  0x3d   :  { %s4083_s28 = scalar_lea.vmem %s4238_s22, 8192  ;;  %p4088_p0 = scmp.lt.s32.totalorder %s4238_s22, %s4238_s22 }
  0x3e   :  { %p4084_p13 = scmp.ne.s32.totalorder %s4238_s22, %s4083_s28  ;;  %p4089_p1 = scmp.lt.s32.totalorder %s4083_s28, %s4083_s28 }
  0x40   :  { %p4090_p2 = por %p4089_p1, %p4088_p0 }
  0x42   :  { %p4091_p3 = pnand %p4090_p2, %p4084_p13 }
  0x44   :  { %4094 = shalt.err (!%p4091_p3)
}
  0x45   :  { %85 = dma.hbm_to_vmem [thread:$0]  %s4952_s10, 8192, %s4238_s22, [#allocation10], %s4103_s19, %s4103_s19, %s4104_s20  }
  0x46   :  { %4095 = dma.done.wait [#allocation5], 512  }
  0x47   :  { %4096 = vsyncadd [#allocation5], 4294966784 }
  0x48   :  { %4097 = dma.done.wait [#allocation7], 544  }
  0x49   :  { %4098 = vsyncadd [#allocation7], 4294966752 }
  0x4a   :  { %4099 = dma.done.wait [#allocation10], 8192  }
  0x4b   :  { %4100 = vsyncadd [#allocation10], 4294959104  ;;  %v4107_v1 = vmov 0   ;;  %s4961_s0 = sld [smem:[#allocation14_spill]]  ;;  %v3641_v6 = vld [vmem:[%s4943_s1] sm:$0xff]   ;;  %v3642_v8 = vld [vmem:[%s4943_s1 + $0x8] sm:$0xff]   ;;  %v117_v16 = vlaneseq }
  0x4c   :  { %3640 = vset.pattern.permute.xlu1 %v4107_v1  ;;  %3639 = vset.pattern.permute.xlu0 %v4107_v1  ;;  %v3643_v10 = vld [vmem:[%s4943_s1 + $0x10] sm:$0xff]   ;;  %v3644_v13 = vld [vmem:[%s4943_s1 + $0x18] ss:$0 sps:$4 sm:$0xff]   ;;  %vm212_vm0 = vcmask 1043456   ;;  %vm199_vm5 = vcmask 457728   ;;  %v4108_v22 = vmov 0.0  }
  0x4d   :  { %682 = vmatprep.mubr.bf16.mxu1 %v4107_v1  ;;  %3481 = vmatprep.subr.bf16.mxu0 %v3641_v6  ;;  %v214_v14 = vsel %vm212_vm0, %v3644_v13, 0  ;;  %v3647_v15 = vld [vmem:[#allocation4 + $0x4] ss:$8 sps:$4 sm:$0xff]   ;;  %v118_v17 = vand.u32 127, %v117_v16  ;;  %v3645_v29 = vld [vmem:[#allocation4] ss:$8 sps:$4 sm:$0xff]  }
  0x4e   :  { %3482 = vmatpush3.bf16.msra.mxu0 %v3641_v6  ;;  %v3650_v32 = vld [vmem:[#allocation4 + $0x14] ss:$8 sps:$4 sm:$0xff]   ;;  %v3648_v36 = vld [vmem:[#allocation4 + $0x10] ss:$8 sps:$4 sm:$0xff]   ;;  %v4325_v42 = vld [vmem:[#allocation6 + $0x4] ss:$8 sps:$4 sm:$0xff]  }
  0x4f   :  { %3483 = vmatprep.subr.bf16.mxu0 %v3642_v8  ;;  %v4328_v43 = vld [vmem:[#allocation6] ss:$8 sps:$4 sm:$0xff]   ;;  %650 = vmatprep.subr.bf16.mxu1 %v4325_v42  ;;  %v4332_v44 = vld [vmem:[#allocation6 + $0x14] ss:$8 sps:$4 sm:$0xff]   ;;  %v4335_v45 = vld [vmem:[#allocation6 + $0x10] ss:$8 sps:$4 sm:$0xff]  }
  0x50   :  { %651 = vmatpush1.bf16.msra.mxu1 %v4328_v43  ;;  %vm321_vm10 = vcmask 261120   ;;  %v4358_v58 = vshrl.u32 %v117_v16, 7  ;;  %v289_v60 = vld [vmem:[%s4946_s4] sm:$0x3]  ;;  %s4109_s4 = smov 64   ;;  %s4110_s19 = smov 32  }
  0x51   :  { %v111_v2 = vld [vmem:[%s4961_s0 + $0x10] sm:$0xff]  ;;  %v109_v3 = vld [vmem:[%s4961_s0] sm:$0xff]  ;;  %v112_v4 = vld [vmem:[%s4961_s0 + $0x18] sm:$0xff]  ;;  %652 = vmatprep.subr.bf16.mxu1 %v4332_v44  ;;  %vm4111_vm11 = vmmov 0   ;;  %vm3214_vm12 = vcmask 7168  }
  0x52   :  { %126 = vperm.xlu1 %3640, %v111_v2   ;;  %120 = vperm.xlu0 %3639, %v109_v3   ;;  %v110_v5 = vld [vmem:[%s4961_s0 + $0x8] sm:$0xff]  ;;  %v113_v9 = vld [vmem:[%s4961_s0 + $0x20] sm:$0xff]  ;;  %v116_v11 = vld [vmem:[%s4961_s0 + $0x38] sm:$0xff]  ;;  %v4361_v59 = vsub.s32 1, %v4358_v58  ;;  %v4367_v61 = vsub.s32 0, %v4358_v58 }
  0x53   :  { %v114_v7 = vld [vmem:[%s4961_s0 + $0x28] sm:$0xff]  ;;  %v115_v12 = vld [vmem:[%s4961_s0 + $0x30] sm:$0xff]  ;;  %3484 = vmatpush3.bf16.msra.mxu0 %v3642_v8 }
  0x54   :  { %3485 = vmatprep.subr.bf16.mxu0 %v3643_v10  ;;  %653 = vmatpush1.bf16.msra.mxu1 %v4335_v45  ;;  %v298_v62 = vrot.slane %v289_v60, %v4361_v59  ;;  %v294_v0 = vrot.slane %v289_v60, %v4367_v61 }
  0x55   :  { %850 = vmatprep.subr.bf16.mxu1 %v4325_v42 }
  0x56   :  { %129 = vperm.xlu1 %3640, %v112_v4   ;;  %123 = vperm.xlu0 %3639, %v110_v5  }
  0x57   :  { %3486 = vmatpush3.bf16.msra.mxu0 %v3643_v10 }
  0x58   :  { %3626 = vmatprep.subr.msk.bf16.mxu0 %vm212_vm0, %v3644_v13 }
  0x5a   :  { %135 = vperm.xlu1 %3640, %v114_v7   ;;  %132 = vperm.xlu0 %3639, %v113_v9  }
  0x5b   :  { %3488 = vmatpush3.bf16.msra.mxu0 %v214_v14 }
  0x5c   :  { %334 = vmatprep.subr.bf16.mxu0 %v3647_v15 }
  0x5e   :  { %141 = vperm.xlu1 %3640, %v116_v11   ;;  %138 = vperm.xlu0 %3639, %v115_v12  }
  0xd1   :  { %v127_v18 = vpop.permute.xlu1 %126  ;;  %v121_v19 = vpop.permute.xlu0 %120 }
  0xd2   :  { %vm145_vm1 = vcmp.eq.s32.totalorder %v118_v17, %v127_v18  ;;  %vm143_vm2 = vcmp.eq.s32.totalorder %v118_v17, %v121_v19 }
  0xd3   :  { %v3225_v23 = vsel %vm145_vm1, 1.0, %v4108_v22  ;;  %v3223_v25 = vsel %vm143_vm2, 1.0, %v4108_v22 }
  0xd5   :  { %v130_v20 = vpop.permute.xlu1 %129  ;;  %v124_v21 = vpop.permute.xlu0 %123 }
  0xd6   :  { %vm146_vm3 = vcmp.eq.s32.totalorder %v118_v17, %v130_v20  ;;  %vm144_vm4 = vcmp.eq.s32.totalorder %v118_v17, %v124_v21 }
  0xd7   :  { %v3226_v24 = vsel %vm146_vm3, 1.0, %v4108_v22  ;;  %v3224_v26 = vsel %vm144_vm4, 1.0, %v4108_v22 }
  0xd8   :  { %v168_v27 = vpack.c.bf16 %v3226_v24, %v3225_v23  ;;  %v167_v28 = vpack.c.bf16 %v3224_v26, %v3223_v25 }
  0xd9   :  { %v136_v30 = vpop.permute.xlu1 %135  ;;  %v133_v31 = vpop.permute.xlu0 %132 }
  0xda   :  { %vm148_vm6 = vcmp.eq.s32.totalorder %v118_v17, %v136_v30  ;;  %vm147_vm7 = vcmp.eq.s32.totalorder %v118_v17, %v133_v31  ;;  %3489 = vmatprep.mubr.msk.bf16.mxu0 %vm199_vm5, %v167_v28 }
  0xdb   :  { %v3228_v33 = vsel %vm148_vm6, 1.0, %v4108_v22  ;;  %v3227_v34 = vsel %vm147_vm7, 1.0, %v4108_v22  ;;  %3490 = vmatmul.mubr.msk.bf16.vlgmr.msra.gmra.mrb[0].mxu0 %vm199_vm5, %v168_v27 }
  0xdc   :  { %v169_v35 = vpack.c.bf16 %v3228_v33, %v3227_v34  ;;  %335 = vmatpush1.bf16.msra.mxu0 %v3645_v29 }
  0xdd   :  { %v142_v37 = vpop.permute.xlu1 %141  ;;  %v139_v38 = vpop.permute.xlu0 %138  ;;  %336 = vmatprep.subr.bf16.mxu0 %v3650_v32 }
  0xde   :  { %vm150_vm8 = vcmp.eq.s32.totalorder %v118_v17, %v142_v37  ;;  %vm149_vm9 = vcmp.eq.s32.totalorder %v118_v17, %v139_v38  ;;  %3493 = vmatprep.mubr.msk.bf16.mxu0 %vm199_vm5, %v169_v35 }
  0xdf   :  { %v3230_v39 = vsel %vm150_vm8, 1.0, %v4108_v22  ;;  %v3229_v40 = vsel %vm149_vm9, 1.0, %v4108_v22 }
  0xe0   :  { %v170_v41 = vpack.c.bf16 %v3230_v39, %v3229_v40  ;;  %337 = vmatpush1.bf16.msra.mxu0 %v3648_v36 }
  0xe1   :  { %450 = vmatprep.subr.bf16.mxu0 %v4325_v42 }
  0xe3   :  { %3494 = vmatmul.mubr.msk.bf16.gmra.mrb[4].mxu0 %vm199_vm5, %v170_v41 }
  0xe4   :  { %366 = vmatprep.mubr.bf16.mxu0 %v4107_v1 }
 0x1ae   :  { %v3491_v46 = vpop.f32.mrb[0].mxu0 }
 0x1af   :  { %v250_v47 = vpop.f32.mrb[1].mxu0 }
 0x1b0   :  { %v3492_v48 = vpop.f32.mrb[2].mxu0 }
 0x1b1   :  { %v282_v49 = vpack.c.bf16 %v3492_v48, %v3491_v46  ;;  %v253_v50 = vpop.f32.mrb[3].mxu0 }
 0x1b2   :  { %v281_v51 = vpack.c.bf16 %v253_v50, %v250_v47 }
 0x1b4   :  { %3243 = vmatmul.mubr.msk.bf16.vlgmr.msra.gmra.mrb[8].mxu0 %vm321_vm10, %v281_v51 }
 0x1b5   :  { %451 = vmatpush1.bf16.msra.mxu0 %v4328_v43  ;;  %376 = vmatprep.mubr.bf16.mxu0 %v4107_v1 }
 0x1b6   :  { %v3495_v52 = vpop.f32.mrb[4].mxu0  ;;  %452 = vmatprep.subr.bf16.mxu0 %v4332_v44 }
 0x1b7   :  { %v266_v53 = vpop.f32.mrb[5].mxu0 }
 0x1b8   :  { %v3496_v54 = vpop.f32.mrb[6].mxu0 }
 0x1b9   :  { %v284_v55 = vpack.c.bf16 %v3496_v54, %v3495_v52  ;;  %v269_v56 = vpop.f32.mrb[7].mxu0  ;;  %453 = vmatpush1.bf16.msra.mxu0 %v4335_v45 }
 0x1ba   :  { %v283_v57 = vpack.c.bf16 %v269_v56, %v266_v53  ;;  %550 = vmatprep.subr.bf16.mxu0 %v4325_v42 }
 0x1bc   :  { %3244 = vmatmul.mubr.msk.bf16.gmra.mrb[12].mxu0 %vm321_vm10, %v282_v49 }
 0x1bd   :  { %386 = vmatprep.mubr.bf16.mxu0 %v4107_v1 }
 0x1c4   :  { %3245 = vmatmul.mubr.msk.bf16.gmra.mrb[16].mxu0 %vm321_vm10, %v283_v57 }
 0x1c5   :  { %396 = vmatprep.mubr.bf16.mxu0 %v4107_v1 }
 0x1cc   :  { %3246 = vmatmul.mubr.msk.bf16.gmra.mrb[20].mxu0 %vm321_vm10, %v284_v55 }
 0x1cd   :  { %482 = vmatprep.mubr.bf16.mxu0 %v4107_v1 }
 0x1d4   :  { %483 = vmatmul.mubr.bf16.vlgmr.msra.gmra.mrb[24].mxu0 %v4107_v1 }
 0x1d5   :  { %551 = vmatpush1.bf16.msra.mxu0 %v4328_v43  ;;  %582 = vmatprep.mubr.bf16.mxu0 %v4107_v1 }
 0x1d6   :  { %552 = vmatprep.subr.bf16.mxu0 %v4332_v44 }
 0x1d9   :  { %553 = vmatpush1.bf16.msra.mxu0 %v4335_v45 }
 0x1da   :  { %750 = vmatprep.subr.bf16.mxu0 %v4325_v42 }
 0x287   :  { %v368_v63 = vpop.f32.mrb[8].mxu0 }
 0x288   :  { %v370_v2 = vpop.f32.mrb[9].mxu0  ;;  %v369_v32 = vadd.f32 %v368_v63, %v294_v0 }
 0x289   :  { %v4371_v3 = vadd.f32 %v370_v2, %v298_v62  ;;  %v372_v4 = vpop.f32.mrb[10].mxu0 }
 0x28a   :  { %v4373_v5 = vadd.f32 %v372_v4, %v294_v0  ;;  %v374_v6 = vpop.f32.mrb[11].mxu0 }
 0x28b   :  { %v4375_v7 = vadd.f32 %v374_v6, %v298_v62 }
 0x28f   :  { %v378_v8 = vpop.f32.mrb[12].mxu0 }
 0x290   :  { %v4377_v9 = vadd.f32 %v378_v8, %v294_v0  ;;  %v380_v10 = vpop.f32.mrb[13].mxu0 }
 0x291   :  { %v4379_v11 = vadd.f32 %v380_v10, %v298_v62  ;;  %v382_v12 = vpop.f32.mrb[14].mxu0 }
 0x292   :  { %v4381_v13 = vadd.f32 %v382_v12, %v294_v0  ;;  %v384_v14 = vpop.f32.mrb[15].mxu0 }
 0x293   :  { %v4383_v15 = vadd.f32 %v384_v14, %v298_v62 }
 0x297   :  { %v388_v16 = vpop.f32.mrb[16].mxu0 }
 0x298   :  { %v4385_v17 = vadd.f32 %v388_v16, %v294_v0  ;;  %v390_v18 = vpop.f32.mrb[17].mxu0 }
 0x299   :  { %v4387_v19 = vadd.f32 %v390_v18, %v298_v62  ;;  %v392_v20 = vpop.f32.mrb[18].mxu0 }
 0x29a   :  { %v4389_v21 = vadd.f32 %v392_v20, %v294_v0  ;;  %v394_v23 = vpop.f32.mrb[19].mxu0 }
 0x29b   :  { %v4391_v24 = vadd.f32 %v394_v23, %v298_v62 }
 0x29f   :  { %v398_v25 = vpop.f32.mrb[20].mxu0 }
 0x2a0   :  { %v4393_v26 = vadd.f32 %v398_v25, %v294_v0  ;;  %v400_v27 = vpop.f32.mrb[21].mxu0 }
 0x2a1   :  { %v4395_v28 = vadd.f32 %v400_v27, %v298_v62  ;;  %v402_v29 = vpop.f32.mrb[22].mxu0 }
 0x2a2   :  { %v4397_v30 = vadd.f32 %v402_v29, %v294_v0  ;;  %v404_v31 = vpop.f32.mrb[23].mxu0 }
 0x2a3   :  { %v405_v36 = vadd.f32 %v404_v31, %v298_v62 }
 0x2a7   :  { %v484_v33 = vpop.f32.mrb[24].mxu0 }
 0x2a8   :  { %v492_v34 = vadd.f32 %v484_v33, %v369_v32  ;;  %v486_v35 = vpop.f32.mrb[25].mxu0 }
 0x2a9   :  { %v487_v37 = vpop.f32.mrb[26].mxu0 }
 0x2aa   :  { %3807 = vtanh.f32 %v492_v34  ;;  %v488_v38 = vpop.f32.mrb[27].mxu0  ;;  %v3251_v46 = vmul.f32 -1.442695, %v492_v34 }
 0x2ab   :  { %v494_v39 = vadd.f32 %v488_v38, %v405_v36 }
 0x2ad   :  { %3809 = vtanh.f32 %v494_v39  ;;  %v3252_v47 = vmul.f32 -1.442695, %v494_v39 }
 0x2ae   :  { %3811 = vpow2.f32 %v3251_v46 }
 0x2af   :  { %3813 = vpow2.f32 %v3252_v47 }
 0x2b4   :  { %v3808_v40 = vpop.eup %3807 }
 0x2b5   :  { %513 = vrot.lane.b32.xlu0 %v3808_v40, %s4109_s4 }
 0x2b7   :  { %v3810_v41 = vpop.eup %3809 }
 0x2b8   :  { %515 = vrot.lane.b32.xlu1 %v3810_v41, %s4109_s4  ;;  %v3812_v48 = vpop.eup %3811 }
 0x2b9   :  { %v3814_v49 = vpop.eup %3813  ;;  %v501_v50 = vadd.f32 1.0, %v3812_v48 }
 0x2ba   :  { %v502_v51 = vadd.f32 1.0, %v3814_v49 }
 0x2bb   :  { %3815 = vrcp.f32 %v501_v50 }
 0x2bc   :  { %3817 = vrcp.f32 %v502_v51 }
 0x2c5   :  { %v3816_v52 = vpop.eup %3815 }
 0x2c6   :  { %v3818_v55 = vpop.eup %3817  ;;  %v509_v60 = vmul.f32 0.0, %v3816_v52 }
 0x2c7   :  { %v510_v0 = vmul.f32 0.0, %v3818_v55 }
 0x327   :  { %v514_v53 = vpop.permute.xlu0 %513 }
 0x328   :  { %v519_v54 = vmul.f32 %v3816_v52, %v514_v53 }
 0x32a   :  { %523 = vrot.lane.b32.xlu0 %v519_v54, %s4110_s19  ;;  %v516_v56 = vpop.permute.xlu1 %515 }
 0x32b   :  { %v520_v57 = vmul.f32 %v3818_v55, %v516_v56 }
 0x32d   :  { %525 = vrot.lane.b32.xlu1 %v520_v57, %s4110_s19 }
 0x39c   :  { %v524_v62 = vpop.permute.xlu0 %523 }
 0x39d   :  { %v529_v63 = vadd.f32 %v524_v62, %v509_v60 }
 0x39f   :  { %3819 = vtanh.f32 %v529_v63  ;;  %v526_v2 = vpop.permute.xlu1 %525 }
 0x3a0   :  { %v530_v4 = vadd.f32 %v526_v2, %v510_v0 }
 0x3a2   :  { %3821 = vtanh.f32 %v530_v4 }
 0x3a9   :  { %v3820_v6 = vpop.eup %3819 }
 0x3aa   :  { %535 = vrot.lane.b32.xlu0 %v3820_v6, %s4109_s4 }
 0x3ac   :  { %v3822_v8 = vpop.eup %3821 }
 0x3ad   :  { %537 = vrot.lane.b32.xlu1 %v3822_v8, %s4109_s4 }
 0x41c   :  { %v536_v10 = vpop.permute.xlu0 %535 }
 0x41d   :  { %v4405_v14 = vmul.f32 %v3816_v52, %v536_v10 }
 0x41f   :  { %v538_v12 = vpop.permute.xlu1 %537 }
 0x420   :  { %v4407_v16 = vmul.f32 %v3818_v55, %v538_v12 }
 0x422   :  { %v543_v18 = vpack.c.bf16 %v4407_v16, %v4405_v14 }
 0x424   :  { %545 = vrot.lane.b32.xlu0 %v543_v18, %s4110_s19 }
 0x496   :  { %v546_v20 = vpop.permute.xlu0 %545 }
 0x497   :  { %3253 = vmatmul.mubr.msk.bf16.vlgmr.msra.gmra.mrb[28].mxu0 %vm321_vm10, %v546_v20 }
 0x498   :  { %751 = vmatpush1.bf16.msra.mxu0 %v4328_v43  ;;  %782 = vmatprep.mubr.bf16.mxu0 %v4107_v1 }
 0x499   :  { %752 = vmatprep.subr.bf16.mxu0 %v4332_v44 }
 0x49c   :  { %753 = vmatpush1.bf16.msra.mxu0 %v4335_v45 }
 0x49d   :  { %950 = vmatprep.subr.bf16.mxu0 %v4325_v42 }
 0x56a   :  { %v584_v23 = vpop.f32.mrb[28].mxu0 }
 0x56b   :  { %v592_v25 = vadd.f32 %v584_v23, %v4373_v5  ;;  %v586_v27 = vpop.f32.mrb[29].mxu0 }
 0x56c   :  { %v587_v29 = vpop.f32.mrb[30].mxu0 }
 0x56d   :  { %3823 = vtanh.f32 %v592_v25  ;;  %v588_v31 = vpop.f32.mrb[31].mxu0  ;;  %v3254_v35 = vmul.f32 -1.442695, %v592_v25 }
 0x56e   :  { %v594_v32 = vadd.f32 %v588_v31, %v4395_v28 }
 0x570   :  { %3825 = vtanh.f32 %v594_v32  ;;  %v3255_v36 = vmul.f32 -1.442695, %v594_v32 }
 0x571   :  { %3827 = vpow2.f32 %v3254_v35 }
 0x572   :  { %3829 = vpow2.f32 %v3255_v36 }
 0x577   :  { %v3824_v33 = vpop.eup %3823 }
 0x578   :  { %613 = vrot.lane.b32.xlu1 %v3824_v33, %s4109_s4 }
 0x57a   :  { %v3826_v34 = vpop.eup %3825 }
 0x57b   :  { %615 = vrot.lane.b32.xlu0 %v3826_v34, %s4109_s4  ;;  %v3828_v37 = vpop.eup %3827 }
 0x57c   :  { %v3830_v38 = vpop.eup %3829  ;;  %v601_v5 = vadd.f32 1.0, %v3828_v37 }
 0x57d   :  { %v602_v39 = vadd.f32 1.0, %v3830_v38 }
 0x57e   :  { %3831 = vrcp.f32 %v601_v5 }
 0x57f   :  { %3833 = vrcp.f32 %v602_v39 }
 0x588   :  { %v3832_v40 = vpop.eup %3831 }
 0x589   :  { %v3834_v46 = vpop.eup %3833  ;;  %v609_v49 = vmul.f32 %v3832_v40, %v529_v63 }
 0x58a   :  { %v610_v52 = vmul.f32 %v3834_v46, %v530_v4 }
 0x5ea   :  { %v614_v41 = vpop.permute.xlu1 %613 }
 0x5eb   :  { %v619_v28 = vmul.f32 %v3832_v40, %v614_v41 }
 0x5ed   :  { %623 = vrot.lane.b32.xlu1 %v619_v28, %s4110_s19  ;;  %v616_v47 = vpop.permute.xlu0 %615 }
 0x5ee   :  { %v620_v48 = vmul.f32 %v3834_v46, %v616_v47 }
 0x5f0   :  { %625 = vrot.lane.b32.xlu0 %v620_v48, %s4110_s19 }
 0x65f   :  { %v624_v50 = vpop.permute.xlu1 %623 }
 0x660   :  { %v629_v51 = vadd.f32 %v624_v50, %v609_v49 }
 0x662   :  { %3835 = vtanh.f32 %v629_v51  ;;  %v626_v53 = vpop.permute.xlu0 %625 }
 0x663   :  { %v630_v54 = vadd.f32 %v626_v53, %v610_v52 }
 0x665   :  { %3837 = vtanh.f32 %v630_v54 }
 0x66c   :  { %v3836_v55 = vpop.eup %3835 }
 0x66d   :  { %635 = vrot.lane.b32.xlu1 %v3836_v55, %s4109_s4 }
 0x66f   :  { %v3838_v56 = vpop.eup %3837 }
 0x670   :  { %637 = vrot.lane.b32.xlu0 %v3838_v56, %s4109_s4 }
 0x6df   :  { %v636_v57 = vpop.permute.xlu1 %635 }
 0x6e0   :  { %v4426_v62 = vmul.f32 %v3832_v40, %v636_v57 }
 0x6e2   :  { %v638_v60 = vpop.permute.xlu0 %637 }
 0x6e3   :  { %v4428_v0 = vmul.f32 %v3834_v46, %v638_v60 }
 0x6e5   :  { %v643_v63 = vpack.c.bf16 %v4428_v0, %v4426_v62 }
 0x6e7   :  { %645 = vrot.lane.b32.xlu1 %v643_v63, %s4110_s19 }
 0x759   :  { %v646_v2 = vpop.permute.xlu1 %645 }
 0x75a   :  { %3256 = vmatmul.mubr.msk.bf16.vlgmr.msra.gmra.mrb[0].mxu1 %vm321_vm10, %v646_v2 }
 0x75b   :  { %851 = vmatpush1.bf16.msra.mxu1 %v4328_v43  ;;  %882 = vmatprep.mubr.bf16.mxu1 %v4107_v1 }
 0x75c   :  { %852 = vmatprep.subr.bf16.mxu1 %v4332_v44 }
 0x75f   :  { %853 = vmatpush1.bf16.msra.mxu1 %v4335_v45 }
 0x760   :  { %1050 = vmatprep.subr.bf16.mxu1 %v4325_v42 }
 0x82d   :  { %v684_v4 = vpop.f32.mrb[0].mxu1 }
 0x82e   :  { %v692_v6 = vadd.f32 %v684_v4, %v4377_v9  ;;  %v686_v8 = vpop.f32.mrb[1].mxu1 }
 0x82f   :  { %v687_v10 = vpop.f32.mrb[2].mxu1 }
 0x830   :  { %3839 = vtanh.f32 %v692_v6  ;;  %v688_v12 = vpop.f32.mrb[3].mxu1  ;;  %v3257_v25 = vmul.f32 -1.442695, %v692_v6 }
 0x831   :  { %v694_v18 = vadd.f32 %v688_v12, %v4391_v24 }
 0x833   :  { %3841 = vtanh.f32 %v694_v18  ;;  %v3258_v27 = vmul.f32 -1.442695, %v694_v18 }
 0x834   :  { %3843 = vpow2.f32 %v3257_v25 }
 0x835   :  { %3845 = vpow2.f32 %v3258_v27 }
 0x83a   :  { %v3840_v20 = vpop.eup %3839 }
 0x83b   :  { %713 = vrot.lane.b32.xlu0 %v3840_v20, %s4109_s4 }
 0x83d   :  { %v3842_v23 = vpop.eup %3841 }
 0x83e   :  { %715 = vrot.lane.b32.xlu1 %v3842_v23, %s4109_s4  ;;  %v3844_v29 = vpop.eup %3843 }
 0x83f   :  { %v3846_v31 = vpop.eup %3845  ;;  %v701_v9 = vadd.f32 1.0, %v3844_v29 }
 0x840   :  { %v702_v32 = vadd.f32 1.0, %v3846_v31 }
 0x841   :  { %3847 = vrcp.f32 %v701_v9 }
 0x842   :  { %3849 = vrcp.f32 %v702_v32 }
 0x84b   :  { %v3848_v33 = vpop.eup %3847 }
 0x84c   :  { %v3850_v35 = vpop.eup %3849  ;;  %v709_v38 = vmul.f32 %v3848_v33, %v629_v51 }
 0x84d   :  { %v710_v40 = vmul.f32 %v3850_v35, %v630_v54 }
 0x8ad   :  { %v714_v34 = vpop.permute.xlu0 %713 }
 0x8ae   :  { %v719_v24 = vmul.f32 %v3848_v33, %v714_v34 }
 0x8b0   :  { %723 = vrot.lane.b32.xlu0 %v719_v24, %s4110_s19  ;;  %v716_v36 = vpop.permute.xlu1 %715 }
 0x8b1   :  { %v720_v37 = vmul.f32 %v3850_v35, %v716_v36 }
 0x8b3   :  { %725 = vrot.lane.b32.xlu1 %v720_v37, %s4110_s19 }
 0x922   :  { %v724_v5 = vpop.permute.xlu0 %723 }
 0x923   :  { %v729_v39 = vadd.f32 %v724_v5, %v709_v38 }
 0x925   :  { %3851 = vtanh.f32 %v729_v39  ;;  %v726_v41 = vpop.permute.xlu1 %725 }
 0x926   :  { %v730_v28 = vadd.f32 %v726_v41, %v710_v40 }
 0x928   :  { %3853 = vtanh.f32 %v730_v28 }
 0x92f   :  { %v3852_v46 = vpop.eup %3851 }
 0x930   :  { %735 = vrot.lane.b32.xlu0 %v3852_v46, %s4109_s4 }
 0x932   :  { %v3854_v47 = vpop.eup %3853 }
 0x933   :  { %737 = vrot.lane.b32.xlu1 %v3854_v47, %s4109_s4 }
 0x9a2   :  { %v736_v48 = vpop.permute.xlu0 %735 }
 0x9a3   :  { %v4447_v50 = vmul.f32 %v3848_v33, %v736_v48 }
 0x9a5   :  { %v738_v49 = vpop.permute.xlu1 %737 }
 0x9a6   :  { %v4449_v52 = vmul.f32 %v3850_v35, %v738_v49 }
 0x9a8   :  { %v743_v51 = vpack.c.bf16 %v4449_v52, %v4447_v50 }
 0x9aa   :  { %745 = vrot.lane.b32.xlu0 %v743_v51, %s4110_s19 }
 0xa1c   :  { %v746_v53 = vpop.permute.xlu0 %745 }
 0xa1d   :  { %3259 = vmatmul.mubr.msk.bf16.vlgmr.msra.gmra.mrb[32].mxu0 %vm321_vm10, %v746_v53 }
 0xa1e   :  { %951 = vmatpush1.bf16.msra.mxu0 %v4328_v43  ;;  %982 = vmatprep.mubr.bf16.mxu0 %v4107_v1 }
 0xa1f   :  { %952 = vmatprep.subr.bf16.mxu0 %v4332_v44 }
 0xa22   :  { %953 = vmatpush1.bf16.msra.mxu0 %v4335_v45 }
 0xa23   :  { %1150 = vmatprep.subr.bf16.mxu0 %v4325_v42 }
 0xaf0   :  { %v784_v54 = vpop.f32.mrb[32].mxu0 }
 0xaf1   :  { %v792_v55 = vadd.f32 %v784_v54, %v4381_v13  ;;  %v786_v56 = vpop.f32.mrb[33].mxu0 }
 0xaf2   :  { %v787_v57 = vpop.f32.mrb[34].mxu0 }
 0xaf3   :  { %3855 = vtanh.f32 %v792_v55  ;;  %v788_v60 = vpop.f32.mrb[35].mxu0  ;;  %v3260_v6 = vmul.f32 -1.442695, %v792_v55 }
 0xaf4   :  { %v794_v63 = vadd.f32 %v788_v60, %v4387_v19 }
 0xaf6   :  { %3857 = vtanh.f32 %v794_v63  ;;  %v3261_v8 = vmul.f32 -1.442695, %v794_v63 }
 0xaf7   :  { %3859 = vpow2.f32 %v3260_v6 }
 0xaf8   :  { %3861 = vpow2.f32 %v3261_v8 }
 0xafd   :  { %v3856_v2 = vpop.eup %3855 }
 0xafe   :  { %813 = vrot.lane.b32.xlu1 %v3856_v2, %s4109_s4 }
 0xb00   :  { %v3858_v4 = vpop.eup %3857 }
 0xb01   :  { %815 = vrot.lane.b32.xlu0 %v3858_v4, %s4109_s4  ;;  %v3860_v42 = vpop.eup %3859 }
 0xb02   :  { %v3862_v10 = vpop.eup %3861  ;;  %v801_v13 = vadd.f32 1.0, %v3860_v42 }
 0xb03   :  { %v802_v12 = vadd.f32 1.0, %v3862_v10 }
 0xb04   :  { %3863 = vrcp.f32 %v801_v13 }
 0xb05   :  { %3865 = vrcp.f32 %v802_v12 }
 0xb0e   :  { %v3864_v18 = vpop.eup %3863 }
 0xb0f   :  { %v3866_v23 = vpop.eup %3865  ;;  %v809_v29 = vmul.f32 %v3864_v18, %v729_v39 }
 0xb10   :  { %v810_v32 = vmul.f32 %v3866_v23, %v730_v28 }
 0xb70   :  { %v814_v20 = vpop.permute.xlu1 %813 }
 0xb71   :  { %v819_v19 = vmul.f32 %v3864_v18, %v814_v20 }
 0xb73   :  { %823 = vrot.lane.b32.xlu1 %v819_v19, %s4110_s19  ;;  %v816_v25 = vpop.permute.xlu0 %815 }
 0xb74   :  { %v820_v27 = vmul.f32 %v3866_v23, %v816_v25 }
 0xb76   :  { %825 = vrot.lane.b32.xlu0 %v820_v27, %s4110_s19 }
 0xbe5   :  { %v824_v31 = vpop.permute.xlu1 %823 }
 0xbe6   :  { %v829_v9 = vadd.f32 %v824_v31, %v809_v29 }
 0xbe8   :  { %3867 = vtanh.f32 %v829_v9  ;;  %v826_v33 = vpop.permute.xlu0 %825 }
 0xbe9   :  { %v830_v34 = vadd.f32 %v826_v33, %v810_v32 }
 0xbeb   :  { %3869 = vtanh.f32 %v830_v34 }
 0xbf2   :  { %v3868_v24 = vpop.eup %3867 }
 0xbf3   :  { %835 = vrot.lane.b32.xlu1 %v3868_v24, %s4109_s4 }
 0xbf5   :  { %v3870_v35 = vpop.eup %3869 }
 0xbf6   :  { %837 = vrot.lane.b32.xlu0 %v3870_v35, %s4109_s4 }
 0xc65   :  { %v836_v36 = vpop.permute.xlu1 %835 }
 0xc66   :  { %v4468_v38 = vmul.f32 %v3864_v18, %v836_v36 }
 0xc68   :  { %v838_v37 = vpop.permute.xlu0 %837 }
 0xc69   :  { %v4470_v5 = vmul.f32 %v3866_v23, %v838_v37 }
 0xc6b   :  { %v843_v39 = vpack.c.bf16 %v4470_v5, %v4468_v38 }
 0xc6d   :  { %845 = vrot.lane.b32.xlu1 %v843_v39, %s4110_s19 }
 0xcdf   :  { %v846_v40 = vpop.permute.xlu1 %845 }
 0xce0   :  { %3262 = vmatmul.mubr.msk.bf16.vlgmr.msra.gmra.mrb[4].mxu1 %vm321_vm10, %v846_v40 }
 0xce1   :  { %1051 = vmatpush1.bf16.msra.mxu1 %v4328_v43  ;;  %1082 = vmatprep.mubr.bf16.mxu1 %v4107_v1 }
 0xce2   :  { %1052 = vmatprep.subr.bf16.mxu1 %v4332_v44 }
 0xce5   :  { %1053 = vmatpush1.bf16.msra.mxu1 %v4335_v45 }
 0xdb3   :  { %v884_v41 = vpop.f32.mrb[4].mxu1 }
 0xdb4   :  { %v892_v28 = vadd.f32 %v884_v41, %v4385_v17  ;;  %v886_v46 = vpop.f32.mrb[5].mxu1 }
 0xdb5   :  { %v887_v47 = vpop.f32.mrb[6].mxu1 }
 0xdb6   :  { %3871 = vtanh.f32 %v892_v28  ;;  %v888_v48 = vpop.f32.mrb[7].mxu1  ;;  %v3263_v54 = vmul.f32 -1.442695, %v892_v28 }
 0xdb7   :  { %v894_v49 = vadd.f32 %v888_v48, %v4383_v15 }
 0xdb9   :  { %3873 = vtanh.f32 %v894_v49  ;;  %v3264_v55 = vmul.f32 -1.442695, %v894_v49 }
 0xdba   :  { %3875 = vpow2.f32 %v3263_v54 }
 0xdbb   :  { %3877 = vpow2.f32 %v3264_v55 }
 0xdc0   :  { %v3872_v51 = vpop.eup %3871 }
 0xdc1   :  { %913 = vrot.lane.b32.xlu0 %v3872_v51, %s4109_s4 }
 0xdc3   :  { %v3874_v53 = vpop.eup %3873 }
 0xdc4   :  { %915 = vrot.lane.b32.xlu1 %v3874_v53, %s4109_s4  ;;  %v3876_v56 = vpop.eup %3875 }
 0xdc5   :  { %v3878_v57 = vpop.eup %3877  ;;  %v901_v17 = vadd.f32 1.0, %v3876_v56 }
 0xdc6   :  { %v902_v60 = vadd.f32 1.0, %v3878_v57 }
 0xdc7   :  { %3879 = vrcp.f32 %v901_v17 }
 0xdc8   :  { %3881 = vrcp.f32 %v902_v60 }
 0xdd1   :  { %v3880_v63 = vpop.eup %3879 }
 0xdd2   :  { %v3882_v4 = vpop.eup %3881  ;;  %v909_v42 = vmul.f32 %v3880_v63, %v829_v9 }
 0xdd3   :  { %v910_v12 = vmul.f32 %v3882_v4, %v830_v34 }
 0xe33   :  { %v914_v2 = vpop.permute.xlu0 %913 }
 0xe34   :  { %v919_v15 = vmul.f32 %v3880_v63, %v914_v2 }
 0xe36   :  { %v916_v6 = vpop.permute.xlu1 %915  ;;  %923 = vrot.lane.b32.xlu0 %v919_v15, %s4110_s19 }
 0xe37   :  { %v920_v8 = vmul.f32 %v3882_v4, %v916_v6 }
 0xe39   :  { %925 = vrot.lane.b32.xlu1 %v920_v8, %s4110_s19 }
 0xea8   :  { %v924_v10 = vpop.permute.xlu0 %923 }
 0xea9   :  { %v929_v13 = vadd.f32 %v924_v10, %v909_v42 }
 0xeab   :  { %3883 = vtanh.f32 %v929_v13  ;;  %v926_v18 = vpop.permute.xlu1 %925 }
 0xeac   :  { %v930_v20 = vadd.f32 %v926_v18, %v910_v12 }
 0xeae   :  { %3885 = vtanh.f32 %v930_v20 }
 0xeb5   :  { %v3884_v19 = vpop.eup %3883 }
 0xeb6   :  { %935 = vrot.lane.b32.xlu0 %v3884_v19, %s4109_s4 }
 0xeb8   :  { %v3886_v23 = vpop.eup %3885 }
 0xeb9   :  { %937 = vrot.lane.b32.xlu1 %v3886_v23, %s4109_s4 }
 0xf28   :  { %v936_v25 = vpop.permute.xlu0 %935 }
 0xf29   :  { %v4488_v29 = vmul.f32 %v3880_v63, %v936_v25 }
 0xf2b   :  { %v938_v27 = vpop.permute.xlu1 %937 }
 0xf2c   :  { %v4490_v31 = vmul.f32 %v3882_v4, %v938_v27 }
 0xf2e   :  { %v943_v9 = vpack.c.bf16 %v4490_v31, %v4488_v29 }
 0xf30   :  { %945 = vrot.lane.b32.xlu0 %v943_v9, %s4110_s19 }
 0xfa2   :  { %v946_v32 = vpop.permute.xlu0 %945 }
 0xfa3   :  { %3265 = vmatmul.mubr.msk.bf16.vlgmr.msra.gmra.mrb[36].mxu0 %vm321_vm10, %v946_v32 }
 0xfa4   :  { %1151 = vmatpush1.bf16.msra.mxu0 %v4328_v43  ;;  %1182 = vmatprep.mubr.bf16.mxu0 %v4107_v1 }
 0xfa5   :  { %1152 = vmatprep.subr.bf16.mxu0 %v4332_v44 }
 0xfa8   :  { %1153 = vmatpush1.bf16.msra.mxu0 %v4335_v45 }
0x1076   :  { %v984_v33 = vpop.f32.mrb[36].mxu0 }
0x1077   :  { %v992_v34 = vadd.f32 %v984_v33, %v4389_v21  ;;  %v986_v24 = vpop.f32.mrb[37].mxu0 }
0x1078   :  { %v987_v35 = vpop.f32.mrb[38].mxu0 }
0x1079   :  { %3887 = vtanh.f32 %v992_v34  ;;  %v988_v36 = vpop.f32.mrb[39].mxu0  ;;  %v3266_v40 = vmul.f32 -1.442695, %v992_v34 }
0x107a   :  { %v994_v37 = vadd.f32 %v988_v36, %v4379_v11 }
0x107c   :  { %3889 = vtanh.f32 %v994_v37  ;;  %v3267_v44 = vmul.f32 -1.442695, %v994_v37 }
0x107d   :  { %3891 = vpow2.f32 %v3266_v40 }
0x107e   :  { %3893 = vpow2.f32 %v3267_v44 }
0x1083   :  { %v3888_v39 = vpop.eup %3887 }
0x1084   :  { %1013 = vrot.lane.b32.xlu1 %v3888_v39, %s4109_s4 }
0x1086   :  { %v3890_v43 = vpop.eup %3889 }
0x1087   :  { %1015 = vrot.lane.b32.xlu0 %v3890_v43, %s4109_s4  ;;  %v3892_v45 = vpop.eup %3891 }
0x1088   :  { %v3894_v41 = vpop.eup %3893  ;;  %v1001_v21 = vadd.f32 1.0, %v3892_v45 }
0x1089   :  { %v1002_v28 = vadd.f32 1.0, %v3894_v41 }
0x108a   :  { %3895 = vrcp.f32 %v1001_v21 }
0x108b   :  { %3897 = vrcp.f32 %v1002_v28 }
0x1094   :  { %v3896_v46 = vpop.eup %3895 }
0x1095   :  { %v3898_v48 = vpop.eup %3897  ;;  %v1009_v53 = vmul.f32 %v3896_v46, %v929_v13 }
0x1096   :  { %v1010_v56 = vmul.f32 %v3898_v48, %v930_v20 }
0x10f6   :  { %v1014_v47 = vpop.permute.xlu1 %1013 }
0x10f7   :  { %v1019_v11 = vmul.f32 %v3896_v46, %v1014_v47 }
0x10f9   :  { %1023 = vrot.lane.b32.xlu1 %v1019_v11, %s4110_s19  ;;  %v1016_v49 = vpop.permute.xlu0 %1015 }
0x10fa   :  { %v1020_v51 = vmul.f32 %v3898_v48, %v1016_v49 }
0x10fc   :  { %1025 = vrot.lane.b32.xlu0 %v1020_v51, %s4110_s19 }
0x116b   :  { %v1024_v54 = vpop.permute.xlu1 %1023 }
0x116c   :  { %v1029_v55 = vadd.f32 %v1024_v54, %v1009_v53 }
0x116e   :  { %3899 = vtanh.f32 %v1029_v55  ;;  %v1026_v57 = vpop.permute.xlu0 %1025 }
0x116f   :  { %v1030_v17 = vadd.f32 %v1026_v57, %v1010_v56 }
0x1171   :  { %3901 = vtanh.f32 %v1030_v17 }
0x1178   :  { %v3900_v60 = vpop.eup %3899 }
0x1179   :  { %1035 = vrot.lane.b32.xlu1 %v3900_v60, %s4109_s4 }
0x117b   :  { %v3902_v63 = vpop.eup %3901 }
0x117c   :  { %1037 = vrot.lane.b32.xlu0 %v3902_v63, %s4109_s4 }
0x11eb   :  { %v1036_v2 = vpop.permute.xlu1 %1035 }
0x11ec   :  { %v4508_v4 = vmul.f32 %v3896_v46, %v1036_v2 }
0x11ee   :  { %v1038_v15 = vpop.permute.xlu0 %1037 }
0x11ef   :  { %v4510_v6 = vmul.f32 %v3898_v48, %v1038_v15 }
0x11f1   :  { %v1043_v8 = vpack.c.bf16 %v4510_v6, %v4508_v4 }
0x11f3   :  { %1045 = vrot.lane.b32.xlu1 %v1043_v8, %s4110_s19 }
0x1265   :  { %v1046_v42 = vpop.permute.xlu1 %1045 }
0x1266   :  { %3268 = vmatmul.mubr.msk.bf16.vlgmr.msra.gmra.mrb[8].mxu1 %vm321_vm10, %v1046_v42 }
0x1267   :  { %1335 = vmatprep.mubr.bf16.mxu1 %v4107_v1 }
0x1339   :  { %v1084_v10 = vpop.f32.mrb[8].mxu1 }
0x133a   :  { %v1092_v13 = vadd.f32 %v1084_v10, %v4393_v26  ;;  %v1086_v12 = vpop.f32.mrb[9].mxu1 }
0x133b   :  { %v1087_v18 = vpop.f32.mrb[10].mxu1 }
0x133c   :  { %3903 = vtanh.f32 %v1092_v13  ;;  %v1088_v20 = vpop.f32.mrb[11].mxu1  ;;  %v3269_v27 = vmul.f32 -1.442695, %v1092_v13 }
0x133d   :  { %v1094_v19 = vadd.f32 %v1088_v20, %v4375_v7 }
0x133f   :  { %3905 = vtanh.f32 %v1094_v19  ;;  %v3270_v9 = vmul.f32 -1.442695, %v1094_v19  ;;  %v3659_v19 = vld [vmem:[%s4947_s5 + $0x24] ss:$8 sps:$4 sm:$0xff]  }
0x1340   :  { %3907 = vpow2.f32 %v3269_v27  ;;  %1303 = vmatprep.subr.bf16.mxu1 %v3659_v19  ;;  %v3660_v27 = vld [vmem:[%s4947_s5 + $0x30] ss:$8 sps:$4 sm:$0xff]  }
0x1341   :  { %3909 = vpow2.f32 %v3270_v9  ;;  %v1250_v9 = vpack.c.bf16 %v4407_v16, %v4428_v0  ;;  %v3669_v16 = vld [vmem:[%s4947_s5 + $0x14] ss:$8 sps:$4 sm:$0xff]  }
0x1346   :  { %v3904_v23 = vpop.eup %3903 }
0x1347   :  { %1113 = vrot.lane.b32.xlu0 %v3904_v23, %s4109_s4  ;;  %v1248_v23 = vpack.c.bf16 %v4490_v31, %v4510_v6 }
0x1349   :  { %v3906_v25 = vpop.eup %3905 }
0x134a   :  { %1115 = vrot.lane.b32.xlu1 %v3906_v25, %s4109_s4  ;;  %v3908_v32 = vpop.eup %3907  ;;  %v3662_v25 = vld [vmem:[%s4947_s5 + $0x34] ss:$8 sps:$4 sm:$0xff]  }
0x134b   :  { %v3910_v33 = vpop.eup %3909  ;;  %v1101_v26 = vadd.f32 1.0, %v3908_v32  ;;  %v3665_v32 = vld [vmem:[%s4947_s5 + $0x4] ss:$8 sps:$4 sm:$0xff]  }
0x134c   :  { %v1102_v34 = vadd.f32 1.0, %v3910_v33  ;;  %v3663_v33 = vld [vmem:[%s4947_s5] ss:$8 sps:$4 sm:$0xff]   ;;  %1420 = vmatprep.subr.bf16.mxu0 %v3665_v32 }
0x134d   :  { %3911 = vrcp.f32 %v1101_v26  ;;  %v3667_v26 = vld [vmem:[%s4947_s5 + $0x10] ss:$8 sps:$4 sm:$0xff]  }
0x134e   :  { %3913 = vrcp.f32 %v1102_v34 }
0x1357   :  { %v3912_v24 = vpop.eup %3911 }
0x1358   :  { %v3914_v36 = vpop.eup %3913  ;;  %v1109_v43 = vmul.f32 %v3912_v24, %v1029_v55 }
0x1359   :  { %v1110_v45 = vmul.f32 %v3914_v36, %v1030_v17 }
0x13b9   :  { %v1114_v35 = vpop.permute.xlu0 %1113 }
0x13ba   :  { %v1119_v7 = vmul.f32 %v3912_v24, %v1114_v35 }
0x13bc   :  { %1123 = vrot.lane.b32.xlu0 %v1119_v7, %s4110_s19  ;;  %v1116_v37 = vpop.permute.xlu1 %1115 }
0x13bd   :  { %v1120_v39 = vmul.f32 %v3914_v36, %v1116_v37  ;;  %v1249_v37 = vpack.c.bf16 %v4449_v52, %v4470_v5 }
0x13bf   :  { %1125 = vrot.lane.b32.xlu1 %v1120_v39, %s4110_s19 }
0x142e   :  { %v1124_v40 = vpop.permute.xlu0 %1123 }
0x142f   :  { %v4523_v44 = vadd.f32 %v1124_v40, %v1109_v43  ;;  %v1243_v43 = vpack.c.bf16 %v4426_v62, %v4405_v14  ;;  %v4595_v14 = vld [vmem:[%s4948_s6 + $0x10] ss:$8 sps:$4 sm:$0xff]  }
0x1431   :  { %3915 = vtanh.f32 %v4523_v44  ;;  %v1126_v41 = vpop.permute.xlu1 %1125 }
0x1432   :  { %v1130_v21 = vadd.f32 %v1126_v41, %v1110_v45 }
0x1434   :  { %3917 = vtanh.f32 %v1130_v21 }
0x143b   :  { %v3916_v28 = vpop.eup %3915 }
0x143c   :  { %1135 = vrot.lane.b32.xlu0 %v3916_v28, %s4109_s4 }
0x143e   :  { %v3918_v46 = vpop.eup %3917 }
0x143f   :  { %1137 = vrot.lane.b32.xlu1 %v3918_v46, %s4109_s4 }
0x14ae   :  { %v1136_v47 = vpop.permute.xlu0 %1135 }
0x14af   :  { %v4528_v48 = vmul.f32 %v3912_v24, %v1136_v47 }
0x14b1   :  { %v1138_v11 = vpop.permute.xlu1 %1137 }
0x14b2   :  { %v4530_v49 = vmul.f32 %v3914_v36, %v1138_v11  ;;  %v1244_v11 = vpack.c.bf16 %v4468_v38, %v4447_v50 }
0x14b4   :  { %v1143_v51 = vpack.c.bf16 %v4530_v49, %v4528_v48 }
0x14b6   :  { %1145 = vrot.lane.b32.xlu0 %v1143_v51, %s4110_s19 }
0x1528   :  { %v1146_v53 = vpop.permute.xlu0 %1145 }
0x1529   :  { %3271 = vmatmul.mubr.msk.bf16.vlgmr.msra.gmra.mrb[40].mxu0 %vm321_vm10, %v1146_v53 }
0x152a   :  { %1452 = vmatprep.mubr.bf16.mxu0 %v4107_v1  ;;  %1421 = vmatpush1.bf16.msra.mxu0 %v3663_v33 }
0x152b   :  { %1422 = vmatprep.subr.bf16.mxu0 %v3669_v16 }
0x152e   :  { %1423 = vmatpush1.bf16.msra.mxu0 %v3667_v26 }
0x152f   :  { %3505 = vmatprep.subr.bf16.mxu0 %v4108_v22 }
0x15fc   :  { %v1184_v54 = vpop.f32.mrb[40].mxu0 }
0x15fd   :  { %v1192_v55 = vadd.f32 %v1184_v54, %v4397_v30  ;;  %v1186_v56 = vpop.f32.mrb[41].mxu0 }
0x15fe   :  { %v1187_v57 = vpop.f32.mrb[42].mxu0 }
0x15ff   :  { %v1188_v17 = vpop.f32.mrb[43].mxu0  ;;  %v3272_v6 = vmul.f32 -1.442695, %v1192_v55 }
0x1600   :  { %v1194_v60 = vadd.f32 %v1188_v17, %v4371_v3  ;;  %v3657_v3 = vld [vmem:[%s4947_s5 + $0x20] ss:$8 sps:$4 sm:$0xff]  }
0x1601   :  { %1304 = vmatpush1.bf16.msra.mxu1 %v3657_v3  ;;  %v4631_v3 = vld [vmem:[#allocation8] sm:$0x3] }
0x1602   :  { %3919 = vtanh.f32 %v1194_v60  ;;  %v3273_v2 = vmul.f32 -1.442695, %v1194_v60  ;;  %1305 = vmatprep.subr.bf16.mxu1 %v3662_v25 }
0x1604   :  { %3921 = vpow2.f32 %v3273_v2 }
0x1605   :  { %1306 = vmatpush1.bf16.msra.mxu1 %v3660_v27  ;;  %v4637_v27 = vrot.slane %v4631_v3, %v4367_v61 }
0x1606   :  { %3497 = vmatprep.subr.bf16.mxu1 %v4108_v22 }
0x160c   :  { %v3920_v63 = vpop.eup %3919 }
0x160d   :  { %1215 = vrot.lane.b32.xlu1 %v3920_v63, %s4109_s4 }
0x160e   :  { %v3922_v15 = vpop.eup %3921 }
0x160f   :  { %v1202_v8 = vadd.f32 1.0, %v3922_v15 }
0x1611   :  { %3923 = vrcp.f32 %v1202_v8 }
0x161b   :  { %v3924_v42 = vpop.eup %3923 }
0x161c   :  { %v1210_v30 = vmul.f32 %v3924_v42, %v1130_v21  ;;  %v4587_v21 = vld [vmem:[%s4948_s6] ss:$8 sps:$4 sm:$0xff]  }
0x167f   :  { %v1216_v10 = vpop.permute.xlu1 %1215 }
0x1680   :  { %v1220_v13 = vmul.f32 %v3924_v42, %v1216_v10 }
0x1682   :  { %1225 = vrot.lane.b32.xlu0 %v1220_v13, %s4110_s19 }
0x16f4   :  { %v1226_v12 = vpop.permute.xlu0 %1225 }
0x16f5   :  { %v1230_v18 = vadd.f32 %v1226_v12, %v1210_v30 }
0x16f7   :  { %3925 = vtanh.f32 %v1230_v18 }
0x16f8   :  { %3927 = vtanh.f32 %v1192_v55 }
0x16f9   :  { %3929 = vpow2.f32 %v3272_v6 }
0x1701   :  { %v3926_v20 = vpop.eup %3925 }
0x1702   :  { %1237 = vrot.lane.b32.xlu1 %v3926_v20, %s4109_s4  ;;  %v3928_v31 = vpop.eup %3927 }
0x1703   :  { %v3930_v0 = vpop.eup %3929 }
0x1704   :  { %v1201_v34 = vadd.f32 1.0, %v3930_v0 }
0x1706   :  { %1265 = vrot.lane.b32.xlu1 %v1248_v23, %s4110_s19  ;;  %3931 = vrcp.f32 %v1201_v34 }
0x170a   :  { %1269 = vrot.lane.b32.xlu1 %v1250_v9, %s4110_s19 }
0x170e   :  { %1213 = vrot.lane.b32.xlu1 %v3928_v31, %s4109_s4 }
0x1710   :  { %v3932_v40 = vpop.eup %3931 }
0x1711   :  { %v1209_v5 = vmul.f32 %v3932_v40, %v4523_v44 }
0x1774   :  { %v1238_v24 = vpop.permute.xlu1 %1237 }
0x1775   :  { %v1242_v35 = vmul.f32 %v3924_v42, %v1238_v24 }
0x1777   :  { %v1247_v7 = vpack.c.bf16 %v4530_v49, %v1242_v35 }
0x1778   :  { %v1266_v36 = vpop.permute.xlu1 %1265 }
0x1779   :  { %1263 = vrot.lane.b32.xlu0 %v1247_v7, %s4110_s19 }
0x177c   :  { %v1270_v39 = vpop.permute.xlu1 %1269 }
0x177d   :  { %1267 = vrot.lane.b32.xlu0 %v1249_v37, %s4110_s19 }
0x1780   :  { %v1214_v45 = vpop.permute.xlu1 %1213 }
0x1781   :  { %v1219_v41 = vmul.f32 %v3932_v40, %v1214_v45  ;;  %1380 = vrot.lane.b32.xlu0 %v1243_v43, %s4110_s19 }
0x1783   :  { %1223 = vrot.lane.b32.xlu1 %v1219_v41, %s4110_s19 }
0x17eb   :  { %v1264_v28 = vpop.permute.xlu0 %1263 }
0x17ec   :  { %3278 = vmatmul.mubr.msk.bf16.vlgmr.msra.gmra.mrb[12].mxu1 %vm321_vm10, %v1264_v28 }
0x17ed   :  { %3498 = vmatpush3.bf16.msra.mxu1 %v4587_v21  ;;  %1345 = vmatprep.mubr.bf16.mxu1 %v4107_v1 }
0x17ee   :  { %3499 = vmatprep.subr.bf16.mxu1 %v4108_v22 }
0x17ef   :  { %v1268_v62 = vpop.permute.xlu0 %1267 }
0x17f1   :  { %3500 = vmatpush3.bf16.msra.mxu1 %v4595_v14 }
0x17f2   :  { %3513 = vmatprep.subr.bf16.mxu1 %v4108_v22 }
0x17f3   :  { %v1381_v52 = vpop.permute.xlu0 %1380 }
0x17f4   :  { %3279 = vmatmul.mubr.msk.bf16.gmra.mrb[16].mxu1 %vm321_vm10, %v1266_v36  ;;  %3286 = vmatmul.mubr.msk.bf16.vlgmr.msra.gmra.mrb[44].mxu0 %vm321_vm10, %v1381_v52 }
0x17f5   :  { %v1224_v46 = vpop.permute.xlu1 %1223  ;;  %1355 = vmatprep.mubr.bf16.mxu1 %v4107_v1  ;;  %1462 = vmatprep.mubr.bf16.mxu0 %v4107_v1 }
0x17f6   :  { %v1229_v47 = vadd.f32 %v1224_v46, %v1209_v5  ;;  %3506 = vmatpush3.bf16.msra.mxu0 %v4587_v21  ;;  %v1245_v46 = vpack.c.bf16 %v4508_v4, %v4488_v29 }
0x17f7   :  { %3507 = vmatprep.subr.bf16.mxu0 %v4108_v22 }
0x17f8   :  { %3933 = vtanh.f32 %v1229_v47 }
0x17fa   :  { %3508 = vmatpush3.bf16.msra.mxu0 %v4595_v14 }
0x17fb   :  { %3521 = vmatprep.subr.bf16.mxu0 %v4108_v22 }
0x17fc   :  { %3280 = vmatmul.mubr.msk.bf16.gmra.mrb[20].mxu1 %vm321_vm10, %v1268_v62 }
0x17fd   :  { %1365 = vmatprep.mubr.bf16.mxu1 %v4107_v1 }
0x1802   :  { %v3934_v44 = vpop.eup %3933 }
0x1803   :  { %1235 = vrot.lane.b32.xlu1 %v3934_v44, %s4109_s4 }
0x1804   :  { %3281 = vmatmul.mubr.msk.bf16.gmra.mrb[24].mxu1 %vm321_vm10, %v1270_v39 }
0x1805   :  { %3501 = vmatprep.mubr.msk.bf16.mxu1 %vm4111_vm11, %v4108_v22 }
0x1807   :  { %1382 = vrot.lane.b32.xlu1 %v1244_v11, %s4110_s19 }
0x180c   :  { %3502 = vmatmul.mubr.bf16.vlgmr.msra.gmra.mrb[28].mxu1 %v4107_v1 }
0x180d   :  { %3514 = vmatpush3.bf16.msra.mxu1 %v4587_v21  ;;  %3517 = vmatprep.mubr.msk.bf16.mxu1 %vm4111_vm11, %v4108_v22 }
0x180e   :  { %3515 = vmatprep.subr.bf16.mxu1 %v4108_v22 }
0x1811   :  { %3516 = vmatpush3.bf16.msra.mxu1 %v4595_v14 }
0x1812   :  { %3529 = vmatprep.subr.bf16.mxu1 %v4108_v22 }
0x1875   :  { %v1236_v50 = vpop.permute.xlu1 %1235 }
0x1876   :  { %v1241_v38 = vmul.f32 %v3932_v40, %v1236_v50 }
0x1878   :  { %v1246_v49 = vpack.c.bf16 %v1241_v38, %v4528_v48 }
0x1879   :  { %v1383_v51 = vpop.permute.xlu1 %1382 }
0x187a   :  { %1386 = vrot.lane.b32.xlu1 %v1246_v49, %s4110_s19  ;;  %3287 = vmatmul.mubr.msk.bf16.gmra.mrb[48].mxu0 %vm321_vm10, %v1383_v51 }
0x187b   :  { %1472 = vmatprep.mubr.bf16.mxu0 %v4107_v1 }
0x18bf   :  { %v1337_v53 = vpop.f32.mrb[12].mxu1 }
0x18c0   :  { %v1339_v54 = vpop.f32.mrb[13].mxu1 }
0x18c1   :  { %v1341_v55 = vpop.f32.mrb[14].mxu1 }
0x18c2   :  { %v1343_v56 = vpop.f32.mrb[15].mxu1 }
0x18c7   :  { %v1347_v57 = vpop.f32.mrb[16].mxu1  ;;  %v1454_v17 = vpop.f32.mrb[44].mxu0 }
0x18c8   :  { %v1455_v60 = vadd.f32 %v1454_v17, %v1337_v53  ;;  %v1349_v63 = vpop.f32.mrb[17].mxu1  ;;  %v1456_v2 = vpop.f32.mrb[45].mxu0 }
0x18c9   :  { %v1351_v15 = vpop.f32.mrb[18].mxu1  ;;  %v1458_v8 = vpop.f32.mrb[46].mxu0 }
0x18ca   :  { %v4629_v42 = vadd.f32 %v1458_v8, %v1341_v55  ;;  %v1353_v48 = vpop.f32.mrb[19].mxu1  ;;  %v1460_v10 = vpop.f32.mrb[47].mxu0  ;;  %v1505_v9 = vadd.f32 %v4637_v27, %v1455_v60 }
0x18cc   :  { %v1507_v8 = vadd.f32 %v4637_v27, %v4629_v42 }
0x18cf   :  { %v1357_v13 = vpop.f32.mrb[20].mxu1 }
0x18d0   :  { %v1359_v30 = vpop.f32.mrb[21].mxu1 }
0x18d1   :  { %v1361_v12 = vpop.f32.mrb[22].mxu1 }
0x18d2   :  { %v1363_v18 = vpop.f32.mrb[23].mxu1 }
0x18d7   :  { %v1367_v20 = vpop.f32.mrb[24].mxu1 }
0x18d8   :  { %v1369_v19 = vpop.f32.mrb[25].mxu1 }
0x18d9   :  { %v1371_v23 = vpop.f32.mrb[26].mxu1 }
0x18da   :  { %v4633_v25 = vpop.f32.mrb[27].mxu1 }
0x18df   :  { %v1588_v31 = vpop.f32.mrb[28].mxu1 }
0x18e0   :  { %v1594_v6 = vadd.f32 %v1588_v31, %v1505_v9  ;;  %v3503_v32 = vpop.f32.mrb[29].mxu1 }
0x18e1   :  { %v1591_v33 = vpop.f32.mrb[30].mxu1 }
0x18e2   :  { %3935 = vtanh.f32 %v1594_v6  ;;  %v3504_v16 = vpop.f32.mrb[31].mxu1  ;;  %v3292_v26 = vmul.f32 -1.442695, %v1594_v6 }
0x18e4   :  { %3937 = vpow2.f32 %v3292_v26 }
0x18ec   :  { %v3936_v0 = vpop.eup %3935  ;;  %v1387_v38 = vpop.permute.xlu1 %1386 }
0x18ed   :  { %1604 = vrot.lane.b32.xlu0 %v3936_v0, %s4109_s4 }
0x18ee   :  { %v3938_v24 = vpop.eup %3937 }
0x18ef   :  { %v1598_v43 = vadd.f32 1.0, %v3938_v24 }
0x18f1   :  { %3939 = vrcp.f32 %v1598_v43 }
0x18fb   :  { %v3940_v40 = vpop.eup %3939 }
0x18fc   :  { %v1602_v28 = vmul.f32 0.0, %v3940_v40 }
0x194d   :  { %v1464_v34 = vpop.f32.mrb[48].mxu0 }
0x194e   :  { %v4641_v35 = vadd.f32 %v1464_v34, %v1347_v57  ;;  %v1466_v7 = vpop.f32.mrb[49].mxu0 }
0x194f   :  { %v1468_v36 = vpop.f32.mrb[50].mxu0 }
0x1950   :  { %v4643_v37 = vadd.f32 %v1468_v36, %v1351_v15  ;;  %v1470_v39 = vpop.f32.mrb[51].mxu0  ;;  %v1509_v24 = vadd.f32 %v4637_v27, %v4641_v35 }
0x195f   :  { %v1605_v45 = vpop.permute.xlu0 %1604 }
0x1960   :  { %v1607_v41 = vmul.f32 %v3940_v40, %v1605_v45 }
0x1962   :  { %1609 = vrot.lane.b32.xlu0 %v1607_v41, %s4110_s19 }
0x19d4   :  { %v1610_v62 = vpop.permute.xlu0 %1609 }
0x19d5   :  { %v1612_v52 = vadd.f32 %v1610_v62, %v1602_v28 }
0x19d7   :  { %3941 = vtanh.f32 %v1612_v52 }
0x19e1   :  { %v3942_v5 = vpop.eup %3941 }
0x19e2   :  { %1615 = vrot.lane.b32.xlu0 %v3942_v5, %s4109_s4 }
0x19e6   :  { %1384 = vrot.lane.b32.xlu0 %v1245_v46, %s4110_s19 }
0x1a54   :  { %v1616_v47 = vpop.permute.xlu0 %1615 }
0x1a55   :  { %v1618_v44 = vmul.f32 %v3940_v40, %v1616_v47 }
0x1a57   :  { %v1620_v11 = vpack.c.bf16 %v1618_v44, %v1618_v44 }
0x1a58   :  { %v1385_v50 = vpop.permute.xlu0 %1384 }
0x1a59   :  { %1622 = vrot.lane.b32.xlu0 %v1620_v11, %s4110_s19  ;;  %3288 = vmatmul.mubr.msk.bf16.gmra.mrb[52].mxu0 %vm321_vm10, %v1385_v50 }
0x1a5a   :  { %1482 = vmatprep.mubr.bf16.mxu0 %v4107_v1 }
0x1a61   :  { %3289 = vmatmul.mubr.msk.bf16.gmra.mrb[56].mxu0 %vm321_vm10, %v1387_v38 }
0x1a62   :  { %3509 = vmatprep.mubr.msk.bf16.mxu0 %vm4111_vm11, %v4108_v22 }
0x1acb   :  { %v1623_v49 = vpop.permute.xlu0 %1622 }
0x1acc   :  { %3510 = vmatmul.mubr.msk.bf16.vlgmr.msra.gmra.mrb[60].mxu0 %vm321_vm10, %v1623_v49 }
0x1acd   :  { %3522 = vmatpush3.bf16.msra.mxu0 %v4587_v21  ;;  %3525 = vmatprep.mubr.msk.bf16.mxu0 %vm4111_vm11, %v4108_v22 }
0x1ace   :  { %3523 = vmatprep.subr.bf16.mxu0 %v4108_v22 }
0x1ad1   :  { %3524 = vmatpush3.bf16.msra.mxu0 %v4595_v14 }
0x1ad2   :  { %3537 = vmatprep.subr.bf16.mxu0 %v4108_v22 }
0x1b2c   :  { %v1474_v29 = vpop.f32.mrb[52].mxu0 }
0x1b2d   :  { %v4663_v4 = vadd.f32 %v1474_v29, %v1357_v13  ;;  %v1476_v51 = vpop.f32.mrb[53].mxu0 }
0x1b2e   :  { %v1478_v53 = vpop.f32.mrb[54].mxu0  ;;  %v1511_v51 = vadd.f32 %v4637_v27, %v4643_v37 }
0x1b2f   :  { %v4665_v54 = vadd.f32 %v1478_v53, %v1361_v12  ;;  %v1480_v55 = vpop.f32.mrb[55].mxu0 }
0x1b34   :  { %v1484_v56 = vpop.f32.mrb[56].mxu0 }
0x1b35   :  { %v4667_v57 = vadd.f32 %v1484_v56, %v1367_v20  ;;  %v1486_v17 = vpop.f32.mrb[57].mxu0 }
0x1b36   :  { %v1488_v60 = vpop.f32.mrb[58].mxu0 }
0x1b37   :  { %v4669_v63 = vadd.f32 %v1488_v60, %v1371_v23  ;;  %v1490_v2 = vpop.f32.mrb[59].mxu0 }
0x1b38   :  { %v4672_v15 = vadd.f32 %v1490_v2, %v4633_v25 }
0x1b9f   :  { %v1661_v48 = vpop.f32.mrb[60].mxu0 }
0x1ba0   :  { %v1667_v10 = vadd.f32 %v1661_v48, %v1507_v8  ;;  %v3511_v13 = vpop.f32.mrb[61].mxu0 }
0x1ba1   :  { %v1664_v30 = vpop.f32.mrb[62].mxu0 }
0x1ba2   :  { %3943 = vtanh.f32 %v1667_v10  ;;  %v3512_v12 = vpop.f32.mrb[63].mxu0  ;;  %v3294_v20 = vmul.f32 -1.442695, %v1667_v10 }
0x1ba4   :  { %3945 = vpow2.f32 %v3294_v20 }
0x1bac   :  { %v3944_v18 = vpop.eup %3943 }
0x1bad   :  { %1677 = vrot.lane.b32.xlu1 %v3944_v18, %s4109_s4 }
0x1bae   :  { %v3946_v19 = vpop.eup %3945 }
0x1baf   :  { %v1671_v23 = vadd.f32 1.0, %v3946_v19 }
0x1bb1   :  { %3947 = vrcp.f32 %v1671_v23 }
0x1bbb   :  { %v3948_v9 = vpop.eup %3947 }
0x1bbc   :  { %v1675_v42 = vmul.f32 %v3948_v9, %v1612_v52 }
0x1c1f   :  { %v1678_v25 = vpop.permute.xlu1 %1677 }
0x1c20   :  { %v1680_v31 = vmul.f32 %v3948_v9, %v1678_v25 }
0x1c22   :  { %1682 = vrot.lane.b32.xlu0 %v1680_v31, %s4110_s19 }
0x1c94   :  { %v1683_v6 = vpop.permute.xlu0 %1682 }
0x1c95   :  { %v1685_v32 = vadd.f32 %v1683_v6, %v1675_v42  ;;  %v1513_v42 = vadd.f32 %v4637_v27, %v4663_v4 }
0x1c97   :  { %3949 = vtanh.f32 %v1685_v32 }
0x1ca1   :  { %v3950_v33 = vpop.eup %3949 }
0x1ca2   :  { %1688 = vrot.lane.b32.xlu1 %v3950_v33, %s4109_s4 }
0x1d14   :  { %v1689_v16 = vpop.permute.xlu1 %1688 }
0x1d15   :  { %v1691_v0 = vmul.f32 %v3948_v9, %v1689_v16 }
0x1d17   :  { %v1693_v26 = vpack.c.bf16 %v1691_v0, %v1691_v0 }
0x1d19   :  { %1695 = vrot.lane.b32.xlu0 %v1693_v26, %s4110_s19 }
0x1d8b   :  { %v1696_v34 = vpop.permute.xlu0 %1695 }
0x1d8c   :  { %3518 = vmatmul.mubr.msk.bf16.vlgmr.msra.gmra.mrb[32].mxu1 %vm321_vm10, %v1696_v34 }
0x1d8d   :  { %3530 = vmatpush3.bf16.msra.mxu1 %v4587_v21  ;;  %3533 = vmatprep.mubr.msk.bf16.mxu1 %vm4111_vm11, %v4108_v22 }
0x1d8e   :  { %3531 = vmatprep.subr.bf16.mxu1 %v4108_v22 }
0x1d91   :  { %3532 = vmatpush3.bf16.msra.mxu1 %v4595_v14 }
0x1d92   :  { %3545 = vmatprep.subr.bf16.mxu1 %v4108_v22 }
0x1e5f   :  { %v1734_v7 = vpop.f32.mrb[32].mxu1 }
0x1e60   :  { %v1740_v36 = vadd.f32 %v1734_v7, %v1509_v24  ;;  %v3519_v39 = vpop.f32.mrb[33].mxu1 }
0x1e61   :  { %v1737_v43 = vpop.f32.mrb[34].mxu1 }
0x1e62   :  { %3951 = vtanh.f32 %v1740_v36  ;;  %v3520_v40 = vpop.f32.mrb[35].mxu1  ;;  %v3296_v41 = vmul.f32 -1.442695, %v1740_v36 }
0x1e64   :  { %3953 = vpow2.f32 %v3296_v41 }
0x1e6c   :  { %v3952_v45 = vpop.eup %3951 }
0x1e6d   :  { %1750 = vrot.lane.b32.xlu1 %v3952_v45, %s4109_s4 }
0x1e6e   :  { %v3954_v28 = vpop.eup %3953 }
0x1e6f   :  { %v1744_v62 = vadd.f32 1.0, %v3954_v28 }
0x1e71   :  { %3955 = vrcp.f32 %v1744_v62 }
0x1e7b   :  { %v3956_v52 = vpop.eup %3955 }
0x1e7c   :  { %v1748_v35 = vmul.f32 %v3956_v52, %v1685_v32 }
0x1edf   :  { %v1751_v5 = vpop.permute.xlu1 %1750 }
0x1ee0   :  { %v1753_v46 = vmul.f32 %v3956_v52, %v1751_v5 }
0x1ee2   :  { %1755 = vrot.lane.b32.xlu0 %v1753_v46, %s4110_s19  ;;  %v1515_v46 = vadd.f32 %v4637_v27, %v4665_v54 }
0x1f54   :  { %v1756_v47 = vpop.permute.xlu0 %1755 }
0x1f55   :  { %v1758_v44 = vadd.f32 %v1756_v47, %v1748_v35 }
0x1f57   :  { %3957 = vtanh.f32 %v1758_v44 }
0x1f61   :  { %v3958_v11 = vpop.eup %3957 }
0x1f62   :  { %1761 = vrot.lane.b32.xlu1 %v3958_v11, %s4109_s4 }
0x1fd4   :  { %v1762_v50 = vpop.permute.xlu1 %1761 }
0x1fd5   :  { %v1764_v38 = vmul.f32 %v3956_v52, %v1762_v50 }
0x1fd7   :  { %v1766_v49 = vpack.c.bf16 %v1764_v38, %v1764_v38 }
0x1fd9   :  { %1768 = vrot.lane.b32.xlu0 %v1766_v49, %s4110_s19 }
0x204b   :  { %v1769_v29 = vpop.permute.xlu0 %1768 }
0x204c   :  { %3526 = vmatmul.mubr.msk.bf16.vlgmr.msra.gmra.mrb[64].mxu0 %vm321_vm10, %v1769_v29 }
0x204d   :  { %3538 = vmatpush3.bf16.msra.mxu0 %v4587_v21  ;;  %3541 = vmatprep.mubr.msk.bf16.mxu0 %vm4111_vm11, %v4108_v22 }
0x204e   :  { %3539 = vmatprep.subr.bf16.mxu0 %v4108_v22 }
0x2051   :  { %3540 = vmatpush3.bf16.msra.mxu0 %v4595_v14 }
0x2052   :  { %3553 = vmatprep.subr.bf16.mxu0 %v4108_v22 }
0x211f   :  { %v1807_v53 = vpop.f32.mrb[64].mxu0 }
0x2120   :  { %v1813_v55 = vadd.f32 %v1807_v53, %v1511_v51  ;;  %v3527_v56 = vpop.f32.mrb[65].mxu0 }
0x2121   :  { %v1810_v17 = vpop.f32.mrb[66].mxu0 }
0x2122   :  { %3959 = vtanh.f32 %v1813_v55  ;;  %v3528_v60 = vpop.f32.mrb[67].mxu0  ;;  %v3298_v8 = vmul.f32 -1.442695, %v1813_v55 }
0x2124   :  { %3961 = vpow2.f32 %v3298_v8 }
0x212c   :  { %v3960_v2 = vpop.eup %3959 }
0x212d   :  { %1823 = vrot.lane.b32.xlu1 %v3960_v2, %s4109_s4 }
0x212e   :  { %v3962_v48 = vpop.eup %3961 }
0x212f   :  { %v1817_v10 = vadd.f32 1.0, %v3962_v48 }
0x2131   :  { %3963 = vrcp.f32 %v1817_v10  ;;  %v1517_v10 = vadd.f32 %v4637_v27, %v4667_v57  ;;  %v1502_v57 = vrot.slane %v4631_v3, %v4361_v59 }
0x213b   :  { %v3964_v13 = vpop.eup %3963 }
0x213c   :  { %v1821_v37 = vmul.f32 %v3964_v13, %v1758_v44 }
0x219f   :  { %v1824_v30 = vpop.permute.xlu1 %1823 }
0x21a0   :  { %v1826_v12 = vmul.f32 %v3964_v13, %v1824_v30 }
0x21a2   :  { %1828 = vrot.lane.b32.xlu0 %v1826_v12, %s4110_s19 }
0x2214   :  { %v1829_v18 = vpop.permute.xlu0 %1828 }
0x2215   :  { %v1831_v20 = vadd.f32 %v1829_v18, %v1821_v37 }
0x2217   :  { %3965 = vtanh.f32 %v1831_v20 }
0x2221   :  { %v3966_v19 = vpop.eup %3965 }
0x2222   :  { %1834 = vrot.lane.b32.xlu1 %v3966_v19, %s4109_s4 }
0x2294   :  { %v1835_v23 = vpop.permute.xlu1 %1834 }
0x2295   :  { %v1837_v9 = vmul.f32 %v3964_v13, %v1835_v23 }
0x2297   :  { %v1839_v25 = vpack.c.bf16 %v1837_v9, %v1837_v9 }
0x2299   :  { %1841 = vrot.lane.b32.xlu0 %v1839_v25, %s4110_s19 }
0x230b   :  { %v1842_v31 = vpop.permute.xlu0 %1841 }
0x230c   :  { %3534 = vmatmul.mubr.msk.bf16.vlgmr.msra.gmra.mrb[36].mxu1 %vm321_vm10, %v1842_v31 }
0x230d   :  { %3546 = vmatpush3.bf16.msra.mxu1 %v4587_v21  ;;  %3549 = vmatprep.mubr.msk.bf16.mxu1 %vm4111_vm11, %v4108_v22 }
0x230e   :  { %3547 = vmatprep.subr.bf16.mxu1 %v4108_v22 }
0x2311   :  { %3548 = vmatpush3.bf16.msra.mxu1 %v4595_v14 }
0x23df   :  { %v1880_v6 = vpop.f32.mrb[36].mxu1 }
0x23e0   :  { %v1886_v32 = vadd.f32 %v1880_v6, %v1513_v42  ;;  %v3535_v33 = vpop.f32.mrb[37].mxu1 }
0x23e1   :  { %v1883_v16 = vpop.f32.mrb[38].mxu1 }
0x23e2   :  { %3967 = vtanh.f32 %v1886_v32  ;;  %v3536_v0 = vpop.f32.mrb[39].mxu1  ;;  %v3300_v34 = vmul.f32 -1.442695, %v1886_v32  ;;  %v1520_v16 = vadd.f32 %v1502_v57, %v4672_v15 }
0x23e4   :  { %3969 = vpow2.f32 %v3300_v34  ;;  %v3307_v34 = vmul.f32 -1.442695, %v1520_v16 }
0x23ec   :  { %v3968_v26 = vpop.eup %3967 }
0x23ed   :  { %1896 = vrot.lane.b32.xlu1 %v3968_v26, %s4109_s4 }
0x23ee   :  { %v3970_v24 = vpop.eup %3969 }
0x23ef   :  { %v1890_v7 = vadd.f32 1.0, %v3970_v24 }
0x23f1   :  { %3971 = vrcp.f32 %v1890_v7 }
0x23fb   :  { %v3972_v36 = vpop.eup %3971 }
0x23fc   :  { %v1894_v4 = vmul.f32 %v3972_v36, %v1831_v20 }
0x245f   :  { %v1897_v39 = vpop.permute.xlu1 %1896 }
0x2460   :  { %v1899_v43 = vmul.f32 %v3972_v36, %v1897_v39 }
0x2462   :  { %1901 = vrot.lane.b32.xlu0 %v1899_v43, %s4110_s19 }
0x24d4   :  { %v1902_v40 = vpop.permute.xlu0 %1901 }
0x24d5   :  { %v1904_v45 = vadd.f32 %v1902_v40, %v1894_v4 }
0x24d7   :  { %3973 = vtanh.f32 %v1904_v45 }
0x24e1   :  { %v3974_v41 = vpop.eup %3973 }
0x24e2   :  { %1907 = vrot.lane.b32.xlu1 %v3974_v41, %s4109_s4 }
0x2554   :  { %v1908_v28 = vpop.permute.xlu1 %1907 }
0x2555   :  { %v1910_v62 = vmul.f32 %v3972_v36, %v1908_v28 }
0x2557   :  { %v1912_v52 = vpack.c.bf16 %v1910_v62, %v1910_v62 }
0x2559   :  { %1914 = vrot.lane.b32.xlu0 %v1912_v52, %s4110_s19  ;;  %v3671_v52 = vld [vmem:[%s4950_s8 + $0x40] ss:$16 sps:$4 sm:$0xff]  }
0x25cb   :  { %v1915_v5 = vpop.permute.xlu0 %1914 }
0x25cc   :  { %3542 = vmatmul.mubr.msk.bf16.vlgmr.msra.gmra.mrb[68].mxu0 %vm321_vm10, %v1915_v5  ;;  %v3673_v5 = vld [vmem:[%s4950_s8 + $0x44] ss:$16 sps:$4 sm:$0xff]  }
0x25cd   :  { %3554 = vmatpush3.bf16.msra.mxu0 %v4587_v21  ;;  %3557 = vmatprep.mubr.msk.bf16.mxu0 %vm4111_vm11, %v4108_v22 }
0x25ce   :  { %3555 = vmatprep.subr.bf16.mxu0 %v4108_v22  ;;  %2219 = vmatprep.subr.bf16.mxu1 %v3673_v5  ;;  %v3715_v5 = vld [vmem:[#allocation9 + $0x64] ss:$8 sps:$4 sm:$0xff]  }
0x25d1   :  { %3556 = vmatpush3.bf16.msra.mxu0 %v4595_v14 }
0x269f   :  { %v1953_v35 = vpop.f32.mrb[68].mxu0 }
0x26a0   :  { %v1959_v47 = vadd.f32 %v1953_v35, %v1515_v46  ;;  %v3543_v44 = vpop.f32.mrb[69].mxu0  ;;  %v3674_v46 = vld [vmem:[%s4950_s8 + $0x48] ss:$16 sps:$4 sm:$0xff]   ;;  %v3676_v35 = vld [vmem:[%s4950_s8 + $0x4c] ss:$16 sps:$4 sm:$0xff]  }
0x26a1   :  { %v1956_v11 = vpop.f32.mrb[70].mxu0  ;;  %v3682_v44 = vld [vmem:[%s4950_s8 + $0x6c] ss:$16 sps:$4 sm:$0xff]   ;;  %2260 = vmatprep.subr.bf16.mxu0 %v3676_v35 }
0x26a2   :  { %3975 = vtanh.f32 %v1959_v47  ;;  %v3544_v50 = vpop.f32.mrb[71].mxu0  ;;  %v3302_v21 = vmul.f32 -1.442695, %v1959_v47  ;;  %v3679_v47 = vld [vmem:[%s4950_s8 + $0x64] ss:$16 sps:$4 sm:$0xff]  }
0x26a3   :  { %v3677_v11 = vld [vmem:[%s4950_s8 + $0x60] ss:$16 sps:$4 sm:$0xff]   ;;  %v3680_v50 = vld [vmem:[%s4950_s8 + $0x68] ss:$16 sps:$4 sm:$0xff]  }
0x26a4   :  { %3977 = vpow2.f32 %v3302_v21  ;;  %v3718_v35 = vld [vmem:[#allocation9 + $0x74] ss:$8 sps:$4 sm:$0xff]  }
0x26ac   :  { %v3976_v38 = vpop.eup %3975 }
0x26ad   :  { %1969 = vrot.lane.b32.xlu1 %v3976_v38, %s4109_s4 }
0x26ae   :  { %v3978_v49 = vpop.eup %3977 }
0x26af   :  { %v1963_v29 = vadd.f32 1.0, %v3978_v49 }
0x26b1   :  { %3979 = vrcp.f32 %v1963_v29  ;;  %v1519_v29 = vadd.f32 %v4637_v27, %v4669_v63 }
0x26bb   :  { %v3980_v51 = vpop.eup %3979 }
0x26bc   :  { %v1967_v54 = vmul.f32 %v3980_v51, %v1904_v45 }
0x271f   :  { %v1970_v53 = vpop.permute.xlu1 %1969 }
0x2720   :  { %v1972_v14 = vmul.f32 %v3980_v51, %v1970_v53 }
0x2722   :  { %1974 = vrot.lane.b32.xlu0 %v1972_v14, %s4110_s19 }
0x2794   :  { %v1975_v55 = vpop.permute.xlu0 %1974 }
0x2795   :  { %v1977_v56 = vadd.f32 %v1975_v55, %v1967_v54 }
0x2797   :  { %3981 = vtanh.f32 %v1977_v56 }
0x27a1   :  { %v3982_v17 = vpop.eup %3981 }
0x27a2   :  { %1980 = vrot.lane.b32.xlu1 %v3982_v17, %s4109_s4 }
0x2814   :  { %v1981_v60 = vpop.permute.xlu1 %1980 }
0x2815   :  { %v1983_v2 = vmul.f32 %v3980_v51, %v1981_v60 }
0x2817   :  { %v1985_v8 = vpack.c.bf16 %v1983_v2, %v1983_v2 }
0x2819   :  { %1987 = vrot.lane.b32.xlu0 %v1985_v8, %s4110_s19 }
0x288b   :  { %v1988_v48 = vpop.permute.xlu0 %1987 }
0x288c   :  { %3550 = vmatmul.mubr.msk.bf16.vlgmr.msra.gmra.mrb[40].mxu1 %vm321_vm10, %v1988_v48 }
0x288d   :  { %2251 = vmatprep.mubr.bf16.mxu1 %v4107_v1  ;;  %2220 = vmatpush1.bf16.msra.mxu1 %v3671_v52  ;;  %v3710_v52 = vld [vmem:[#allocation9 + $0x50] ss:$8 sps:$4 sm:$0xff]  }
0x288e   :  { %2221 = vmatprep.subr.bf16.mxu1 %v3679_v47  ;;  %v3716_v47 = vld [vmem:[#allocation9 + $0x70] ss:$8 sps:$4 sm:$0xff]  }
0x2891   :  { %2222 = vmatpush1.bf16.msra.mxu1 %v3677_v11  ;;  %v3719_v11 = vld [vmem:[#allocation9 + $0x80] ss:$8 sps:$4 sm:$0xff]  }
0x295f   :  { %v2026_v13 = vpop.f32.mrb[40].mxu1 }
0x2960   :  { %v2032_v30 = vadd.f32 %v2026_v13, %v1517_v10  ;;  %v3551_v12 = vpop.f32.mrb[41].mxu1 }
0x2961   :  { %v2029_v37 = vpop.f32.mrb[42].mxu1 }
0x2962   :  { %3983 = vtanh.f32 %v2032_v30  ;;  %v3552_v18 = vpop.f32.mrb[43].mxu1  ;;  %v3304_v19 = vmul.f32 -1.442695, %v2032_v30 }
0x2964   :  { %3985 = vpow2.f32 %v3304_v19  ;;  %v3685_v19 = vld [vmem:[%s4950_s8 + $0x4] ss:$16 sps:$4 sm:$0xff]  }
0x2965   :  { %2347 = vmatprep.subr.bf16.mxu1 %v3685_v19  ;;  %v3798_v19 = vld [vmem:[%s4954_s12 + $0x18] sm:$0xff]  }
0x296c   :  { %v3984_v20 = vpop.eup %3983 }
0x296d   :  { %2042 = vrot.lane.b32.xlu1 %v3984_v20, %s4109_s4  ;;  %v3683_v20 = vld [vmem:[%s4950_s8] ss:$16 sps:$4 sm:$0xff]  }
0x296e   :  { %v3986_v23 = vpop.eup %3985 }
0x296f   :  { %v2036_v9 = vadd.f32 1.0, %v3986_v23 }
0x2971   :  { %3987 = vrcp.f32 %v2036_v9 }
0x297b   :  { %v3988_v25 = vpop.eup %3987 }
0x297c   :  { %v2040_v6 = vmul.f32 %v3988_v25, %v1977_v56 }
0x29df   :  { %v2043_v31 = vpop.permute.xlu1 %2042 }
0x29e0   :  { %v2045_v42 = vmul.f32 %v3988_v25, %v2043_v31  ;;  %v3688_v31 = vld [vmem:[%s4950_s8 + $0xc] ss:$16 sps:$4 sm:$0xff]  }
0x29e2   :  { %2047 = vrot.lane.b32.xlu0 %v2045_v42, %s4110_s19 }
0x2a54   :  { %v2048_v32 = vpop.permute.xlu0 %2047 }
0x2a55   :  { %v4738_v33 = vadd.f32 %v2048_v32, %v2040_v6  ;;  %v3691_v6 = vld [vmem:[%s4950_s8 + $0x24] ss:$16 sps:$4 sm:$0xff]   ;;  %v3689_v32 = vld [vmem:[%s4950_s8 + $0x20] ss:$16 sps:$4 sm:$0xff]  }
0x2a57   :  { %3989 = vtanh.f32 %v4738_v33 }
0x2a58   :  { %3991 = vtanh.f32 %v1520_v16  ;;  %v3692_v16 = vld [vmem:[%s4950_s8 + $0x28] ss:$16 sps:$4 sm:$0xff]  }
0x2a59   :  { %3993 = vpow2.f32 %v3307_v34 }
0x2a61   :  { %v3990_v0 = vpop.eup %3989 }
0x2a62   :  { %2053 = vrot.lane.b32.xlu1 %v3990_v0, %s4109_s4  ;;  %v3992_v26 = vpop.eup %3991 }
0x2a63   :  { %v3994_v24 = vpop.eup %3993 }
0x2a64   :  { %v2134_v7 = vadd.f32 1.0, %v3994_v24 }
0x2a66   :  { %2140 = vrot.lane.b32.xlu1 %v3992_v26, %s4109_s4  ;;  %3995 = vrcp.f32 %v2134_v7  ;;  %v3697_v26 = vld [vmem:[#allocation9 + $0x4] ss:$8 sps:$4 sm:$0xff]  }
0x2a70   :  { %v3996_v43 = vpop.eup %3995 }
0x2a71   :  { %v2138_v45 = vmul.f32 0.0, %v3996_v43 }
0x2ad4   :  { %v2054_v3 = vpop.permute.xlu1 %2053 }
0x2ad5   :  { %v2056_v36 = vmul.f32 %v3988_v25, %v2054_v3  ;;  %v3686_v25 = vld [vmem:[%s4950_s8 + $0x8] ss:$16 sps:$4 sm:$0xff]  }
0x2ad6   :  { %v3695_v3 = vld [vmem:[#allocation9] ss:$8 sps:$4 sm:$0xff]  }
0x2ad7   :  { %v2058_v39 = vpack.c.bf16 %v2056_v36, %v2056_v36  ;;  %v3700_v36 = vld [vmem:[#allocation9 + $0x14] ss:$8 sps:$4 sm:$0xff]  }
0x2ad8   :  { %v2141_v4 = vpop.permute.xlu1 %2140 }
0x2ad9   :  { %v2143_v15 = vmul.f32 %v3996_v43, %v2141_v4  ;;  %2060 = vrot.lane.b32.xlu0 %v2058_v39, %s4110_s19  ;;  %v3703_v4 = vld [vmem:[#allocation9 + $0x24] ss:$8 sps:$4 sm:$0xff]  }
0x2adb   :  { %2145 = vrot.lane.b32.xlu1 %v2143_v15, %s4110_s19  ;;  %v3701_v15 = vld [vmem:[#allocation9 + $0x20] ss:$8 sps:$4 sm:$0xff]  }
0x2b4b   :  { %v2061_v40 = vpop.permute.xlu0 %2060 }
0x2b4c   :  { %3558 = vmatmul.mubr.msk.bf16.vlgmr.msra.gmra.mrb[72].mxu0 %vm321_vm10, %v2061_v40  ;;  %v3706_v40 = vld [vmem:[#allocation9 + $0x34] ss:$8 sps:$4 sm:$0xff]  }
0x2b4d   :  { %v2146_v41 = vpop.permute.xlu1 %2145  ;;  %2292 = vmatprep.mubr.bf16.mxu0 %v4107_v1  ;;  %2261 = vmatpush1.bf16.msra.mxu0 %v3674_v46  ;;  %v3713_v46 = vld [vmem:[#allocation9 + $0x60] ss:$8 sps:$4 sm:$0xff]  }
0x2b4e   :  { %v2148_v28 = vadd.f32 %v2146_v41, %v2138_v45  ;;  %2262 = vmatprep.subr.bf16.mxu0 %v3682_v44  ;;  %v3704_v45 = vld [vmem:[#allocation9 + $0x30] ss:$8 sps:$4 sm:$0xff]   ;;  %v3709_v41 = vld [vmem:[#allocation9 + $0x44] ss:$8 sps:$4 sm:$0xff]  }
0x2b4f   :  { %v3721_v44 = vld [vmem:[#allocation9 + $0x84] ss:$8 sps:$4 sm:$0xff]  }
0x2b50   :  { %3997 = vtanh.f32 %v2148_v28  ;;  %v3707_v28 = vld [vmem:[#allocation9 + $0x40] ss:$8 sps:$4 sm:$0xff]  }
0x2b51   :  { %2263 = vmatpush1.bf16.msra.mxu0 %v3680_v50  ;;  %v3724_v50 = vld [vmem:[#allocation9 + $0x94] ss:$8 sps:$4 sm:$0xff]  }
0x2b52   :  { %2388 = vmatprep.subr.bf16.mxu0 %v3688_v31  ;;  %v3802_v31 = vld [vmem:[%s4954_s12 + $0x28] sm:$0xff]  }
0x2b5a   :  { %v3998_v62 = vpop.eup %3997 }
0x2b5b   :  { %2151 = vrot.lane.b32.xlu1 %v3998_v62, %s4109_s4  ;;  %v3712_v62 = vld [vmem:[#allocation9 + $0x54] ss:$8 sps:$4 sm:$0xff]  }
0x2bcd   :  { %v2152_v38 = vpop.permute.xlu1 %2151 }
0x2bce   :  { %v2154_v21 = vmul.f32 %v3996_v43, %v2152_v38  ;;  %v3698_v43 = vld [vmem:[#allocation9 + $0x10] ss:$8 sps:$4 sm:$0xff]  }
0x2bcf   :  { %v3722_v38 = vld [vmem:[#allocation9 + $0x90] ss:$8 sps:$4 sm:$0xff]  }
0x2bd0   :  { %v2172_v49 = vpack.c.bf16 %v2154_v21, %v2154_v21  ;;  %v3727_v21 = vld [vmem:[#allocation9 + $0xa4] ss:$8 sps:$4 sm:$0xff]  }
0x2bd2   :  { %2174 = vrot.lane.b32.xlu1 %v2172_v49, %s4110_s19  ;;  %v3725_v49 = vld [vmem:[#allocation9 + $0xa0] ss:$8 sps:$4 sm:$0xff]  }
0x2c1f   :  { %v2099_v51 = vpop.f32.mrb[72].mxu0 }
0x2c20   :  { %v2105_v53 = vadd.f32 %v2099_v51, %v1519_v29  ;;  %v3559_v14 = vpop.f32.mrb[73].mxu0  ;;  %v3730_v29 = vld [vmem:[#allocation9 + $0xb4] ss:$8 sps:$4 sm:$0xff]   ;;  %v3728_v51 = vld [vmem:[#allocation9 + $0xb0] ss:$8 sps:$4 sm:$0xff]  }
0x2c21   :  { %v2102_v54 = vpop.f32.mrb[74].mxu0  ;;  %v3731_v14 = vld [vmem:[#allocation9 + $0xc0] ss:$8 sps:$4 sm:$0xff]  }
0x2c22   :  { %3999 = vtanh.f32 %v2105_v53  ;;  %v3560_v55 = vpop.f32.mrb[75].mxu0  ;;  %v3306_v60 = vmul.f32 -1.442695, %v2105_v53  ;;  %v3733_v53 = vld [vmem:[#allocation9 + $0xc4] ss:$8 sps:$4 sm:$0xff]  }
0x2c23   :  { %v3736_v54 = vld [vmem:[#allocation9 + $0xd4] ss:$8 sps:$4 sm:$0xff]   ;;  %v3734_v55 = vld [vmem:[#allocation9 + $0xd0] ss:$8 sps:$4 sm:$0xff]  }
0x2c24   :  { %4001 = vpow2.f32 %v3306_v60  ;;  %v3742_v60 = vld [vmem:[#allocation9 + $0xf4] ss:$8 sps:$4 sm:$0xff]  }
0x2c2c   :  { %v4000_v56 = vpop.eup %3999 }
0x2c2d   :  { %2115 = vrot.lane.b32.xlu0 %v4000_v56, %s4109_s4  ;;  %v3739_v56 = vld [vmem:[#allocation9 + $0xe4] ss:$8 sps:$4 sm:$0xff]  }
0x2c2e   :  { %v4002_v27 = vpop.eup %4001 }
0x2c2f   :  { %v2109_v63 = vadd.f32 1.0, %v4002_v27  ;;  %v3740_v27 = vld [vmem:[#allocation9 + $0xf0] ss:$8 sps:$4 sm:$0xff]  }
0x2c31   :  { %4003 = vrcp.f32 %v2109_v63  ;;  %v3745_v63 = vld [vmem:[#allocation9 + $0x104] ss:$8 sps:$4 sm:$0xff]  }
0x2c3b   :  { %v4004_v2 = vpop.eup %4003 }
0x2c3c   :  { %v2113_v10 = vmul.f32 %v4004_v2, %v4738_v33  ;;  %v3694_v33 = vld [vmem:[%s4950_s8 + $0x2c] ss:$16 sps:$4 sm:$0xff]  }
0x2c44   :  { %v2175_v17 = vpop.permute.xlu1 %2174 }
0x2c45   :  { %3316 = vmatmul.mubr.msk.bf16.vlgmr.msra.gmra.mrb[44].mxu1 %vm321_vm10, %v2175_v17  ;;  %3317 = vmatmul.mubr.msk.bf16.vlgmr.msra.gmra.mrb[76].mxu0 %vm321_vm10, %v2175_v17  ;;  %v3737_v17 = vld [vmem:[#allocation9 + $0xe0] ss:$8 sps:$4 sm:$0xff]  }
0x2c46   :  { %2379 = vmatprep.mubr.bf16.mxu1 %v4107_v1  ;;  %2420 = vmatprep.mubr.bf16.mxu0 %v4107_v1 }
0x2c47   :  { %2348 = vmatpush1.bf16.msra.mxu1 %v3683_v20  ;;  %2389 = vmatpush1.bf16.msra.mxu0 %v3686_v25  ;;  %v3797_v20 = vld [vmem:[%s4954_s12 + $0x58] sm:$0xff]   ;;  %v3801_v25 = vld [vmem:[%s4954_s12 + $0x68] sm:$0xff]  }
0x2c48   :  { %2349 = vmatprep.subr.bf16.mxu1 %v3691_v6  ;;  %2390 = vmatprep.subr.bf16.mxu0 %v3694_v33  ;;  %v2445_v6 = vsub.s32 3, %v4358_v58 }
0x2c4b   :  { %2350 = vmatpush1.bf16.msra.mxu1 %v3689_v32  ;;  %2391 = vmatpush1.bf16.msra.mxu0 %v3692_v16 }
0x2c4c   :  { %2859 = vmatprep.subr.bf16.mxu1 %v3697_v26 }
0x2c9f   :  { %v2116_v8 = vpop.permute.xlu0 %2115 }
0x2ca0   :  { %v2118_v48 = vmul.f32 %v4004_v2, %v2116_v8  ;;  %v3792_v8 = vld [vmem:[%s4954_s12] sm:$0xff]  }
0x2ca2   :  { %2120 = vrot.lane.b32.xlu0 %v2118_v48, %s4110_s19  ;;  %v3793_v48 = vld [vmem:[%s4954_s12 + $0x48] sm:$0xff]  }
0x2d14   :  { %v2121_v13 = vpop.permute.xlu0 %2120 }
0x2d15   :  { %v2123_v30 = vadd.f32 %v2121_v13, %v2113_v10  ;;  %v3794_v10 = vld [vmem:[%s4954_s12 + $0x8] sm:$0xff]   ;;  %v3795_v13 = vld [vmem:[%s4954_s12 + $0x50] sm:$0xff]  }
0x2d17   :  { %4005 = vtanh.f32 %v2123_v30  ;;  %v3796_v30 = vld [vmem:[%s4954_s12 + $0x10] sm:$0xff]  }
0x2d18   :  { %v4783_v12 = vpop.f32.mrb[44].mxu1  ;;  %v4785_v37 = vpop.f32.mrb[76].mxu0 }
0x2d19   :  { %v4787_v1 = vpop.f32.mrb[45].mxu1  ;;  %v4789_v18 = vpop.f32.mrb[77].mxu0 }
0x2d1a   :  { %v2257_v23 = vpop.f32.mrb[46].mxu1  ;;  %v2298_v9 = vpop.f32.mrb[78].mxu0 }
0x2d1b   :  { %v2258_v42 = vpop.f32.mrb[47].mxu1  ;;  %v2299_v57 = vpop.f32.mrb[79].mxu0  ;;  %v3799_v23 = vld [vmem:[%s4954_s12 + $0x60] sm:$0xff]  }
0x2d1c   :  { %v3800_v9 = vld [vmem:[%s4954_s12 + $0x20] sm:$0xff]   ;;  %v2441_v42 = vsub.s32 2, %v4358_v58 }
0x2d1d   :  { %v2429_v57 = vld [vmem:[%s4951_s9] sm:$0xf] }
0x2d1e   :  { %v2434_v32 = vrot.slane %v2429_v57, %v4367_v61  ;;  %v2442_v33 = vrot.slane %v2429_v57, %v2441_v42  ;;  %v2438_v26 = vrot.slane %v2429_v57, %v4361_v59 }
0x2d21   :  { %v4006_v0 = vpop.eup %4005 }
0x2d22   :  { %2126 = vrot.lane.b32.xlu0 %v4006_v0, %s4109_s4 }
0x2d94   :  { %v2127_v34 = vpop.permute.xlu0 %2126 }
0x2d95   :  { %v2129_v24 = vmul.f32 %v4004_v2, %v2127_v34  ;;  %v3791_v2 = vld [vmem:[%s4954_s12 + $0x40] sm:$0xff]   ;;  %v2446_v34 = vrot.slane %v2429_v57, %v2445_v6  ;;  %v3803_v57 = vld [vmem:[%s4954_s12 + $0x70] sm:$0xff]  }
0x2d96   :  { %3442 = vmatprep.subr.bf16.mxu0 %v3791_v2  ;;  %v3773_v2 = vld [vmem:[#allocation9 + $0x1a0] ss:$8 sps:$4 sm:$0xff]   ;;  %v3804_v6 = vld [vmem:[%s4954_s12 + $0x30] sm:$0xff]  }
0x2d97   :  { %v2171_v7 = vpack.c.bf16 %v2129_v24, %v2129_v24 }
0x2d99   :  { %2302 = vrot.lane.b32.xlu0 %v2171_v7, %s4110_s19 }
0x2e0b   :  { %v2303_v39 = vpop.permute.xlu0 %2302 }
0x2e0c   :  { %3326 = vmatmul.mubr.msk.bf16.vlgmr.msra.gmra.mrb[48].mxu1 %vm321_vm10, %v2303_v39  ;;  %3327 = vmatmul.mubr.msk.bf16.vlgmr.msra.gmra.mrb[80].mxu0 %vm321_vm10, %v2303_v39 }
0x2e0d   :  { %2860 = vmatpush1.bf16.msra.mxu1 %v3695_v3  ;;  %3443 = vmatpush3.bf16.msra.mxu0 %v3792_v8  ;;  %v3778_v8 = vld [vmem:[#allocation9 + $0x1b4] ss:$8 sps:$4 sm:$0xff]  }
0x2e0e   :  { %2861 = vmatprep.subr.bf16.mxu1 %v3700_v36  ;;  %3444 = vmatprep.subr.bf16.mxu0 %v3793_v48  ;;  %v3776_v48 = vld [vmem:[#allocation9 + $0x1b0] ss:$8 sps:$4 sm:$0xff]  }
0x2e11   :  { %2862 = vmatpush1.bf16.msra.mxu1 %v3698_v43  ;;  %3445 = vmatpush3.bf16.msra.mxu0 %v3794_v10  ;;  %v3781_v10 = vld [vmem:[#allocation9 + $0x1c4] ss:$8 sps:$4 sm:$0xff]  }
0x2e12   :  { %2863 = vmatprep.subr.bf16.mxu1 %v3703_v4  ;;  %3446 = vmatprep.subr.bf16.mxu0 %v3795_v13  ;;  %v3779_v13 = vld [vmem:[#allocation9 + $0x1c0] ss:$8 sps:$4 sm:$0xff]  }
0x2e15   :  { %2864 = vmatpush1.bf16.msra.mxu1 %v3701_v15  ;;  %3447 = vmatpush3.bf16.msra.mxu0 %v3796_v30  ;;  %v3784_v30 = vld [vmem:[#allocation9 + $0x1d4] ss:$8 sps:$4 sm:$0xff]  }
0x2e16   :  { %2865 = vmatprep.subr.bf16.mxu1 %v3706_v40  ;;  %3448 = vmatprep.subr.bf16.mxu0 %v3797_v20  ;;  %v3782_v20 = vld [vmem:[#allocation9 + $0x1d0] ss:$8 sps:$4 sm:$0xff]  }
0x2e19   :  { %2866 = vmatpush1.bf16.msra.mxu1 %v3704_v45  ;;  %3449 = vmatpush3.bf16.msra.mxu0 %v3798_v19  ;;  %v3787_v19 = vld [vmem:[#allocation9 + $0x1e4] ss:$8 sps:$4 sm:$0xff]  }
0x2e1a   :  { %2867 = vmatprep.subr.bf16.mxu1 %v3709_v41  ;;  %3450 = vmatprep.subr.bf16.mxu0 %v3799_v23  ;;  %v3785_v23 = vld [vmem:[#allocation9 + $0x1e0] ss:$8 sps:$4 sm:$0xff]  }
0x2e1d   :  { %2868 = vmatpush1.bf16.msra.mxu1 %v3707_v28  ;;  %3451 = vmatpush3.bf16.msra.mxu0 %v3800_v9  ;;  %v3790_v9 = vld [vmem:[#allocation9 + $0x1f4] ss:$8 sps:$4 sm:$0xff]  }
0x2e1e   :  { %2869 = vmatprep.subr.bf16.mxu1 %v3712_v62  ;;  %3452 = vmatprep.subr.bf16.mxu0 %v3801_v25  ;;  %v3788_v25 = vld [vmem:[#allocation9 + $0x1f0] ss:$8 sps:$4 sm:$0xff]  }
0x2e21   :  { %2870 = vmatpush1.bf16.msra.mxu1 %v3710_v52  ;;  %3453 = vmatpush3.bf16.msra.mxu0 %v3802_v31 }
0x2e22   :  { %2871 = vmatprep.subr.bf16.mxu1 %v3715_v5  ;;  %3454 = vmatprep.subr.bf16.mxu0 %v3803_v57 }
0x2e25   :  { %2872 = vmatpush1.bf16.msra.mxu1 %v3713_v46  ;;  %3455 = vmatpush3.bf16.msra.mxu0 %v3804_v6 }
0x2e26   :  { %2873 = vmatprep.subr.bf16.mxu1 %v3718_v35 }
0x2e29   :  { %2874 = vmatpush1.bf16.msra.mxu1 %v3716_v47  ;;  %v3748_v47 = vld [vmem:[#allocation9 + $0x114] ss:$8 sps:$4 sm:$0xff]  }
0x2e2a   :  { %2875 = vmatprep.subr.bf16.mxu1 %v3721_v44 }
0x2e2d   :  { %2876 = vmatpush1.bf16.msra.mxu1 %v3719_v11  ;;  %v3749_v11 = vld [vmem:[#allocation9 + $0x120] ss:$8 sps:$4 sm:$0xff]  }
0x2e2e   :  { %2877 = vmatprep.subr.bf16.mxu1 %v3724_v50  ;;  %v3754_v50 = vld [vmem:[#allocation9 + $0x134] ss:$8 sps:$4 sm:$0xff]  }
0x2e31   :  { %2878 = vmatpush1.bf16.msra.mxu1 %v3722_v38  ;;  %v3752_v38 = vld [vmem:[#allocation9 + $0x130] ss:$8 sps:$4 sm:$0xff]  }
0x2e32   :  { %2879 = vmatprep.subr.bf16.mxu1 %v3727_v21  ;;  %v3757_v21 = vld [vmem:[#allocation9 + $0x144] ss:$8 sps:$4 sm:$0xff]  }
0x2e35   :  { %2880 = vmatpush1.bf16.msra.mxu1 %v3725_v49  ;;  %v3755_v49 = vld [vmem:[#allocation9 + $0x140] ss:$8 sps:$4 sm:$0xff]  }
0x2e36   :  { %2881 = vmatprep.subr.bf16.mxu1 %v3730_v29  ;;  %v3760_v29 = vld [vmem:[#allocation9 + $0x154] ss:$8 sps:$4 sm:$0xff]  }
0x2e39   :  { %2882 = vmatpush1.bf16.msra.mxu1 %v3728_v51  ;;  %v3758_v51 = vld [vmem:[#allocation9 + $0x150] ss:$8 sps:$4 sm:$0xff]  }
0x2e3a   :  { %2883 = vmatprep.subr.bf16.mxu1 %v3733_v53  ;;  %v3763_v53 = vld [vmem:[#allocation9 + $0x164] ss:$8 sps:$4 sm:$0xff]  }
0x2e3d   :  { %2884 = vmatpush1.bf16.msra.mxu1 %v3731_v14  ;;  %v3761_v14 = vld [vmem:[#allocation9 + $0x160] ss:$8 sps:$4 sm:$0xff]  }
0x2e3e   :  { %2885 = vmatprep.subr.bf16.mxu1 %v3736_v54  ;;  %v3766_v54 = vld [vmem:[#allocation9 + $0x174] ss:$8 sps:$4 sm:$0xff]  }
0x2e41   :  { %2886 = vmatpush1.bf16.msra.mxu1 %v3734_v55  ;;  %v3764_v55 = vld [vmem:[#allocation9 + $0x170] ss:$8 sps:$4 sm:$0xff]  }
0x2e42   :  { %2887 = vmatprep.subr.bf16.mxu1 %v3739_v56  ;;  %v3769_v56 = vld [vmem:[#allocation9 + $0x184] ss:$8 sps:$4 sm:$0xff]  }
0x2e45   :  { %2888 = vmatpush1.bf16.msra.mxu1 %v3737_v17  ;;  %v3767_v17 = vld [vmem:[#allocation9 + $0x180] ss:$8 sps:$4 sm:$0xff]  }
0x2e46   :  { %2889 = vmatprep.subr.bf16.mxu1 %v3742_v60  ;;  %v3772_v60 = vld [vmem:[#allocation9 + $0x194] ss:$8 sps:$4 sm:$0xff]  }
0x2e49   :  { %2890 = vmatpush1.bf16.msra.mxu1 %v3740_v27  ;;  %v3770_v27 = vld [vmem:[#allocation9 + $0x190] ss:$8 sps:$4 sm:$0xff]  }
0x2e4a   :  { %2900 = vmatprep.subr.bf16.mxu1 %v3745_v63  ;;  %v3775_v63 = vld [vmem:[#allocation9 + $0x1a4] ss:$8 sps:$4 sm:$0xff]  }
0x2edf   :  { %v2381_v16 = vpop.f32.mrb[48].mxu1  ;;  %v2422_v0 = vpop.f32.mrb[80].mxu0 }
0x2ee0   :  { %v2382_v24 = vadd.f32 %v2381_v16, %v4783_v12  ;;  %v2423_v7 = vadd.f32 %v2422_v0, %v4785_v37  ;;  %v2383_v3 = vpop.f32.mrb[49].mxu1  ;;  %v2424_v36 = vpop.f32.mrb[81].mxu0  ;;  %v3743_v37 = vld [vmem:[#allocation9 + $0x100] ss:$8 sps:$4 sm:$0xff]   ;;  %v4112_v16 = vmov 0.0|0.0  }
0x2ee1   :  { %v2384_v39 = vadd.f32 %v2383_v3, %v4787_v1  ;;  %v2425_v43 = vadd.f32 %v2424_v36, %v4789_v18  ;;  %v2385_v4 = vpop.f32.mrb[50].mxu1  ;;  %v2426_v58 = vpop.f32.mrb[82].mxu0  ;;  %v3746_v1 = vld [vmem:[#allocation9 + $0x110] ss:$8 sps:$4 sm:$0xff]   ;;  %v3751_v18 = vld [vmem:[#allocation9 + $0x124] ss:$8 sps:$4 sm:$0xff]  }
0x2ee2   :  { %v2451_v15 = vadd.f32 %v2434_v32, %v2382_v24  ;;  %v4866_v40 = vadd.f32 %v2442_v33, %v2423_v7  ;;  %v2386_v45 = vpop.f32.mrb[51].mxu1  ;;  %v2427_v41 = vpop.f32.mrb[83].mxu0  ;;  %v3805_v32 = vld [vmem:[%s4954_s12 + $0x78] sm:$0xff]   ;;  %v2527_v0 = vld [vmem:[%s4953_s11] sm:$0x3] }
0x2ee3   :  { %v2452_v28 = vadd.f32 %v2438_v26, %v2384_v39  ;;  %v2454_v62 = vadd.f32 %v2446_v34, %v2425_v43  ;;  %v3806_v33 = vld [vmem:[%s4954_s12 + $0x38] sm:$0xff]   ;;  %3456 = vmatprep.subr.bf16.mxu0 %v3805_v32  ;;  %v2532_v26 = vrot.slane %v2527_v0, %v4367_v61  ;;  %v2536_v34 = vrot.slane %v2527_v0, %v4361_v59  ;;  %v3121_v58 = vld [vmem:[%s4956_s14] sm:$0xff]  ;;  %v3123_v59 = vld [vmem:[%s4956_s14 + $0x10] sm:$0xff] }
0x2ee4   :  { %v2455_v52 = vmax.f32 %v2451_v15, 0.0  ;;  %v2457_v31 = vmax.f32 %v4866_v40, 0.0  ;;  %3457 = vmatpush3.bf16.msra.mxu0 %v3806_v33  ;;  %v3122_v15 = vld [vmem:[%s4956_s14 + $0x8] sm:$0xff] }
0x2ee5   :  { %v2456_v5 = vmax.f32 %v2452_v28, 0.0  ;;  %v2458_v12 = vmax.f32 %v2454_v62, 0.0  ;;  %3596 = vmatprep.subr.bf16.mxu0 %v4112_v16  ;;  %v3597_v61 = vpack.c.bf16 %v3122_v15, %v3121_v58  ;;  %v3124_v28 = vld [vmem:[%s4956_s14 + $0x18] sm:$0xff] }
0x2ee6   :  { %v2459_v35 = vpack.c.bf16 %v2455_v52, %v2455_v52  ;;  %v2461_v42 = vpack.c.bf16 %v2457_v31, %v2457_v31  ;;  %v3600_v62 = vpack.c.bf16 %v3124_v28, %v3123_v59  ;;  %v3125_v52 = vld [vmem:[%s4956_s14 + $0x20] sm:$0xff] }
0x2ee7   :  { %v2460_v46 = vpack.c.bf16 %v2456_v5, %v2456_v5  ;;  %v2462_v44 = vpack.c.bf16 %v2458_v12, %v2458_v12  ;;  %v3126_v5 = vld [vmem:[%s4956_s14 + $0x28] sm:$0xff] }
0x2ee8   :  { %v3603_v12 = vpack.c.bf16 %v3126_v5, %v3125_v52 }
0x2ee9   :  { %2891 = vmatprep.mubr.bf16.mxu1 %v2460_v46  ;;  %v3127_v46 = vld [vmem:[%s4956_s14 + $0x30] sm:$0xff] }
0x2eea   :  { %2892 = vmatmul.mubr.bf16.vlgmr.msra.gmra.mrb[52].mxu1 %v2459_v35  ;;  %v3129_v35 = vld [vmem:[%s4956_s14 + $0x40] sm:$0xff] }
0x2eeb   :  { %2901 = vmatpush1.bf16.msra.mxu1 %v3743_v37  ;;  %2932 = vmatprep.mubr.bf16.mxu1 %v2462_v44 }
0x2eec   :  { %2902 = vmatprep.subr.bf16.mxu1 %v3748_v47  ;;  %v3130_v47 = vld [vmem:[%s4956_s14 + $0x48] sm:$0xff] }
0x2eed   :  { %v3609_v44 = vpack.c.bf16 %v3130_v47, %v3129_v35 }
0x2eef   :  { %2903 = vmatpush1.bf16.msra.mxu1 %v3746_v1  ;;  %v3131_v1 = vld [vmem:[%s4956_s14 + $0x50] sm:$0xff] }
0x2ef0   :  { %2904 = vmatprep.subr.bf16.mxu1 %v3751_v18  ;;  %v3132_v18 = vld [vmem:[%s4956_s14 + $0x58] sm:$0xff] }
0x2ef3   :  { %2905 = vmatpush1.bf16.msra.mxu1 %v3749_v11  ;;  %v3612_v11 = vpack.c.bf16 %v3132_v18, %v3131_v1 }
0x2ef4   :  { %2906 = vmatprep.subr.bf16.mxu1 %v3754_v50  ;;  %v3133_v50 = vld [vmem:[%s4956_s14 + $0x60] sm:$0xff] }
0x2ef7   :  { %2907 = vmatpush1.bf16.msra.mxu1 %v3752_v38  ;;  %v3134_v38 = vld [vmem:[%s4956_s14 + $0x68] sm:$0xff] }
0x2ef8   :  { %2908 = vmatprep.subr.bf16.mxu1 %v3757_v21  ;;  %v3615_v21 = vpack.c.bf16 %v3134_v38, %v3133_v50 }
0x2efb   :  { %2909 = vmatpush1.bf16.msra.mxu1 %v3755_v49  ;;  %v3135_v49 = vld [vmem:[%s4956_s14 + $0x70] sm:$0xff] }
0x2efc   :  { %2910 = vmatprep.subr.bf16.mxu1 %v3760_v29  ;;  %v3136_v29 = vld [vmem:[%s4956_s14 + $0x78] sm:$0xff] }
0x2eff   :  { %2911 = vmatpush1.bf16.msra.mxu1 %v3758_v51  ;;  %v3618_v51 = vpack.c.bf16 %v3136_v29, %v3135_v49 }
0x2f00   :  { %2912 = vmatprep.subr.bf16.mxu1 %v3763_v53 }
0x2f03   :  { %2913 = vmatpush1.bf16.msra.mxu1 %v3761_v14  ;;  %v3392_v14 = vld [vmem:[%s4955_s13] ss:$0 sm:$0xff] }
0x2f04   :  { %2914 = vmatprep.subr.bf16.mxu1 %v3766_v54 }
0x2f07   :  { %2915 = vmatpush1.bf16.msra.mxu1 %v3764_v55 }
0x2f08   :  { %2916 = vmatprep.subr.bf16.mxu1 %v3769_v56 }
0x2f0b   :  { %2917 = vmatpush1.bf16.msra.mxu1 %v3767_v17 }
0x2f0c   :  { %2918 = vmatprep.subr.bf16.mxu1 %v3772_v60 }
0x2f0f   :  { %2919 = vmatpush1.bf16.msra.mxu1 %v3770_v27 }
0x2f10   :  { %2920 = vmatprep.subr.bf16.mxu1 %v3775_v63  ;;  %v3409_v63 = vld [vmem:[#allocation3] ss:$0 sm:$0xff] }
0x2f13   :  { %2921 = vmatpush1.bf16.msra.mxu1 %v3773_v2 }
0x2f14   :  { %2922 = vmatprep.subr.bf16.mxu1 %v3778_v8 }
0x2f17   :  { %2923 = vmatpush1.bf16.msra.mxu1 %v3776_v48 }
0x2f18   :  { %2924 = vmatprep.subr.bf16.mxu1 %v3781_v10 }
0x2f1b   :  { %2925 = vmatpush1.bf16.msra.mxu1 %v3779_v13 }
0x2f1c   :  { %2926 = vmatprep.subr.bf16.mxu1 %v3784_v30 }
0x2f1f   :  { %2927 = vmatpush1.bf16.msra.mxu1 %v3782_v20 }
0x2f20   :  { %2928 = vmatprep.subr.bf16.mxu1 %v3787_v19 }
0x2f23   :  { %2929 = vmatpush1.bf16.msra.mxu1 %v3785_v23 }
0x2f24   :  { %2930 = vmatprep.subr.bf16.mxu1 %v3790_v9 }
0x2f27   :  { %2931 = vmatpush1.bf16.msra.mxu1 %v3788_v25 }
0x2f2a   :  { %2933 = vmatmul.mubr.bf16.vlgmr.msra.gmra.mrb[52].mxu1 %v2461_v42 }
0x2ffd   :  { %v2934_v24 = vpop.f32.mrb[52].mxu1 }
0x2ffe   :  { %v3620_v7 = vadd.f32 %v2934_v24, %v2532_v26  ;;  %v2936_v3 = vpop.f32.mrb[53].mxu1 }
0x2fff   :  { %v3621_v36 = vadd.f32 %v2936_v3, %v2536_v34  ;;  %v2938_v39 = vpop.f32.mrb[54].mxu1 }
0x3000   :  { %v2941_v43 = vmax.f32 %v3620_v7, 0.0  ;;  %v2939_v4 = vpop.f32.mrb[55].mxu1 }
0x3001   :  { %v2942_v40 = vmax.f32 %v3621_v36, 0.0 }
0x3002   :  { %v2943_v41 = vpack.c.bf16 %v2941_v43, %v2941_v43 }
0x3003   :  { %v2944_v45 = vpack.c.bf16 %v2942_v40, %v2942_v40 }
0x3005   :  { %3112 = vmatprep.mubr.bf16.mxu0 %v2944_v45 }
0x3006   :  { %3113 = vmatmul.mubr.bf16.vlgmr.msra.gmra.mrb[84].mxu0 %v2943_v41 }
0x3007   :  { %3598 = vmatpush3.bf16.msra.mxu0 %v3597_v61  ;;  %3593 = vmatprep.mubr.msk.f32.mxu0 %vm4111_vm11, %v4108_v22  ;;  %v3128_v22 = vld [vmem:[%s4956_s14 + $0x38] sm:$0xff] }
0x3008   :  { %3599 = vmatprep.subr.bf16.mxu0 %v4112_v16  ;;  %v3606_v37 = vpack.c.bf16 %v3128_v22, %v3127_v46 }
0x300b   :  { %3601 = vmatpush3.bf16.msra.mxu0 %v3600_v62 }
0x300c   :  { %3602 = vmatprep.subr.bf16.mxu0 %v4112_v16 }
0x300f   :  { %3604 = vmatpush3.bf16.msra.mxu0 %v3603_v12 }
0x3010   :  { %3605 = vmatprep.subr.bf16.mxu0 %v4112_v16 }
0x3013   :  { %3607 = vmatpush3.bf16.msra.mxu0 %v3606_v37 }
0x3014   :  { %3608 = vmatprep.subr.bf16.mxu0 %v4112_v16 }
0x3017   :  { %3610 = vmatpush3.bf16.msra.mxu0 %v3609_v44 }
0x3018   :  { %3611 = vmatprep.subr.bf16.mxu0 %v4112_v16 }
0x301b   :  { %3613 = vmatpush3.bf16.msra.mxu0 %v3612_v11 }
0x301c   :  { %3614 = vmatprep.subr.bf16.mxu0 %v4112_v16 }
0x301f   :  { %3616 = vmatpush3.bf16.msra.mxu0 %v3615_v21 }
0x3020   :  { %3617 = vmatprep.subr.bf16.mxu0 %v4112_v16 }
0x3023   :  { %3619 = vmatpush3.bf16.msra.mxu0 %v3618_v51 }
0x30d9   :  { %v3458_v53 = vpop.f32.mrb[84].mxu0 }
0x30da   :  { %v3459_v54 = vpop.f32.mrb[85].mxu0 }
0x30db   :  { %v3460_v55 = vadd.f32 %v3459_v54, %v3458_v53  ;;  %v3461_v56 = vpop.f32.mrb[86].mxu0 }
0x30dc   :  { %v3462_v17 = vpop.f32.mrb[87].mxu0 }
0x30dd   :  { %v3115_v60 = vadd.f32 %v3460_v55, %v3392_v14 }
0x30df   :  { %v3120_v27 = vmax.f32 %v3115_v60, 0.0 }
0x30e1   :  { %3594 = vmatmul.mubr.f32.vlgmr.msra.gmra.mrb[88].mxu0 %v3120_v27 }
0x31b4   :  { %v3210_v2 = vpop.f32.mrb[88].mxu0 }
0x31b5   :  { %v3211_v8 = vadd.f32 %v3409_v63, %v3210_v2  ;;  %v3595_v48 = vpop.f32.mrb[89].mxu0 }
0x31b7   :  { %3215 = vst.msk [vmem:[%s4958_s16] sm:$0xff] %vm3214_vm12, %v3211_v8 }
0x31b8   :  { %3220 = vsyncpa [#allocation5], 1 }
0x31b9   :  { %3221 = vsyncpa [#allocation7], 1 }
0x31ba   :  { %3222 = vsyncpa [#allocation10], 1 }

</bundles_post_ra>
